<compile_context>
chip_gen: v5e
topology: v5e:2x2
jax: 0.10.0
libtpu: 0.0.40
codegen_flags: <defaults>
</compile_context>

<pallas_src>
import functools

import jax
import jax.numpy as jnp
from jax.experimental import pallas as pl
from jax.experimental.pallas import tpu as pltpu


def _ceil_to(x, m):
    return ((x + m - 1) // m) * m


def _vmem_limit_bytes():
    try:
        kind = jax.devices()[0].device_kind.lower()
    except Exception:
        kind = ""
    if "v5" in kind or "v6" in kind:
        return 100 * 1024 * 1024   # 128 MiB physical VMEM on v5e/v6e
    return 48 * 1024 * 1024        # headroom under v7x's 64 MiB (and safe default)


# --------------------------------------------------------------------------
# LSTM kernel: grid = (batch tiles [parallel], time chunks [arbitrary]).
# Layer-major inside a chunk: batched X@Wih for all TT steps, then the
# sequential recurrence with only the small h@Whh matmul per step.
# --------------------------------------------------------------------------
def _lstm_kernel(num_layers, chunk_len, batch_tile, hidden_pad, x_ref, *refs):
    # refs = [Wih_0, Whh_0, b_0, ..., out, h_scr, c_scr, act_scr, gates_scr]
    w_refs = refs[:3 * num_layers]
    out_ref = refs[3 * num_layers]
    h_scr, c_scr, act_scr, gates_scr = refs[3 * num_layers + 1:]

    TT, TB, Hp = chunk_len, batch_tile, hidden_pad
    Ep = x_ref.shape[-1]

    # Fresh recurrent state at the first time chunk of each batch tile.
    @pl.when(pl.program_id(1) == 0)
    def _():
        h_scr[...] = jnp.zeros_like(h_scr)
        c_scr[...] = jnp.zeros_like(c_scr)

    for l in range(num_layers):
        wih_ref = w_refs[3 * l]
        whh_ref = w_refs[3 * l + 1]
        b_ref = w_refs[3 * l + 2]
        is_last = (l == num_layers - 1)

        # Batched input projection (+ bias, folded in once per chunk per layer):
        # one large-M bf16 matmul over the whole time chunk.
        if l == 0:
            xin = x_ref[...].reshape(TT * TB, Ep)
        else:
            xin = act_scr[...]
        gates_scr[...] = (jnp.dot(xin, wih_ref[...],
                                  preferred_element_type=jnp.float32)
                          + b_ref[...])

        # Sequential recurrence: only the (TB,Hp)@(Hp,4Hp) GEMM per step.
        @pl.loop(0, TT)
        def _step(t, l=l, is_last=is_last, whh_ref=whh_ref):
            row = pl.multiple_of(t * TB, TB)
            # bf16 MXU operands, f32 accumulation; recurrent state stays f32.
            g = (gates_scr[pl.ds(row, TB), :]
                 + jnp.dot(h_scr[l].astype(jnp.bfloat16), whh_ref[...],
                           preferred_element_type=jnp.float32))
            i_g = jax.nn.sigmoid(g[:, 0 * Hp:1 * Hp])
            f_g = jax.nn.sigmoid(g[:, 1 * Hp:2 * Hp])
            g_g = jnp.tanh(g[:, 2 * Hp:3 * Hp])
            o_g = jax.nn.sigmoid(g[:, 3 * Hp:4 * Hp])
            c_new = f_g * c_scr[l] + i_g * g_g
            h_new = o_g * jnp.tanh(c_new)
            h_scr[l] = h_new
            c_scr[l] = c_new
            if is_last:
                out_ref[t] = h_new.astype(jnp.bfloat16)
            else:
                act_scr[pl.ds(row, TB), :] = h_new.astype(jnp.bfloat16)


def lstm_forward(x_tbe, fused_params, batch_tile, time_chunk, vmem_limit):
    """x_tbe: (T_pad, B_pad, Ep) bf16 (zero padded).
    fused_params: list of (Wih(Ein_pad,4Hp) bf16, Whh(Hp,4Hp) bf16, b(1,4Hp) f32).
    Returns (T_pad, B_pad, Hp) bf16 last-layer hiddens."""
    T_pad, B_pad, Ep = x_tbe.shape
    Hp = fused_params[0][1].shape[0]
    L = len(fused_params)
    TB, TT = batch_tile, time_chunk
    assert B_pad % TB == 0 and T_pad % TT == 0

    flat_weights = [w for triple in fused_params for w in triple]

    def build(single_buffer_weights):
        wkw = {"pipeline_mode": pl.Buffered(1)} if single_buffer_weights else {}
        in_specs = [pl.BlockSpec((TT, TB, Ep), lambda b, tc: (tc, b, 0))]
        for w in flat_weights:
            # Constant block index -> weights stay VMEM-resident across the grid.
            in_specs.append(pl.BlockSpec(w.shape, lambda b, tc: (0, 0), **wkw))
        return pl.pallas_call(
            functools.partial(_lstm_kernel, L, TT, TB, Hp),
            out_shape=jax.ShapeDtypeStruct((T_pad, B_pad, Hp), jnp.bfloat16),
            grid_spec=pltpu.PrefetchScalarGridSpec(
                num_scalar_prefetch=0,
                grid=(B_pad // TB, T_pad // TT),   # batch outer/parallel, time inner/arbitrary
                in_specs=in_specs,
                out_specs=pl.BlockSpec((TT, TB, Hp), lambda b, tc: (tc, b, 0)),
                scratch_shapes=[
                    pltpu.VMEM((L, TB, Hp), jnp.float32),        # h state (carried)
                    pltpu.VMEM((L, TB, Hp), jnp.float32),        # c state (carried)
                    pltpu.VMEM((TT * TB, Hp), jnp.bfloat16),     # inter-layer activations
                    pltpu.VMEM((TT * TB, 4 * Hp), jnp.float32),  # chunk gate pre-activations
                ]),
            compiler_params=pltpu.CompilerParams(
                dimension_semantics=("parallel", "arbitrary"),
                vmem_limit_bytes=vmem_limit),
        )

    try:
        # Weights never change block index: a single buffer halves their VMEM.
        return build(True)(x_tbe, *flat_weights)
    except Exception:
        return build(False)(x_tbe, *flat_weights)


# --------------------------------------------------------------------------
# Linear kernel: (N, Hp)bf16 @ (Hp, Vp)bf16 + (1, Vp)f32, lane-dense tiles.
# Vocab tiles are the OUTER grid axis so W is streamed from HBM exactly once.
# --------------------------------------------------------------------------
def _linear_kernel(h_ref, w_ref, b_ref, o_ref):
    o_ref[...] = (jnp.dot(h_ref[...], w_ref[...],
                          preferred_element_type=jnp.float32) + b_ref[...])


def linear_forward(h, w, b, v_true, vmem_limit):
    """h: (N, Hp) bf16; w: (Hp, Vp) bf16; b: (1, Vp) f32. Returns (N, v_true) f32."""
    N, Hp = h.shape
    Vp = w.shape[1]

    TN = 256 if N > 256 else _ceil_to(max(N, 1), 16)
    N_pad = _ceil_to(N, TN)
    if Vp % 512 == 0:
        TV = 512
    elif Vp % 256 == 0:
        TV = 256
    else:
        TV = 128

    h_p = jnp.pad(h, ((0, N_pad - N), (0, 0)))

    # TODO(synk): add a K grid axis + f32 VMEM accumulator if H grows very large.
    out = pl.pallas_call(
        _linear_kernel,
        out_shape=jax.ShapeDtypeStruct((N_pad, Vp), jnp.float32),
        grid_spec=pltpu.PrefetchScalarGridSpec(
            num_scalar_prefetch=0,
            # Vocab outer, rows inner: W/bias blocks depend only on the outer index,
            # so the dominant vocab weight is fetched once while h tiles re-stream.
            grid=(Vp // TV, N_pad // TN),
            in_specs=[pl.BlockSpec((TN, Hp), lambda j, i: (i, 0)),
                      pl.BlockSpec((Hp, TV), lambda j, i: (0, j)),
                      pl.BlockSpec((1, TV), lambda j, i: (0, j))],
            out_specs=pl.BlockSpec((TN, TV), lambda j, i: (i, j)),
        ),
        compiler_params=pltpu.CompilerParams(
            dimension_semantics=("parallel", "arbitrary"),
            vmem_limit_bytes=vmem_limit),
    )(h_p, w, b)
    return out[:N, :v_true]


# --------------------------------------------------------------------------
# One-time weight fusing + zero padding + bf16 cast (padded hidden/input
# positions stay exactly 0: zero preactivation -> i=f=o=0.5, g=0 -> c,h stay 0;
# the invariant survives the bf16 cast since zeros are exact).
# --------------------------------------------------------------------------
def _fuse_and_pad_layer(wih_g, whh_g, bias_g, in_pad, Hp):
    """wih_g: (4, Ein, H), whh_g: (4, H, H), bias_g: (4, 1, H) (= b_ih + b_hh).
    Returns Wih_cat (in_pad, 4Hp), Whh_cat (Hp, 4Hp), b_cat (1, 4Hp)."""
    H = whh_g.shape[-1]
    Ein = wih_g.shape[1]

    def cat_pad_gates(w):                       # (4, R, H) -> (R, 4*Hp)
        w = jnp.pad(w, ((0, 0), (0, 0), (0, Hp - H)))
        return jnp.concatenate([w[k] for k in range(4)], axis=-1)

    wih = jnp.pad(cat_pad_gates(wih_g), ((0, in_pad - Ein), (0, 0)))
    whh = jnp.pad(cat_pad_gates(whh_g), ((0, Hp - H), (0, 0)))
    bias = cat_pad_gates(bias_g)                # (1, 4*Hp)
    return wih, whh, bias


def prepare_params(params):
    """One-time fuse/pad/cast of weights (kept out of the per-call forward path)."""
    E = params["embed"].shape[1]
    H = params["lstm"][0][1].shape[-1]
    V = params["linear_w_t"].shape[1]
    Ep, Hp, Vp = _ceil_to(E, 128), _ceil_to(H, 128), _ceil_to(V, 128)

    fused = []
    for l, (wih_g, whh_g, bias_g) in enumerate(params["lstm"]):
        in_pad = Ep if l == 0 else Hp
        wih, whh, bias = _fuse_and_pad_layer(wih_g, whh_g, bias_g, in_pad, Hp)
        fused.append((wih.astype(jnp.bfloat16), whh.astype(jnp.bfloat16), bias))

    lin_w = jnp.pad(params["linear_w_t"],
                    ((0, Hp - H), (0, Vp - V))).astype(jnp.bfloat16)
    lin_b = jnp.pad(params["linear_b"], (0, Vp - V)).reshape(1, Vp)
    return {"embed": params["embed"], "lstm_fused": fused,
            "linear_w": lin_w, "linear_b": lin_b,
            "dims": (E, H, V, Ep, Hp, Vp)}


# --------------------------------------------------------------------------
# DecoderRNN forward
# --------------------------------------------------------------------------
def decoder_rnn_forward(prep, features, captions, lengths, *, time_chunk=32):
    """features: (B, E) f32; captions: (B, Tc) int32; lengths: python list (sorted desc)."""
    E, H, V, Ep, Hp, Vp = prep["dims"]
    B = features.shape[0]

    # Glue: embedding lookup + <feature, caption embeddings> concat (XLA gather).
    emb = prep["embed"][captions]                                       # (B, Tc, E)
    embeddings = jnp.concatenate([features[:, None, :], emb], axis=1)   # (B, T1, E)
    T1 = embeddings.shape[1]

    # Batch to x16 sublanes (bf16 slabs), E/H to x128 lanes; give v7x's two
    # TensorCores >=2 parallel batch tiles when B is large enough.
    B16 = _ceil_to(B, 16)
    if B16 >= 32:
        TB = min(_ceil_to(B16 // 2, 16), 128)
    else:
        TB = B16
    B_pad = _ceil_to(B16, TB)

    TT = max(1, min(time_chunk, T1))
    T_pad = _ceil_to(T1, TT)

    x_tbe = jnp.transpose(embeddings, (1, 0, 2))                        # (T1, B, E)
    x_tbe = jnp.pad(x_tbe, ((0, T_pad - T1), (0, B_pad - B), (0, Ep - E)))
    x_tbe = x_tbe.astype(jnp.bfloat16)

    vmem_limit = _vmem_limit_bytes()
    hiddens = lstm_forward(x_tbe, prep["lstm_fused"], TB, TT, vmem_limit)  # (T_pad,B_pad,Hp) bf16

    # pack_padded_sequence ordering, gathered straight from the time-major slab
    # (flat row index = t * B_pad + b; no (T,B,H)->(B,T,H) transpose).
    # TODO(synk): fuse this gather into the linear kernel via scalar-prefetched row
    # indices (pl.Element) to avoid the packed_h HBM round-trip and the
    # per-lengths-pattern retrace.
    flat_idx = []
    for t in range(T1):
        for b in range(B):
            if lengths[b] > t:
                flat_idx.append(t * B_pad + b)
    packed_h = hiddens.reshape(T_pad * B_pad, Hp)[jnp.array(flat_idx, jnp.int32)]

    return linear_forward(packed_h, prep["linear_w"], prep["linear_b"], V, vmem_limit)


# --------------------------------------------------------------------------
# Pure-JAX f32 reference (for correctness check)
# --------------------------------------------------------------------------
def reference_forward(params, features, captions, lengths):
    emb = params["embed"][captions]
    embeddings = jnp.concatenate([features[:, None, :], emb], axis=1)
    B, T1, E = embeddings.shape
    H = params["lstm"][0][1].shape[-1]

    x = jnp.transpose(embeddings, (1, 0, 2))  # (T1, B, E)
    for (wih, whh, bias) in params["lstm"]:
        h = jnp.zeros((B, H), jnp.float32)
        c = jnp.zeros((B, H), jnp.float32)

        def step(carry, xt, wih=wih, whh=whh, bias=bias):
            h, c = carry
            g = [xt @ wih[k] + h @ whh[k] + bias[k] for k in range(4)]
            i = jax.nn.sigmoid(g[0]); f = jax.nn.sigmoid(g[1])
            gg = jnp.tanh(g[2]); o = jax.nn.sigmoid(g[3])
            c = f * c + i * gg
            h = o * jnp.tanh(c)
            return (h, c), h

        (_, _), outs = jax.lax.scan(step, (h, c), x)
        x = outs
    hiddens_bth = jnp.transpose(x, (1, 0, 2))
    bs_idx, ts_idx = [], []
    for t in range(T1):
        for b in range(B):
            if lengths[b] > t:
                bs_idx.append(b); ts_idx.append(t)
    packed_h = hiddens_bth[jnp.array(bs_idx), jnp.array(ts_idx)]
    return packed_h @ params["linear_w_t"] + params["linear_b"]


# --------------------------------------------------------------------------
# Deterministic parameter init (mirrors DecoderRNN.__init__ / init_weights)
# --------------------------------------------------------------------------
def init_params(key, embed_size, hidden_size, vocab_size, num_layers):
    keys = jax.random.split(key, 2 + 4 * num_layers)
    params = {}
    params["embed"] = jax.random.uniform(keys[0], (vocab_size, embed_size),
                                         jnp.float32, -0.1, 0.1)
    params["linear_w_t"] = jax.random.uniform(keys[1], (hidden_size, vocab_size),
                                              jnp.float32, -0.1, 0.1)
    params["linear_b"] = jnp.zeros((vocab_size,), jnp.float32)

    k = 1.0 / jnp.sqrt(hidden_size)
    lstm = []
    for l in range(num_layers):
        in_dim = embed_size if l == 0 else hidden_size
        kw = keys[2 + 4 * l: 2 + 4 * (l + 1)]
        wih = jax.random.uniform(kw[0], (4, in_dim, hidden_size), jnp.float32, -k, k)
        whh = jax.random.uniform(kw[1], (4, hidden_size, hidden_size), jnp.float32, -k, k)
        b_ih = jax.random.uniform(kw[2], (4, 1, hidden_size), jnp.float32, -k, k)
        b_hh = jax.random.uniform(kw[3], (4, 1, hidden_size), jnp.float32, -k, k)
        lstm.append((wih, whh, b_ih + b_hh))
    params["lstm"] = lstm
    return params


if __name__ == "__main__":
    # Small, deterministic example.
    B, E, H, V, L = 4, 32, 32, 100, 2
    Tc = 8                       # caption length; LSTM sequence has T1 = Tc + 1
    lengths = [9, 8, 7, 5]       # sorted descending, as required by pack_padded_sequence

    key = jax.random.PRNGKey(0)
    k_param, k_feat, k_cap = jax.random.split(key, 3)
    params = init_params(k_param, E, H, V, L)
    prep = prepare_params(params)   # one-time fuse/pad/bf16 cast

    features = jax.random.normal(k_feat, (B, E), jnp.float32)
    captions = jax.random.randint(k_cap, (B, Tc), 0, V, dtype=jnp.int32)

    # time_chunk=4 -> 3 chunks at T1=9: exercises the cross-chunk state carry.
    out = decoder_rnn_forward(prep, features, captions, lengths, time_chunk=4)
    out = jax.block_until_ready(out)

    ref = reference_forward(params, features, captions, lengths)
    assert out.shape == (sum(lengths), V), out.shape
    # Loose tolerance: kernel uses bf16 weights/activation slabs vs a pure-f32 reference.
    max_err = float(jnp.max(jnp.abs(out - ref)))
    assert jnp.allclose(out, ref, atol=8e-2, rtol=8e-2), f"mismatch vs reference, max_abs_err={max_err}"

    print("KERNEL_OK")
</pallas_src>

<mosaic_0001>
module attributes {stable_mosaic.version = 11 : i64} {
  func.func @_lstm_kernel(%arg0: i32, %arg1: i32, %arg2: memref<4x16x128xbf16, #tpu.memory_space<vmem>>, %arg3: memref<128x512xbf16, #tpu.memory_space<vmem>>, %arg4: memref<128x512xbf16, #tpu.memory_space<vmem>>, %arg5: memref<1x512xf32, #tpu.memory_space<vmem>>, %arg6: memref<128x512xbf16, #tpu.memory_space<vmem>>, %arg7: memref<128x512xbf16, #tpu.memory_space<vmem>>, %arg8: memref<1x512xf32, #tpu.memory_space<vmem>>, %arg9: memref<4x16x128xbf16, #tpu.memory_space<vmem>>, %arg10: memref<2x16x128xf32, #tpu.memory_space<vmem>>, %arg11: memref<2x16x128xf32, #tpu.memory_space<vmem>>, %arg12: memref<64x128xbf16, #tpu.memory_space<vmem>>, %arg13: memref<64x512xf32, #tpu.memory_space<vmem>>) attributes {dimension_semantics = [#tpu.dimension_semantics<parallel>, #tpu.dimension_semantics<arbitrary>], iteration_bounds = array<i64: 1, 3>, scalar_prefetch = 0 : i64, scratch_operands = 4 : i64, tpu.core_type = #tpu.core_type<tc>, window_params = [{transform_indices = @transform_0, window_bounds = array<i64: 4, 16, 128>}, {pipeline_mode = #tpu.pipeline_mode<synchronous>, transform_indices = @transform_1, window_bounds = array<i64: 128, 512>}, {pipeline_mode = #tpu.pipeline_mode<synchronous>, transform_indices = @transform_2, window_bounds = array<i64: 128, 512>}, {pipeline_mode = #tpu.pipeline_mode<synchronous>, transform_indices = @transform_3, window_bounds = array<i64: 1, 512>}, {pipeline_mode = #tpu.pipeline_mode<synchronous>, transform_indices = @transform_4, window_bounds = array<i64: 128, 512>}, {pipeline_mode = #tpu.pipeline_mode<synchronous>, transform_indices = @transform_5, window_bounds = array<i64: 128, 512>}, {pipeline_mode = #tpu.pipeline_mode<synchronous>, transform_indices = @transform_6, window_bounds = array<i64: 1, 512>}, {transform_indices = @transform_7, window_bounds = array<i64: 4, 16, 128>}]} {
    %c0_i32 = arith.constant 0 : i32
    %0 = arith.cmpi eq, %arg1, %c0_i32 : i32
    %1 = arith.extui %0 : i1 to i32
    %c0_i32_0 = arith.constant 0 : i32
    %2 = arith.cmpi ne, %1, %c0_i32_0 : i32
    scf.if %2 {
      %cst_24 = arith.constant 0.000000e+00 : f32
      %20 = vector.broadcast %cst_24 : f32 to vector<2x16x128xf32>
      %c0_25 = arith.constant 0 : index
      %c0_26 = arith.constant 0 : index
      %c0_27 = arith.constant 0 : index
      %21 = vector.load %arg10[%c0_25, %c0_26, %c0_27] : memref<2x16x128xf32, #tpu.memory_space<vmem>>, vector<2x16x128xf32>
      tpu.vector_store %arg10[%c0_25, %c0_26, %c0_27], %20 {strides = array<i32>} : memref<2x16x128xf32, #tpu.memory_space<vmem>>, vector<2x16x128xf32>,
      %cst_28 = arith.constant 0.000000e+00 : f32
      %22 = vector.broadcast %cst_28 : f32 to vector<2x16x128xf32>
      %c0_29 = arith.constant 0 : index
      %c0_30 = arith.constant 0 : index
      %c0_31 = arith.constant 0 : index
      %23 = vector.load %arg11[%c0_29, %c0_30, %c0_31] : memref<2x16x128xf32, #tpu.memory_space<vmem>>, vector<2x16x128xf32>
      tpu.vector_store %arg11[%c0_29, %c0_30, %c0_31], %22 {strides = array<i32>} : memref<2x16x128xf32, #tpu.memory_space<vmem>>, vector<2x16x128xf32>,
    } else {
    }
    %c0 = arith.constant 0 : index
    %c0_1 = arith.constant 0 : index
    %c0_2 = arith.constant 0 : index
    %3 = vector.load %arg2[%c0, %c0_1, %c0_2] : memref<4x16x128xbf16, #tpu.memory_space<vmem>>, vector<4x16x128xbf16>
    %4 = vector.shape_cast %3 : vector<4x16x128xbf16> to vector<64x128xbf16>
    %c0_3 = arith.constant 0 : index
    %c0_4 = arith.constant 0 : index
    %5 = vector.load %arg3[%c0_3, %c0_4] : memref<128x512xbf16, #tpu.memory_space<vmem>>, vector<128x512xbf16>
    %cst = arith.constant dense<0.000000e+00> : vector<64x512xf32>
    %6 = tpu.matmul %4, %5, %cst {dimension_numbers = #tpu.dot_dimension_numbers<[1], [0], [0], [1], [0, 0, 1, 1], [], []>} : vector<64x128xbf16>, vector<128x512xbf16>, vector<64x512xf32> -> vector<64x512xf32>
    %c0_5 = arith.constant 0 : index
    %c0_6 = arith.constant 0 : index
    %7 = vector.load %arg5[%c0_5, %c0_6] : memref<1x512xf32, #tpu.memory_space<vmem>>, vector<1x512xf32>
    %8 = vector.broadcast %7 : vector<1x512xf32> to vector<64x512xf32>
    %9 = arith.addf %6, %8 : vector<64x512xf32>
    %c0_7 = arith.constant 0 : index
    %c0_8 = arith.constant 0 : index
    %10 = vector.load %arg13[%c0_7, %c0_8] : memref<64x512xf32, #tpu.memory_space<vmem>>, vector<64x512xf32>
    tpu.vector_store %arg13[%c0_7, %c0_8], %9 {strides = array<i32>} : memref<64x512xf32, #tpu.memory_space<vmem>>, vector<64x512xf32>,
    %c0_i32_9 = arith.constant 0 : i32
    %c4_i32 = arith.constant 4 : i32
    %11 = arith.addi %c0_i32_9, %c4_i32 : i32
    %c1_i32 = arith.constant 1 : i32
    scf.for %arg14 = %c0_i32_9 to %11 step %c1_i32  : i32 {
      %c1_i32_24 = arith.constant 1 : i32
      %20 = arith.muli %arg14, %c1_i32_24 : i32
      %c0_i32_25 = arith.constant 0 : i32
      %21 = arith.addi %c0_i32_25, %20 : i32
      %c16_i32 = arith.constant 16 : i32
      %22 = arith.muli %21, %c16_i32 : i32
      %23 = tpu.assume_multiple %22, 16 : i32
      %24 = arith.index_cast %23 : i32 to index
      %c0_26 = arith.constant 0 : index
      %25 = vector.load %arg13[%24, %c0_26] : memref<64x512xf32, #tpu.memory_space<vmem>>, vector<16x512xf32>
      %c0_27 = arith.constant 0 : index
      %c0_28 = arith.constant 0 : index
      %c0_29 = arith.constant 0 : index
      %26 = vector.load %arg10[%c0_27, %c0_28, %c0_29] : memref<2x16x128xf32, #tpu.memory_space<vmem>>, vector<1x16x128xf32>
      %27 = vector.shape_cast %26 : vector<1x16x128xf32> to vector<16x128xf32>
      %28 = arith.truncf %27 : vector<16x128xf32> to vector<16x128xbf16>
      %c0_30 = arith.constant 0 : index
      %c0_31 = arith.constant 0 : index
      %29 = vector.load %arg4[%c0_30, %c0_31] : memref<128x512xbf16, #tpu.memory_space<vmem>>, vector<128x512xbf16>
      %cst_32 = arith.constant dense<0.000000e+00> : vector<16x512xf32>
      %30 = tpu.matmul %28, %29, %cst_32 {dimension_numbers = #tpu.dot_dimension_numbers<[1], [0], [0], [1], [0, 0, 1, 1], [], []>} : vector<16x128xbf16>, vector<128x512xbf16>, vector<16x512xf32> -> vector<16x512xf32>
      %31 = arith.addf %25, %30 : vector<16x512xf32>
      %32 = vector.extract_strided_slice %31 {offsets = [0, 0], sizes = [16, 128], strides = [1, 1]} : vector<16x512xf32> to vector<16x128xf32>
      %33 = arith.negf %32 : vector<16x128xf32>
      %34 = math.exp %33 : vector<16x128xf32>
      %cst_33 = arith.constant 1.000000e+00 : f32
      %35 = vector.broadcast %cst_33 : f32 to vector<16x128xf32>
      %36 = arith.addf %35, %34 : vector<16x128xf32>
      %37 = arith.divf %35, %36 : vector<16x128xf32>
      %38 = vector.extract_strided_slice %31 {offsets = [0, 128], sizes = [16, 128], strides = [1, 1]} : vector<16x512xf32> to vector<16x128xf32>
      %39 = arith.negf %38 : vector<16x128xf32>
      %40 = math.exp %39 : vector<16x128xf32>
      %cst_34 = arith.constant 1.000000e+00 : f32
      %41 = vector.broadcast %cst_34 : f32 to vector<16x128xf32>
      %42 = arith.addf %41, %40 : vector<16x128xf32>
      %43 = arith.divf %41, %42 : vector<16x128xf32>
      %44 = vector.extract_strided_slice %31 {offsets = [0, 256], sizes = [16, 128], strides = [1, 1]} : vector<16x512xf32> to vector<16x128xf32>
      %45 = math.tanh %44 : vector<16x128xf32>
      %46 = vector.extract_strided_slice %31 {offsets = [0, 384], sizes = [16, 128], strides = [1, 1]} : vector<16x512xf32> to vector<16x128xf32>
      %47 = arith.negf %46 : vector<16x128xf32>
      %48 = math.exp %47 : vector<16x128xf32>
      %cst_35 = arith.constant 1.000000e+00 : f32
      %49 = vector.broadcast %cst_35 : f32 to vector<16x128xf32>
      %50 = arith.addf %49, %48 : vector<16x128xf32>
      %51 = arith.divf %49, %50 : vector<16x128xf32>
      %c0_36 = arith.constant 0 : index
      %c0_37 = arith.constant 0 : index
      %c0_38 = arith.constant 0 : index
      %52 = vector.load %arg11[%c0_36, %c0_37, %c0_38] : memref<2x16x128xf32, #tpu.memory_space<vmem>>, vector<1x16x128xf32>
      %53 = vector.shape_cast %52 : vector<1x16x128xf32> to vector<16x128xf32>
      %54 = arith.mulf %43, %53 : vector<16x128xf32>
      %55 = arith.mulf %37, %45 : vector<16x128xf32>
      %56 = arith.addf %54, %55 : vector<16x128xf32>
      %57 = math.tanh %56 : vector<16x128xf32>
      %58 = arith.mulf %51, %57 : vector<16x128xf32>
      %c0_39 = arith.constant 0 : index
      %c0_40 = arith.constant 0 : index
      %c0_41 = arith.constant 0 : index
      %59 = vector.load %arg10[%c0_39, %c0_40, %c0_41] : memref<2x16x128xf32, #tpu.memory_space<vmem>>, vector<1x16x128xf32>
      %60 = vector.shape_cast %59 : vector<1x16x128xf32> to vector<16x128xf32>
      %61 = vector.shape_cast %58 : vector<16x128xf32> to vector<1x16x128xf32>
      tpu.vector_store %arg10[%c0_39, %c0_40, %c0_41], %61 {strides = array<i32>} : memref<2x16x128xf32, #tpu.memory_space<vmem>>, vector<1x16x128xf32>,
      %c0_42 = arith.constant 0 : index
      %c0_43 = arith.constant 0 : index
      %c0_44 = arith.constant 0 : index
      %62 = vector.load %arg11[%c0_42, %c0_43, %c0_44] : memref<2x16x128xf32, #tpu.memory_space<vmem>>, vector<1x16x128xf32>
      %63 = vector.shape_cast %62 : vector<1x16x128xf32> to vector<16x128xf32>
      %64 = vector.shape_cast %56 : vector<16x128xf32> to vector<1x16x128xf32>
      tpu.vector_store %arg11[%c0_42, %c0_43, %c0_44], %64 {strides = array<i32>} : memref<2x16x128xf32, #tpu.memory_space<vmem>>, vector<1x16x128xf32>,
      %65 = arith.truncf %58 : vector<16x128xf32> to vector<16x128xbf16>
      %66 = arith.index_cast %23 : i32 to index
      %c0_45 = arith.constant 0 : index
      %67 = vector.load %arg12[%66, %c0_45] : memref<64x128xbf16, #tpu.memory_space<vmem>>, vector<16x128xbf16>
      tpu.vector_store %arg12[%66, %c0_45], %65 {strides = array<i32>} : memref<64x128xbf16, #tpu.memory_space<vmem>>, vector<16x128xbf16>,
    }
    %c4_i32_10 = arith.constant 4 : i32
    %c0_11 = arith.constant 0 : index
    %c0_12 = arith.constant 0 : index
    %12 = vector.load %arg12[%c0_11, %c0_12] : memref<64x128xbf16, #tpu.memory_space<vmem>>, vector<64x128xbf16>
    %c0_13 = arith.constant 0 : index
    %c0_14 = arith.constant 0 : index
    %13 = vector.load %arg6[%c0_13, %c0_14] : memref<128x512xbf16, #tpu.memory_space<vmem>>, vector<128x512xbf16>
    %cst_15 = arith.constant dense<0.000000e+00> : vector<64x512xf32>
    %14 = tpu.matmul %12, %13, %cst_15 {dimension_numbers = #tpu.dot_dimension_numbers<[1], [0], [0], [1], [0, 0, 1, 1], [], []>} : vector<64x128xbf16>, vector<128x512xbf16>, vector<64x512xf32> -> vector<64x512xf32>
    %c0_16 = arith.constant 0 : index
    %c0_17 = arith.constant 0 : index
    %15 = vector.load %arg8[%c0_16, %c0_17] : memref<1x512xf32, #tpu.memory_space<vmem>>, vector<1x512xf32>
    %16 = vector.broadcast %15 : vector<1x512xf32> to vector<64x512xf32>
    %17 = arith.addf %14, %16 : vector<64x512xf32>
    %c0_18 = arith.constant 0 : index
    %c0_19 = arith.constant 0 : index
    %18 = vector.load %arg13[%c0_18, %c0_19] : memref<64x512xf32, #tpu.memory_space<vmem>>, vector<64x512xf32>
    tpu.vector_store %arg13[%c0_18, %c0_19], %17 {strides = array<i32>} : memref<64x512xf32, #tpu.memory_space<vmem>>, vector<64x512xf32>,
    %c0_i32_20 = arith.constant 0 : i32
    %c4_i32_21 = arith.constant 4 : i32
    %19 = arith.addi %c0_i32_20, %c4_i32_21 : i32
    %c1_i32_22 = arith.constant 1 : i32
    scf.for %arg14 = %c0_i32_20 to %19 step %c1_i32_22  : i32 {
      %c1_i32_24 = arith.constant 1 : i32
      %20 = arith.muli %arg14, %c1_i32_24 : i32
      %c0_i32_25 = arith.constant 0 : i32
      %21 = arith.addi %c0_i32_25, %20 : i32
      %c16_i32 = arith.constant 16 : i32
      %22 = arith.muli %21, %c16_i32 : i32
      %23 = tpu.assume_multiple %22, 16 : i32
      %24 = arith.index_cast %23 : i32 to index
      %c0_26 = arith.constant 0 : index
      %25 = vector.load %arg13[%24, %c0_26] : memref<64x512xf32, #tpu.memory_space<vmem>>, vector<16x512xf32>
      %c1 = arith.constant 1 : index
      %c0_27 = arith.constant 0 : index
      %c0_28 = arith.constant 0 : index
      %26 = vector.load %arg10[%c1, %c0_27, %c0_28] : memref<2x16x128xf32, #tpu.memory_space<vmem>>, vector<1x16x128xf32>
      %27 = vector.shape_cast %26 : vector<1x16x128xf32> to vector<16x128xf32>
      %28 = arith.truncf %27 : vector<16x128xf32> to vector<16x128xbf16>
      %c0_29 = arith.constant 0 : index
      %c0_30 = arith.constant 0 : index
      %29 = vector.load %arg7[%c0_29, %c0_30] : memref<128x512xbf16, #tpu.memory_space<vmem>>, vector<128x512xbf16>
      %cst_31 = arith.constant dense<0.000000e+00> : vector<16x512xf32>
      %30 = tpu.matmul %28, %29, %cst_31 {dimension_numbers = #tpu.dot_dimension_numbers<[1], [0], [0], [1], [0, 0, 1, 1], [], []>} : vector<16x128xbf16>, vector<128x512xbf16>, vector<16x512xf32> -> vector<16x512xf32>
      %31 = arith.addf %25, %30 : vector<16x512xf32>
      %32 = vector.extract_strided_slice %31 {offsets = [0, 0], sizes = [16, 128], strides = [1, 1]} : vector<16x512xf32> to vector<16x128xf32>
      %33 = arith.negf %32 : vector<16x128xf32>
      %34 = math.exp %33 : vector<16x128xf32>
      %cst_32 = arith.constant 1.000000e+00 : f32
      %35 = vector.broadcast %cst_32 : f32 to vector<16x128xf32>
      %36 = arith.addf %35, %34 : vector<16x128xf32>
      %37 = arith.divf %35, %36 : vector<16x128xf32>
      %38 = vector.extract_strided_slice %31 {offsets = [0, 128], sizes = [16, 128], strides = [1, 1]} : vector<16x512xf32> to vector<16x128xf32>
      %39 = arith.negf %38 : vector<16x128xf32>
      %40 = math.exp %39 : vector<16x128xf32>
      %cst_33 = arith.constant 1.000000e+00 : f32
      %41 = vector.broadcast %cst_33 : f32 to vector<16x128xf32>
      %42 = arith.addf %41, %40 : vector<16x128xf32>
      %43 = arith.divf %41, %42 : vector<16x128xf32>
      %44 = vector.extract_strided_slice %31 {offsets = [0, 256], sizes = [16, 128], strides = [1, 1]} : vector<16x512xf32> to vector<16x128xf32>
      %45 = math.tanh %44 : vector<16x128xf32>
      %46 = vector.extract_strided_slice %31 {offsets = [0, 384], sizes = [16, 128], strides = [1, 1]} : vector<16x512xf32> to vector<16x128xf32>
      %47 = arith.negf %46 : vector<16x128xf32>
      %48 = math.exp %47 : vector<16x128xf32>
      %cst_34 = arith.constant 1.000000e+00 : f32
      %49 = vector.broadcast %cst_34 : f32 to vector<16x128xf32>
      %50 = arith.addf %49, %48 : vector<16x128xf32>
      %51 = arith.divf %49, %50 : vector<16x128xf32>
      %c1_35 = arith.constant 1 : index
      %c0_36 = arith.constant 0 : index
      %c0_37 = arith.constant 0 : index
      %52 = vector.load %arg11[%c1_35, %c0_36, %c0_37] : memref<2x16x128xf32, #tpu.memory_space<vmem>>, vector<1x16x128xf32>
      %53 = vector.shape_cast %52 : vector<1x16x128xf32> to vector<16x128xf32>
      %54 = arith.mulf %43, %53 : vector<16x128xf32>
      %55 = arith.mulf %37, %45 : vector<16x128xf32>
      %56 = arith.addf %54, %55 : vector<16x128xf32>
      %57 = math.tanh %56 : vector<16x128xf32>
      %58 = arith.mulf %51, %57 : vector<16x128xf32>
      %c1_38 = arith.constant 1 : index
      %c0_39 = arith.constant 0 : index
      %c0_40 = arith.constant 0 : index
      %59 = vector.load %arg10[%c1_38, %c0_39, %c0_40] : memref<2x16x128xf32, #tpu.memory_space<vmem>>, vector<1x16x128xf32>
      %60 = vector.shape_cast %59 : vector<1x16x128xf32> to vector<16x128xf32>
      %61 = vector.shape_cast %58 : vector<16x128xf32> to vector<1x16x128xf32>
      tpu.vector_store %arg10[%c1_38, %c0_39, %c0_40], %61 {strides = array<i32>} : memref<2x16x128xf32, #tpu.memory_space<vmem>>, vector<1x16x128xf32>,
      %c1_41 = arith.constant 1 : index
      %c0_42 = arith.constant 0 : index
      %c0_43 = arith.constant 0 : index
      %62 = vector.load %arg11[%c1_41, %c0_42, %c0_43] : memref<2x16x128xf32, #tpu.memory_space<vmem>>, vector<1x16x128xf32>
      %63 = vector.shape_cast %62 : vector<1x16x128xf32> to vector<16x128xf32>
      %64 = vector.shape_cast %56 : vector<16x128xf32> to vector<1x16x128xf32>
      tpu.vector_store %arg11[%c1_41, %c0_42, %c0_43], %64 {strides = array<i32>} : memref<2x16x128xf32, #tpu.memory_space<vmem>>, vector<1x16x128xf32>,
      %65 = arith.truncf %58 : vector<16x128xf32> to vector<16x128xbf16>
      %66 = arith.index_cast %21 : i32 to index
      %c0_44 = arith.constant 0 : index
      %c0_45 = arith.constant 0 : index
      %67 = vector.load %arg9[%66, %c0_44, %c0_45] : memref<4x16x128xbf16, #tpu.memory_space<vmem>>, vector<1x16x128xbf16>
      %68 = vector.shape_cast %67 : vector<1x16x128xbf16> to vector<16x128xbf16>
      %69 = vector.shape_cast %65 : vector<16x128xbf16> to vector<1x16x128xbf16>
      tpu.vector_store %arg9[%66, %c0_44, %c0_45], %69 {strides = array<i32>} : memref<4x16x128xbf16, #tpu.memory_space<vmem>>, vector<1x16x128xbf16>,
    }
    %c4_i32_23 = arith.constant 4 : i32
    return
  }
  func.func @transform_0(%arg0: i32, %arg1: i32) -> (i32, i32, i32) {
    %c0_i32 = arith.constant 0 : i32
    %c0_i32_0 = arith.constant 0 : i32
    return %arg1, %arg0, %c0_i32 : i32, i32, i32
  }
  func.func @transform_1(%arg0: i32, %arg1: i32) -> (i32, i32) {
    %c0_i32 = arith.constant 0 : i32
    %c0_i32_0 = arith.constant 0 : i32
    %c0_i32_1 = arith.constant 0 : i32
    return %c0_i32, %c0_i32_0 : i32, i32
  }
  func.func @transform_2(%arg0: i32, %arg1: i32) -> (i32, i32) {
    %c0_i32 = arith.constant 0 : i32
    %c0_i32_0 = arith.constant 0 : i32
    %c0_i32_1 = arith.constant 0 : i32
    return %c0_i32, %c0_i32_0 : i32, i32
  }
  func.func @transform_3(%arg0: i32, %arg1: i32) -> (i32, i32) {
    %c0_i32 = arith.constant 0 : i32
    %c0_i32_0 = arith.constant 0 : i32
    %c0_i32_1 = arith.constant 0 : i32
    return %c0_i32, %c0_i32_0 : i32, i32
  }
  func.func @transform_4(%arg0: i32, %arg1: i32) -> (i32, i32) {
    %c0_i32 = arith.constant 0 : i32
    %c0_i32_0 = arith.constant 0 : i32
    %c0_i32_1 = arith.constant 0 : i32
    return %c0_i32, %c0_i32_0 : i32, i32
  }
  func.func @transform_5(%arg0: i32, %arg1: i32) -> (i32, i32) {
    %c0_i32 = arith.constant 0 : i32
    %c0_i32_0 = arith.constant 0 : i32
    %c0_i32_1 = arith.constant 0 : i32
    return %c0_i32, %c0_i32_0 : i32, i32
  }
  func.func @transform_6(%arg0: i32, %arg1: i32) -> (i32, i32) {
    %c0_i32 = arith.constant 0 : i32
    %c0_i32_0 = arith.constant 0 : i32
    %c0_i32_1 = arith.constant 0 : i32
    return %c0_i32, %c0_i32_0 : i32, i32
  }
  func.func @transform_7(%arg0: i32, %arg1: i32) -> (i32, i32, i32) {
    %c0_i32 = arith.constant 0 : i32
    %c0_i32_0 = arith.constant 0 : i32
    return %arg1, %arg0, %c0_i32 : i32, i32, i32
  }
}

module attributes {stable_mosaic.version = 11 : i64} {
  func.func @_lstm_kernel(%arg0: i32, %arg1: i32, %arg2: memref<4x16x128xbf16, #tpu.memory_space<vmem>>, %arg3: memref<128x512xbf16, #tpu.memory_space<vmem>>, %arg4: memref<128x512xbf16, #tpu.memory_space<vmem>>, %arg5: memref<1x512xf32, #tpu.memory_space<vmem>>, %arg6: memref<128x512xbf16, #tpu.memory_space<vmem>>, %arg7: memref<128x512xbf16, #tpu.memory_space<vmem>>, %arg8: memref<1x512xf32, #tpu.memory_space<vmem>>, %arg9: memref<4x16x128xbf16, #tpu.memory_space<vmem>>, %arg10: memref<2x16x128xf32, #tpu.memory_space<vmem>>, %arg11: memref<2x16x128xf32, #tpu.memory_space<vmem>>, %arg12: memref<64x128xbf16, #tpu.memory_space<vmem>>, %arg13: memref<64x512xf32, #tpu.memory_space<vmem>>) attributes {dimension_semantics = [#tpu.dimension_semantics<parallel>, #tpu.dimension_semantics<arbitrary>], iteration_bounds = array<i64: 1, 3>, scalar_prefetch = 0 : i64, scratch_operands = 4 : i64, tpu.core_type = #tpu.core_type<tc>, window_params = [{transform_indices = @transform_0, window_bounds = array<i64: 4, 16, 128>}, {pipeline_mode = #tpu.pipeline_mode<synchronous>, transform_indices = @transform_1, window_bounds = array<i64: 128, 512>}, {pipeline_mode = #tpu.pipeline_mode<synchronous>, transform_indices = @transform_2, window_bounds = array<i64: 128, 512>}, {pipeline_mode = #tpu.pipeline_mode<synchronous>, transform_indices = @transform_3, window_bounds = array<i64: 1, 512>}, {pipeline_mode = #tpu.pipeline_mode<synchronous>, transform_indices = @transform_4, window_bounds = array<i64: 128, 512>}, {pipeline_mode = #tpu.pipeline_mode<synchronous>, transform_indices = @transform_5, window_bounds = array<i64: 128, 512>}, {pipeline_mode = #tpu.pipeline_mode<synchronous>, transform_indices = @transform_6, window_bounds = array<i64: 1, 512>}, {transform_indices = @transform_7, window_bounds = array<i64: 4, 16, 128>}]} {
    %c0_i32 = arith.constant 0 : i32
    %0 = arith.cmpi eq, %arg1, %c0_i32 : i32
    %1 = arith.extui %0 : i1 to i32
    %c0_i32_0 = arith.constant 0 : i32
    %2 = arith.cmpi ne, %1, %c0_i32_0 : i32
    scf.if %2 {
      %cst_24 = arith.constant 0.000000e+00 : f32
      %20 = vector.broadcast %cst_24 : f32 to vector<2x16x128xf32>
      %c0_25 = arith.constant 0 : index
      %c0_26 = arith.constant 0 : index
      %c0_27 = arith.constant 0 : index
      %21 = vector.load %arg10[%c0_25, %c0_26, %c0_27] : memref<2x16x128xf32, #tpu.memory_space<vmem>>, vector<2x16x128xf32>
      tpu.vector_store %arg10[%c0_25, %c0_26, %c0_27], %20 {strides = array<i32>} : memref<2x16x128xf32, #tpu.memory_space<vmem>>, vector<2x16x128xf32>,
      %cst_28 = arith.constant 0.000000e+00 : f32
      %22 = vector.broadcast %cst_28 : f32 to vector<2x16x128xf32>
      %c0_29 = arith.constant 0 : index
      %c0_30 = arith.constant 0 : index
      %c0_31 = arith.constant 0 : index
      %23 = vector.load %arg11[%c0_29, %c0_30, %c0_31] : memref<2x16x128xf32, #tpu.memory_space<vmem>>, vector<2x16x128xf32>
      tpu.vector_store %arg11[%c0_29, %c0_30, %c0_31], %22 {strides = array<i32>} : memref<2x16x128xf32, #tpu.memory_space<vmem>>, vector<2x16x128xf32>,
    } else {
    }
    %c0 = arith.constant 0 : index
    %c0_1 = arith.constant 0 : index
    %c0_2 = arith.constant 0 : index
    %3 = vector.load %arg2[%c0, %c0_1, %c0_2] : memref<4x16x128xbf16, #tpu.memory_space<vmem>>, vector<4x16x128xbf16>
    %4 = vector.shape_cast %3 : vector<4x16x128xbf16> to vector<64x128xbf16>
    %c0_3 = arith.constant 0 : index
    %c0_4 = arith.constant 0 : index
    %5 = vector.load %arg3[%c0_3, %c0_4] : memref<128x512xbf16, #tpu.memory_space<vmem>>, vector<128x512xbf16>
    %cst = arith.constant dense<0.000000e+00> : vector<64x512xf32>
    %6 = tpu.matmul %4, %5, %cst {dimension_numbers = #tpu.dot_dimension_numbers<[1], [0], [0], [1], [0, 0, 1, 1], [], []>} : vector<64x128xbf16>, vector<128x512xbf16>, vector<64x512xf32> -> vector<64x512xf32>
    %c0_5 = arith.constant 0 : index
    %c0_6 = arith.constant 0 : index
    %7 = vector.load %arg5[%c0_5, %c0_6] : memref<1x512xf32, #tpu.memory_space<vmem>>, vector<1x512xf32>
    %8 = vector.broadcast %7 : vector<1x512xf32> to vector<64x512xf32>
    %9 = arith.addf %6, %8 : vector<64x512xf32>
    %c0_7 = arith.constant 0 : index
    %c0_8 = arith.constant 0 : index
    %10 = vector.load %arg13[%c0_7, %c0_8] : memref<64x512xf32, #tpu.memory_space<vmem>>, vector<64x512xf32>
    tpu.vector_store %arg13[%c0_7, %c0_8], %9 {strides = array<i32>} : memref<64x512xf32, #tpu.memory_space<vmem>>, vector<64x512xf32>,
    %c0_i32_9 = arith.constant 0 : i32
    %c4_i32 = arith.constant 4 : i32
    %11 = arith.addi %c0_i32_9, %c4_i32 : i32
    %c1_i32 = arith.constant 1 : i32
    scf.for %arg14 = %c0_i32_9 to %11 step %c1_i32  : i32 {
      %c1_i32_24 = arith.constant 1 : i32
      %20 = arith.muli %arg14, %c1_i32_24 : i32
      %c0_i32_25 = arith.constant 0 : i32
      %21 = arith.addi %c0_i32_25, %20 : i32
      %c16_i32 = arith.constant 16 : i32
      %22 = arith.muli %21, %c16_i32 : i32
      %23 = tpu.assume_multiple %22, 16 : i32
      %24 = arith.index_cast %23 : i32 to index
      %c0_26 = arith.constant 0 : index
      %25 = vector.load %arg13[%24, %c0_26] : memref<64x512xf32, #tpu.memory_space<vmem>>, vector<16x512xf32>
      %c0_27 = arith.constant 0 : index
      %c0_28 = arith.constant 0 : index
      %c0_29 = arith.constant 0 : index
      %26 = vector.load %arg10[%c0_27, %c0_28, %c0_29] : memref<2x16x128xf32, #tpu.memory_space<vmem>>, vector<1x16x128xf32>
      %27 = vector.shape_cast %26 : vector<1x16x128xf32> to vector<16x128xf32>
      %28 = arith.truncf %27 : vector<16x128xf32> to vector<16x128xbf16>
      %c0_30 = arith.constant 0 : index
      %c0_31 = arith.constant 0 : index
      %29 = vector.load %arg4[%c0_30, %c0_31] : memref<128x512xbf16, #tpu.memory_space<vmem>>, vector<128x512xbf16>
      %cst_32 = arith.constant dense<0.000000e+00> : vector<16x512xf32>
      %30 = tpu.matmul %28, %29, %cst_32 {dimension_numbers = #tpu.dot_dimension_numbers<[1], [0], [0], [1], [0, 0, 1, 1], [], []>} : vector<16x128xbf16>, vector<128x512xbf16>, vector<16x512xf32> -> vector<16x512xf32>
      %31 = arith.addf %25, %30 : vector<16x512xf32>
      %32 = vector.extract_strided_slice %31 {offsets = [0, 0], sizes = [16, 128], strides = [1, 1]} : vector<16x512xf32> to vector<16x128xf32>
      %33 = arith.negf %32 : vector<16x128xf32>
      %34 = math.exp %33 : vector<16x128xf32>
      %cst_33 = arith.constant 1.000000e+00 : f32
      %35 = vector.broadcast %cst_33 : f32 to vector<16x128xf32>
      %36 = arith.addf %35, %34 : vector<16x128xf32>
      %37 = arith.divf %35, %36 : vector<16x128xf32>
      %38 = vector.extract_strided_slice %31 {offsets = [0, 128], sizes = [16, 128], strides = [1, 1]} : vector<16x512xf32> to vector<16x128xf32>
      %39 = arith.negf %38 : vector<16x128xf32>
      %40 = math.exp %39 : vector<16x128xf32>
      %cst_34 = arith.constant 1.000000e+00 : f32
      %41 = vector.broadcast %cst_34 : f32 to vector<16x128xf32>
      %42 = arith.addf %41, %40 : vector<16x128xf32>
      %43 = arith.divf %41, %42 : vector<16x128xf32>
      %44 = vector.extract_strided_slice %31 {offsets = [0, 256], sizes = [16, 128], strides = [1, 1]} : vector<16x512xf32> to vector<16x128xf32>
      %45 = math.tanh %44 : vector<16x128xf32>
      %46 = vector.extract_strided_slice %31 {offsets = [0, 384], sizes = [16, 128], strides = [1, 1]} : vector<16x512xf32> to vector<16x128xf32>
      %47 = arith.negf %46 : vector<16x128xf32>
      %48 = math.exp %47 : vector<16x128xf32>
      %cst_35 = arith.constant 1.000000e+00 : f32
      %49 = vector.broadcast %cst_35 : f32 to vector<16x128xf32>
      %50 = arith.addf %49, %48 : vector<16x128xf32>
      %51 = arith.divf %49, %50 : vector<16x128xf32>
      %c0_36 = arith.constant 0 : index
      %c0_37 = arith.constant 0 : index
      %c0_38 = arith.constant 0 : index
      %52 = vector.load %arg11[%c0_36, %c0_37, %c0_38] : memref<2x16x128xf32, #tpu.memory_space<vmem>>, vector<1x16x128xf32>
      %53 = vector.shape_cast %52 : vector<1x16x128xf32> to vector<16x128xf32>
      %54 = arith.mulf %43, %53 : vector<16x128xf32>
      %55 = arith.mulf %37, %45 : vector<16x128xf32>
      %56 = arith.addf %54, %55 : vector<16x128xf32>
      %57 = math.tanh %56 : vector<16x128xf32>
      %58 = arith.mulf %51, %57 : vector<16x128xf32>
      %c0_39 = arith.constant 0 : index
      %c0_40 = arith.constant 0 : index
      %c0_41 = arith.constant 0 : index
      %59 = vector.load %arg10[%c0_39, %c0_40, %c0_41] : memref<2x16x128xf32, #tpu.memory_space<vmem>>, vector<1x16x128xf32>
      %60 = vector.shape_cast %59 : vector<1x16x128xf32> to vector<16x128xf32>
      %61 = vector.shape_cast %58 : vector<16x128xf32> to vector<1x16x128xf32>
      tpu.vector_store %arg10[%c0_39, %c0_40, %c0_41], %61 {strides = array<i32>} : memref<2x16x128xf32, #tpu.memory_space<vmem>>, vector<1x16x128xf32>,
      %c0_42 = arith.constant 0 : index
      %c0_43 = arith.constant 0 : index
      %c0_44 = arith.constant 0 : index
      %62 = vector.load %arg11[%c0_42, %c0_43, %c0_44] : memref<2x16x128xf32, #tpu.memory_space<vmem>>, vector<1x16x128xf32>
      %63 = vector.shape_cast %62 : vector<1x16x128xf32> to vector<16x128xf32>
      %64 = vector.shape_cast %56 : vector<16x128xf32> to vector<1x16x128xf32>
      tpu.vector_store %arg11[%c0_42, %c0_43, %c0_44], %64 {strides = array<i32>} : memref<2x16x128xf32, #tpu.memory_space<vmem>>, vector<1x16x128xf32>,
      %65 = arith.truncf %58 : vector<16x128xf32> to vector<16x128xbf16>
      %66 = arith.index_cast %23 : i32 to index
      %c0_45 = arith.constant 0 : index
      %67 = vector.load %arg12[%66, %c0_45] : memref<64x128xbf16, #tpu.memory_space<vmem>>, vector<16x128xbf16>
      tpu.vector_store %arg12[%66, %c0_45], %65 {strides = array<i32>} : memref<64x128xbf16, #tpu.memory_space<vmem>>, vector<16x128xbf16>,
    }
    %c4_i32_10 = arith.constant 4 : i32
    %c0_11 = arith.constant 0 : index
    %c0_12 = arith.constant 0 : index
    %12 = vector.load %arg12[%c0_11, %c0_12] : memref<64x128xbf16, #tpu.memory_space<vmem>>, vector<64x128xbf16>
    %c0_13 = arith.constant 0 : index
    %c0_14 = arith.constant 0 : index
    %13 = vector.load %arg6[%c0_13, %c0_14] : memref<128x512xbf16, #tpu.memory_space<vmem>>, vector<128x512xbf16>
    %cst_15 = arith.constant dense<0.000000e+00> : vector<64x512xf32>
    %14 = tpu.matmul %12, %13, %cst_15 {dimension_numbers = #tpu.dot_dimension_numbers<[1], [0], [0], [1], [0, 0, 1, 1], [], []>} : vector<64x128xbf16>, vector<128x512xbf16>, vector<64x512xf32> -> vector<64x512xf32>
    %c0_16 = arith.constant 0 : index
    %c0_17 = arith.constant 0 : index
    %15 = vector.load %arg8[%c0_16, %c0_17] : memref<1x512xf32, #tpu.memory_space<vmem>>, vector<1x512xf32>
    %16 = vector.broadcast %15 : vector<1x512xf32> to vector<64x512xf32>
    %17 = arith.addf %14, %16 : vector<64x512xf32>
    %c0_18 = arith.constant 0 : index
    %c0_19 = arith.constant 0 : index
    %18 = vector.load %arg13[%c0_18, %c0_19] : memref<64x512xf32, #tpu.memory_space<vmem>>, vector<64x512xf32>
    tpu.vector_store %arg13[%c0_18, %c0_19], %17 {strides = array<i32>} : memref<64x512xf32, #tpu.memory_space<vmem>>, vector<64x512xf32>,
    %c0_i32_20 = arith.constant 0 : i32
    %c4_i32_21 = arith.constant 4 : i32
    %19 = arith.addi %c0_i32_20, %c4_i32_21 : i32
    %c1_i32_22 = arith.constant 1 : i32
    scf.for %arg14 = %c0_i32_20 to %19 step %c1_i32_22  : i32 {
      %c1_i32_24 = arith.constant 1 : i32
      %20 = arith.muli %arg14, %c1_i32_24 : i32
      %c0_i32_25 = arith.constant 0 : i32
      %21 = arith.addi %c0_i32_25, %20 : i32
      %c16_i32 = arith.constant 16 : i32
      %22 = arith.muli %21, %c16_i32 : i32
      %23 = tpu.assume_multiple %22, 16 : i32
      %24 = arith.index_cast %23 : i32 to index
      %c0_26 = arith.constant 0 : index
      %25 = vector.load %arg13[%24, %c0_26] : memref<64x512xf32, #tpu.memory_space<vmem>>, vector<16x512xf32>
      %c1 = arith.constant 1 : index
      %c0_27 = arith.constant 0 : index
      %c0_28 = arith.constant 0 : index
      %26 = vector.load %arg10[%c1, %c0_27, %c0_28] : memref<2x16x128xf32, #tpu.memory_space<vmem>>, vector<1x16x128xf32>
      %27 = vector.shape_cast %26 : vector<1x16x128xf32> to vector<16x128xf32>
      %28 = arith.truncf %27 : vector<16x128xf32> to vector<16x128xbf16>
      %c0_29 = arith.constant 0 : index
      %c0_30 = arith.constant 0 : index
      %29 = vector.load %arg7[%c0_29, %c0_30] : memref<128x512xbf16, #tpu.memory_space<vmem>>, vector<128x512xbf16>
      %cst_31 = arith.constant dense<0.000000e+00> : vector<16x512xf32>
      %30 = tpu.matmul %28, %29, %cst_31 {dimension_numbers = #tpu.dot_dimension_numbers<[1], [0], [0], [1], [0, 0, 1, 1], [], []>} : vector<16x128xbf16>, vector<128x512xbf16>, vector<16x512xf32> -> vector<16x512xf32>
      %31 = arith.addf %25, %30 : vector<16x512xf32>
      %32 = vector.extract_strided_slice %31 {offsets = [0, 0], sizes = [16, 128], strides = [1, 1]} : vector<16x512xf32> to vector<16x128xf32>
      %33 = arith.negf %32 : vector<16x128xf32>
      %34 = math.exp %33 : vector<16x128xf32>
      %cst_32 = arith.constant 1.000000e+00 : f32
      %35 = vector.broadcast %cst_32 : f32 to vector<16x128xf32>
      %36 = arith.addf %35, %34 : vector<16x128xf32>
      %37 = arith.divf %35, %36 : vector<16x128xf32>
      %38 = vector.extract_strided_slice %31 {offsets = [0, 128], sizes = [16, 128], strides = [1, 1]} : vector<16x512xf32> to vector<16x128xf32>
      %39 = arith.negf %38 : vector<16x128xf32>
      %40 = math.exp %39 : vector<16x128xf32>
      %cst_33 = arith.constant 1.000000e+00 : f32
      %41 = vector.broadcast %cst_33 : f32 to vector<16x128xf32>
      %42 = arith.addf %41, %40 : vector<16x128xf32>
      %43 = arith.divf %41, %42 : vector<16x128xf32>
      %44 = vector.extract_strided_slice %31 {offsets = [0, 256], sizes = [16, 128], strides = [1, 1]} : vector<16x512xf32> to vector<16x128xf32>
      %45 = math.tanh %44 : vector<16x128xf32>
      %46 = vector.extract_strided_slice %31 {offsets = [0, 384], sizes = [16, 128], strides = [1, 1]} : vector<16x512xf32> to vector<16x128xf32>
      %47 = arith.negf %46 : vector<16x128xf32>
      %48 = math.exp %47 : vector<16x128xf32>
      %cst_34 = arith.constant 1.000000e+00 : f32
      %49 = vector.broadcast %cst_34 : f32 to vector<16x128xf32>
      %50 = arith.addf %49, %48 : vector<16x128xf32>
      %51 = arith.divf %49, %50 : vector<16x128xf32>
      %c1_35 = arith.constant 1 : index
      %c0_36 = arith.constant 0 : index
      %c0_37 = arith.constant 0 : index
      %52 = vector.load %arg11[%c1_35, %c0_36, %c0_37] : memref<2x16x128xf32, #tpu.memory_space<vmem>>, vector<1x16x128xf32>
      %53 = vector.shape_cast %52 : vector<1x16x128xf32> to vector<16x128xf32>
      %54 = arith.mulf %43, %53 : vector<16x128xf32>
      %55 = arith.mulf %37, %45 : vector<16x128xf32>
      %56 = arith.addf %54, %55 : vector<16x128xf32>
      %57 = math.tanh %56 : vector<16x128xf32>
      %58 = arith.mulf %51, %57 : vector<16x128xf32>
      %c1_38 = arith.constant 1 : index
      %c0_39 = arith.constant 0 : index
      %c0_40 = arith.constant 0 : index
      %59 = vector.load %arg10[%c1_38, %c0_39, %c0_40] : memref<2x16x128xf32, #tpu.memory_space<vmem>>, vector<1x16x128xf32>
      %60 = vector.shape_cast %59 : vector<1x16x128xf32> to vector<16x128xf32>
      %61 = vector.shape_cast %58 : vector<16x128xf32> to vector<1x16x128xf32>
      tpu.vector_store %arg10[%c1_38, %c0_39, %c0_40], %61 {strides = array<i32>} : memref<2x16x128xf32, #tpu.memory_space<vmem>>, vector<1x16x128xf32>,
      %c1_41 = arith.constant 1 : index
      %c0_42 = arith.constant 0 : index
      %c0_43 = arith.constant 0 : index
      %62 = vector.load %arg11[%c1_41, %c0_42, %c0_43] : memref<2x16x128xf32, #tpu.memory_space<vmem>>, vector<1x16x128xf32>
      %63 = vector.shape_cast %62 : vector<1x16x128xf32> to vector<16x128xf32>
      %64 = vector.shape_cast %56 : vector<16x128xf32> to vector<1x16x128xf32>
      tpu.vector_store %arg11[%c1_41, %c0_42, %c0_43], %64 {strides = array<i32>} : memref<2x16x128xf32, #tpu.memory_space<vmem>>, vector<1x16x128xf32>,
      %65 = arith.truncf %58 : vector<16x128xf32> to vector<16x128xbf16>
      %66 = arith.index_cast %21 : i32 to index
      %c0_44 = arith.constant 0 : index
      %c0_45 = arith.constant 0 : index
      %67 = vector.load %arg9[%66, %c0_44, %c0_45] : memref<4x16x128xbf16, #tpu.memory_space<vmem>>, vector<1x16x128xbf16>
      %68 = vector.shape_cast %67 : vector<1x16x128xbf16> to vector<16x128xbf16>
      %69 = vector.shape_cast %65 : vector<16x128xbf16> to vector<1x16x128xbf16>
      tpu.vector_store %arg9[%66, %c0_44, %c0_45], %69 {strides = array<i32>} : memref<4x16x128xbf16, #tpu.memory_space<vmem>>, vector<1x16x128xbf16>,
    }
    %c4_i32_23 = arith.constant 4 : i32
    return
  }
  func.func @transform_0(%arg0: i32, %arg1: i32) -> (i32, i32, i32) {
    %c0_i32 = arith.constant 0 : i32
    %c0_i32_0 = arith.constant 0 : i32
    return %arg1, %arg0, %c0_i32 : i32, i32, i32
  }
  func.func @transform_1(%arg0: i32, %arg1: i32) -> (i32, i32) {
    %c0_i32 = arith.constant 0 : i32
    %c0_i32_0 = arith.constant 0 : i32
    %c0_i32_1 = arith.constant 0 : i32
    return %c0_i32, %c0_i32_0 : i32, i32
  }
  func.func @transform_2(%arg0: i32, %arg1: i32) -> (i32, i32) {
    %c0_i32 = arith.constant 0 : i32
    %c0_i32_0 = arith.constant 0 : i32
    %c0_i32_1 = arith.constant 0 : i32
    return %c0_i32, %c0_i32_0 : i32, i32
  }
  func.func @transform_3(%arg0: i32, %arg1: i32) -> (i32, i32) {
    %c0_i32 = arith.constant 0 : i32
    %c0_i32_0 = arith.constant 0 : i32
    %c0_i32_1 = arith.constant 0 : i32
    return %c0_i32, %c0_i32_0 : i32, i32
  }
  func.func @transform_4(%arg0: i32, %arg1: i32) -> (i32, i32) {
    %c0_i32 = arith.constant 0 : i32
    %c0_i32_0 = arith.constant 0 : i32
    %c0_i32_1 = arith.constant 0 : i32
    return %c0_i32, %c0_i32_0 : i32, i32
  }
  func.func @transform_5(%arg0: i32, %arg1: i32) -> (i32, i32) {
    %c0_i32 = arith.constant 0 : i32
    %c0_i32_0 = arith.constant 0 : i32
    %c0_i32_1 = arith.constant 0 : i32
    return %c0_i32, %c0_i32_0 : i32, i32
  }
  func.func @transform_6(%arg0: i32, %arg1: i32) -> (i32, i32) {
    %c0_i32 = arith.constant 0 : i32
    %c0_i32_0 = arith.constant 0 : i32
    %c0_i32_1 = arith.constant 0 : i32
    return %c0_i32, %c0_i32_0 : i32, i32
  }
  func.func @transform_7(%arg0: i32, %arg1: i32) -> (i32, i32, i32) {
    %c0_i32 = arith.constant 0 : i32
    %c0_i32_0 = arith.constant 0 : i32
    return %arg1, %arg0, %c0_i32 : i32, i32, i32
  }
}

</mosaic_0001>

<bundles_post_ra>
// kernel: tpu_custom_call.1
= control target key start
LH: loop header
LB: loop body
LE: loop exit
PB: predicated region body
PF: predicated region fallthrough
CT: control target
= control target key end

     0   :  { %s3902_s0 = inlined_call_operand.hbm [shape: bf16[12,16,128], index: 0, kind: input, shape index: {}]   ;;  %s3903_s1 = inlined_call_operand.hbm [shape: bf16[128,512], index: 1, kind: input, shape index: {}]   ;;  %s3904_s2 = inlined_call_operand.hbm [shape: bf16[128,512], index: 2, kind: input, shape index: {}]   ;;  %s3905_s3 = inlined_call_operand.hbm [shape: f32[1,512], index: 3, kind: input, shape index: {}]   ;;  %s3906_s4 = inlined_call_operand.hbm [shape: bf16[128,512], index: 4, kind: input, shape index: {}]   ;;  %s3907_s5 = inlined_call_operand.hbm [shape: bf16[128,512], index: 5, kind: input, shape index: {}]   ;;  %s3908_s6 = inlined_call_operand.vmem [shape: f32[1,512], index: 6, kind: input, shape index: {}]   ;;  %s3909_s7 = inlined_call_operand.hbm [shape: bf16[12,16,128], index: 7, kind: output, shape index: {}]  }
   0x1   :  { %3911 = sst [smem:[#allocation23_spill]] %s3903_s1 }
   0x2   :  { %3912 = sst [smem:[#allocation24_spill]] %s3904_s2 }
   0x3   :  { %3913 = sst [smem:[#allocation25_spill]] %s3905_s3 }
   0x4   :  { %3914 = sst [smem:[#allocation26_spill]] %s3906_s4 }
   0x5   :  { %12 = vsyncpa [#allocation7], 0 }
   0x6   :  { %14 = vsyncpa [#allocation7 + $0x1], 0 }
   0x7   :  { %15 = vsyncpa [#allocation10], 0 }
   0x8   :  { %16 = vsyncpa [#allocation13], 0 }
   0x9   :  { %17 = vsyncpa [#allocation16], 0 }
   0xa   :  { %18 = vsyncpa [#allocation8], 0 }
   0xb   :  { %20 = vsyncpa [#allocation8 + $0x1], 0  ;;  %s3478_s24 = smov 0   ;;  %s3480_s25 = smov 0  }
   0xc   :  { %s3482_s26 = smov 0   ;;  %s3484_s27 = smov 0  }
   0xd   :  { %s3486_s28 = smov 0   ;;  %s3488_s29 = smov 0  }
   0xe LB: > { %s3910_s30 = sadd.s32 4294967295, %s3416_s29   ;;  %p2190_p0 = scmp.ge.s32.totalorder %s3416_s29, 1  ;;  %s3416_s29 = sphi %s3488_s29, %s26_s29   ;;  %s3412_s28 = sphi %s3486_s28, %s3939_s28   ;;  %s3408_s27 = sphi %s3484_s27, %s3938_s27   ;;  %s3404_s26 = sphi %s3482_s26, %s3937_s26   ;;  %s3400_s25 = sphi %s3480_s25, %s3936_s25   ;;  %s3396_s24 = sphi %s3478_s24, %s3935_s24  }
   0xf   : > { %p3512_p1 = scmp.eq.s32.totalorder %s3910_s30, 0  ;;  %p225_p2 = scmp.lt.s32.totalorder %s3416_s29, 4 }
  0x10   : > { %s3916_s1 = sld [smem:[#allocation23_spill]]  ;;  %s3426_s13 = smov [#allocation9]  }
  0x11   : > { %p3520_p3 = pnand %p2190_p0, %p225_p2  ;;  %s238_s14 = sshll.u32 %s3426_s13, 4  ;;  %s239_s14 = int_to_ptr.vmem [resolvable:$true] %s238_s14 }
  0x12   : > { %s3919_s3 = sld [smem:[#allocation25_spill]]  ;;  %s3427_s19 = smov 256  }
  0x13   : > { %p2958_p4 = pneg %p3520_p3  ;;  %s3428_s20 = smov 16  }
  0x14   : > { %s3429_s21 = smov [#allocation12]   ;;  %s3920_s2 = sld [smem:[#allocation24_spill]] }
  0x15   : > { %p3528_p5 = pnand %p2958_p4, %p3512_p1  ;;  %s267_s22 = sshll.u32 %s3429_s21, 4  ;;  %s268_s22 = int_to_ptr.vmem [resolvable:$true] %s267_s22 }
  0x16   : > { %s236_s11 = sshll.u32 %s3916_s1, 4  ;;  %s3921_s4 = sld [smem:[#allocation26_spill]]  ;;  %s237_s11 = int_to_ptr.hbm [resolvable:$true] %s236_s11 }
  0x17   : > { %2961 = dma.hbm_to_vmem [thread:$0]  (!%p3528_p5), %s237_s11, 4096, %s239_s14, [#allocation10], %s3427_s19, %s3427_s19, %s3428_s20  }
  0x18   : > { %s265_s18 = sshll.u32 %s3919_s3, 4  ;;  %s3430_s30 = smov [#allocation11]   ;;  %s266_s18 = int_to_ptr.hbm [resolvable:$true] %s265_s18 }
  0x19   : > { %2967 = dma.hbm_to_vmem [thread:$0]  (!%p3528_p5), %s266_s18, 64, %s268_s22, [#allocation13]  }
  0x1a   : > { %s250_s10 = sshll.u32 %s3920_s2, 4  ;;  %s252_s11 = sshll.u32 %s3430_s30, 4  ;;  %s251_s10 = int_to_ptr.hbm [resolvable:$true] %s250_s10  ;;  %s253_s11 = int_to_ptr.vmem [resolvable:$true] %s252_s11 }
  0x1b   : > { %2964 = dma.hbm_to_vmem [thread:$0]  (!%p3528_p5), %s251_s10, 4096, %s253_s11, [#allocation10], %s3427_s19, %s3427_s19, %s3428_s20  }
  0x1c   : > { %s276_s17 = sshll.u32 %s3921_s4, 4  ;;  %s3431_s14 = smov [#allocation14]   ;;  %s277_s17 = int_to_ptr.hbm [resolvable:$true] %s276_s17 }
  0x1d   : > { %s278_s18 = sshll.u32 %s3431_s14, 4  ;;  %s290_s23 = sshll.u32 %s3907_s5, 4  ;;  %s279_s18 = int_to_ptr.vmem [resolvable:$true] %s278_s18  ;;  %s291_s23 = int_to_ptr.hbm [resolvable:$true] %s290_s23 }
  0x1e   : > { %2970 = dma.hbm_to_vmem [thread:$0]  (!%p3528_p5), %s277_s17, 4096, %s279_s18, [#allocation13], %s3427_s19, %s3427_s19, %s3428_s20  }
  0x1f   : > { %s3432_s30 = smov [#allocation15]   ;;  %s2189_s10 = sadd.s32 4294967294, %s3416_s29  }
  0x20   : > { %s292_s9 = sshll.u32 %s3432_s30, 4  ;;  %s35_s13 = sadd.s32 1, %s3412_s28  ;;  %s293_s9 = int_to_ptr.vmem [resolvable:$true] %s292_s9 }
  0x21   : > { %2973 = dma.hbm_to_vmem [thread:$0]  (!%p3528_p5), %s291_s23, 4096, %s293_s9, [#allocation16], %s3427_s19, %s3427_s19, %s3428_s20  }
  0x22   : > { %s47_s16 = sadd.s32 1, %s3404_s26  ;;  %p36_p6 = scmp.ge.s32.totalorder %s35_s13, 3 }
  0x23   : > { %p54_p7 = scmp.ne.s32.totalorder %s3404_s26, %s3400_s25  ;;  %p55_p8 = scmp.eq.s32.totalorder %s3416_s29, 0 }
  0x24   : > { %p60_p9 = scmp.ne.s32.totalorder %s3400_s25, %s3396_s24  ;;  %s3941_s13 = smov (%p36_p6, %s35_s13), 0 }
  0x25   : > { %p3564_p10 = por %p55_p8, %p54_p7  ;;  %s42_s19 = ssub.s32 %s3412_s28, %s3941_s13 }
  0x26   : > { %p3570_p11 = por %p3512_p1, %p60_p9  ;;  %s3924_s20 = sadd.s32 4294967295, %s3416_s29  }
  0x27   : > { %p212_p12 = scmp.eq.s32.totalorder %s3924_s20, 2  ;;  %p45_p13 = scmp.eq.s32.totalorder %s42_s19, 0 }
  0x28   : > { %p218_p0 = scmp.eq.s32.totalorder %s2189_s10, 2  ;;  %p2987_p4 = scmp.lt.s32.totalorder %s3416_s29, 3 }
  0x29   : > { %p3578_p2 = por %p212_p12, %p54_p7  ;;  %s309_s21 = sand.u32 1, %s3404_s26  }
  0x2a   : > { %s3584_s14 = scalar_select %p45_p13, %s3404_s26, %s47_s16  }
  0x2b   : > { %p3586_p5 = por %p218_p0, %p60_p9  ;;  %s2197_s22 = sshll.u32 %s309_s21, 5 }
  0x2c   : > { %s2782_s23 = sshll.u32 %s3412_s28, 5  ;;  %s313_s19 = scalar_lea.vmem [#allocation6], %s2197_s22 }
  0x2d   : > { %s321_s20 = scalar_lea.hbm %s3902_s0, %s2782_s23  ;;  %s324_s10 = sshll.u32 %s313_s19, 4  ;;  %s325_s10 = int_to_ptr.vmem [resolvable:$true] %s324_s10 }
  0x2e   : > { %s322_s1 = sshll.u32 %s321_s20, 4  ;;  %p2975_p6 = pnand %p2987_p4, %p3564_p10  ;;  %s323_s1 = int_to_ptr.hbm [resolvable:$true] %s322_s1 }
  0x2f   : > { %s310_s16 = scalar_lea.sflag [#allocation7], %s309_s21  ;;  %s3433_s2 = smov 64  }
  0x30   : > { %s3434_s3 = smov 4   ;;  %336 = sbr.rel (%p3520_p3) target bundleno = 946 (0x3b2), region = 48 }
  0x31   : > { %2977 = dma.hbm_to_vmem [thread:$0]  (!%p2975_p6), %s323_s1, 512, %s325_s10, %s310_s16, %s3433_s2, %s3433_s2, %s3434_s3  }
  0x32   : > { %s3600_s4 = sand.u32 (!%p3520_p3), 1, %s3400_s25  }
  0x33   : > { %s2202_s22 = sshll.u32 (!%p3520_p3), %s3600_s4, 5  ;;  %s339_s23 = scalar_lea.sflag (!%p3520_p3), [#allocation7], %s3600_s4 }
  0x34   : > { %s3604_s30 = scalar_lea.vmem (!%p3520_p3), [#allocation6], %s2202_s22 }
  0x35   : > { %3375 = dma.done.wait (%p3570_p11), %s339_s23, 512  }
  0x36   : > { %3377 = vsyncadd (%p3570_p11), %s339_s23, 4294966784 }
  0x37   : > { %3379 = dma.done.wait (%p3512_p1), [#allocation10], 8192  }
  0x38   : > { %3381 = vsyncadd (%p3512_p1), [#allocation10], 4294959104 }
  0x39   : > { %3383 = dma.done.wait (%p3512_p1), [#allocation13], 4160  }
  0x3a   : > { %3385 = vsyncadd (%p3512_p1), [#allocation13], 4294963136 }
  0x3b   : > { %3387 = dma.done.wait (%p3512_p1), [#allocation16], 4096  }
  0x3c   : > { %3389 = vsyncadd (%p3512_p1), [#allocation16], 4294963200  ;;  %s3622_s1 = scalar_lea.vmem [#allocation17], %s2202_s22  ;;  %p2209_p3 = scmp.ne.s32.totalorder %s3408_s27, 0 }
  0x3e   : > { %406 = sbr.rel (%p2209_p3) target bundleno = 76 (0x4c), region = 76 }
  0x43   : > { %v3435_v0 = vmov 0.0  }
  0x44   : > { %407 = vst [vmem:[#allocation2 + $0x10] sm:$0xff] %v3435_v0 }
  0x45   : > { %408 = vst [vmem:[#allocation2] sm:$0xff] %v3435_v0 }
  0x46   : > { %409 = vst [vmem:[#allocation2 + $0x18] sm:$0xff] %v3435_v0 }
  0x47   : > { %410 = vst [vmem:[#allocation2 + $0x8] sm:$0xff] %v3435_v0 }
  0x48   : > { %411 = vst [vmem:[#allocation3] sm:$0xff] %v3435_v0 }
  0x49   : > { %412 = vst [vmem:[#allocation3 + $0x18] sm:$0xff] %v3435_v0 }
  0x4a   : > { %413 = vst [vmem:[#allocation3 + $0x8] sm:$0xff] %v3435_v0 }
  0x4b   : > { %414 = vst [vmem:[#allocation3 + $0x10] sm:$0xff] %v3435_v0 }
  0x4c PF: > { %v2340_v1 = vld [vmem:[#allocation9 + $0xe0] sm:$0xf]  ;;  %v2817_v2 = vld [vmem:[#allocation9 + $0xec] sm:$0xf0]  ;;  %v2815_v3 = vld [vmem:[#allocation9 + $0xe4] sm:$0xf] }
  0x4d   : > { %v2341_v4 = vor.u32 %v2817_v2, %v2340_v1  ;;  %v2342_v5 = vld [vmem:[#allocation9 + $0xf0] sm:$0xf0]  ;;  %v2348_v6 = vld [vmem:[#allocation9 + $0xe8] sm:$0xf]  ;;  %v2818_v7 = vld [vmem:[#allocation9 + $0xf4] sm:$0xf0] }
  0x4e   : > { %v2345_v8 = vor.u32 %v2815_v3, %v2342_v5  ;;  %v2349_v9 = vor.u32 %v2818_v7, %v2348_v6  ;;  %v2816_v10 = vld [vmem:[#allocation9 + $0xec] sm:$0xf]  ;;  %v2350_v11 = vld [vmem:[#allocation9 + $0xf8] sm:$0xf0]  ;;  %v2324_v12 = vld [vmem:[#allocation9 + $0xc0] sm:$0xf] }
  0x4f   : > { %649 = vmatpush.bf16.msra.mxu0 %v2341_v4  ;;  %v2353_v13 = vor.u32 %v2816_v10, %v2350_v11  ;;  %v2813_v14 = vld [vmem:[#allocation9 + $0xcc] sm:$0xf0]  ;;  %v2811_v15 = vld [vmem:[#allocation9 + $0xc4] sm:$0xf]  ;;  %v2326_v16 = vld [vmem:[#allocation9 + $0xd0] sm:$0xf0] }
  0x50   : > { %678 = vmatpush.bf16.msra.mxu1 %v2345_v8  ;;  %707 = vmatpush.bf16.msra.mxu2 %v2349_v9  ;;  %v2325_v17 = vor.u32 %v2813_v14, %v2324_v12  ;;  %v2329_v18 = vor.u32 %v2811_v15, %v2326_v16  ;;  %v2332_v19 = vld [vmem:[#allocation9 + $0xc8] sm:$0xf]  ;;  %v2814_v20 = vld [vmem:[#allocation9 + $0xd4] sm:$0xf0]  ;;  %v2812_v21 = vld [vmem:[#allocation9 + $0xcc] sm:$0xf] }
  0x51   : > { %736 = vmatpush.bf16.msra.mxu3 %v2353_v13  ;;  %v2333_v22 = vor.u32 %v2814_v20, %v2332_v19  ;;  %v2334_v23 = vld [vmem:[#allocation9 + $0xd8] sm:$0xf0]  ;;  %v2308_v24 = vld [vmem:[#allocation9 + $0xa0] sm:$0xf]  ;;  %v2809_v25 = vld [vmem:[#allocation9 + $0xac] sm:$0xf0] }
  0x52   : > { %v2337_v26 = vor.u32 %v2812_v21, %v2334_v23  ;;  %v2807_v27 = vld [vmem:[#allocation9 + $0xa4] sm:$0xf]  ;;  %v2310_v28 = vld [vmem:[#allocation9 + $0xb0] sm:$0xf0]  ;;  %v2316_v29 = vld [vmem:[#allocation9 + $0xa8] sm:$0xf]  ;;  %v2309_v30 = vor.u32 %v2809_v25, %v2308_v24 }
  0x53   : > { %650 = vmatpush.bf16.msra.mxu0 %v2325_v17  ;;  %v2810_v31 = vld [vmem:[#allocation9 + $0xb4] sm:$0xf0]  ;;  %v2808_v32 = vld [vmem:[#allocation9 + $0xac] sm:$0xf]  ;;  %v2318_v33 = vld [vmem:[#allocation9 + $0xb8] sm:$0xf0]  ;;  %v2313_v34 = vor.u32 %v2807_v27, %v2310_v28 }
  0x54   : > { %679 = vmatpush.bf16.msra.mxu1 %v2329_v18  ;;  %708 = vmatpush.bf16.msra.mxu2 %v2333_v22  ;;  %v2317_v35 = vor.u32 %v2810_v31, %v2316_v29  ;;  %v2292_v36 = vld [vmem:[#allocation9 + $0x80] sm:$0xf]  ;;  %v2805_v37 = vld [vmem:[#allocation9 + $0x8c] sm:$0xf0]  ;;  %v2803_v38 = vld [vmem:[#allocation9 + $0x84] sm:$0xf]  ;;  %v2321_v39 = vor.u32 %v2808_v32, %v2318_v33 }
  0x55   : > { %737 = vmatpush.bf16.msra.mxu3 %v2337_v26  ;;  %v2294_v40 = vld [vmem:[#allocation9 + $0x90] sm:$0xf0]  ;;  %v2300_v41 = vld [vmem:[#allocation9 + $0x88] sm:$0xf]  ;;  %v2806_v42 = vld [vmem:[#allocation9 + $0x94] sm:$0xf0]  ;;  %v2293_v45 = vor.u32 %v2805_v37, %v2292_v36 }
  0x56   : > { %v2804_v43 = vld [vmem:[#allocation9 + $0x8c] sm:$0xf]  ;;  %v2302_v44 = vld [vmem:[#allocation9 + $0x98] sm:$0xf0]  ;;  %v2297_v46 = vor.u32 %v2803_v38, %v2294_v40  ;;  %v2301_v47 = vor.u32 %v2806_v42, %v2300_v41  ;;  %v2276_v48 = vld [vmem:[#allocation9 + $0x60] sm:$0xf] }
  0x57   : > { %651 = vmatpush.bf16.msra.mxu0 %v2309_v30  ;;  %v2801_v49 = vld [vmem:[#allocation9 + $0x6c] sm:$0xf0]  ;;  %v2799_v50 = vld [vmem:[#allocation9 + $0x64] sm:$0xf]  ;;  %v2305_v51 = vor.u32 %v2804_v43, %v2302_v44  ;;  %v2278_v52 = vld [vmem:[#allocation9 + $0x70] sm:$0xf0] }
  0x58   : > { %680 = vmatpush.bf16.msra.mxu1 %v2313_v34  ;;  %709 = vmatpush.bf16.msra.mxu2 %v2317_v35  ;;  %v2284_v53 = vld [vmem:[#allocation9 + $0x68] sm:$0xf]  ;;  %v2802_v54 = vld [vmem:[#allocation9 + $0x74] sm:$0xf0]  ;;  %v2800_v55 = vld [vmem:[#allocation9 + $0x6c] sm:$0xf]  ;;  %v2277_v57 = vor.u32 %v2801_v49, %v2276_v48  ;;  %v2281_v58 = vor.u32 %v2799_v50, %v2278_v52 }
  0x59   : > { %738 = vmatpush.bf16.msra.mxu3 %v2321_v39  ;;  %v2286_v56 = vld [vmem:[#allocation9 + $0x78] sm:$0xf0]  ;;  %v2285_v59 = vor.u32 %v2802_v54, %v2284_v53  ;;  %v2260_v60 = vld [vmem:[#allocation9 + $0x40] sm:$0xf]  ;;  %v2797_v61 = vld [vmem:[#allocation9 + $0x4c] sm:$0xf0] }
  0x5a   : > { %v2795_v62 = vld [vmem:[#allocation9 + $0x44] sm:$0xf]  ;;  %v2289_v63 = vor.u32 %v2800_v55, %v2286_v56  ;;  %v2262_v0 = vld [vmem:[#allocation9 + $0x50] sm:$0xf0]  ;;  %v2268_v1 = vld [vmem:[#allocation9 + $0x48] sm:$0xf]  ;;  %v2261_v5 = vor.u32 %v2797_v61, %v2260_v60 }
  0x5b   : > { %652 = vmatpush.bf16.msra.mxu0 %v2293_v45  ;;  %v2798_v2 = vld [vmem:[#allocation9 + $0x54] sm:$0xf0]  ;;  %v2796_v3 = vld [vmem:[#allocation9 + $0x4c] sm:$0xf]  ;;  %v2270_v4 = vld [vmem:[#allocation9 + $0x58] sm:$0xf0]  ;;  %v2265_v6 = vor.u32 %v2795_v62, %v2262_v0 }
  0x5c   : > { %681 = vmatpush.bf16.msra.mxu1 %v2297_v46  ;;  %710 = vmatpush.bf16.msra.mxu2 %v2301_v47  ;;  %v2269_v7 = vor.u32 %v2798_v2, %v2268_v1  ;;  %v2244_v8 = vld [vmem:[#allocation9 + $0x20] sm:$0xf]  ;;  %v2793_v9 = vld [vmem:[#allocation9 + $0x2c] sm:$0xf0]  ;;  %v2791_v10 = vld [vmem:[#allocation9 + $0x24] sm:$0xf]  ;;  %v2273_v11 = vor.u32 %v2796_v3, %v2270_v4 }
  0x5d   : > { %739 = vmatpush.bf16.msra.mxu3 %v2305_v51  ;;  %v2246_v12 = vld [vmem:[#allocation9 + $0x30] sm:$0xf0]  ;;  %v2252_v13 = vld [vmem:[#allocation9 + $0x28] sm:$0xf]  ;;  %v2794_v14 = vld [vmem:[#allocation9 + $0x34] sm:$0xf0]  ;;  %v2245_v17 = vor.u32 %v2793_v9, %v2244_v8 }
  0x5e   : > { %v2792_v15 = vld [vmem:[#allocation9 + $0x2c] sm:$0xf]  ;;  %v2254_v16 = vld [vmem:[#allocation9 + $0x38] sm:$0xf0]  ;;  %v2249_v18 = vor.u32 %v2791_v10, %v2246_v12  ;;  %v2253_v19 = vor.u32 %v2794_v14, %v2252_v13  ;;  %v2228_v20 = vld [vmem:[#allocation9] sm:$0xf] }
  0x5f   : > { %653 = vmatpush.bf16.msra.mxu0 %v2277_v57  ;;  %v2789_v21 = vld [vmem:[#allocation9 + $0xc] sm:$0xf0]  ;;  %v2787_v22 = vld [vmem:[#allocation9 + $0x4] sm:$0xf]  ;;  %v2257_v23 = vor.u32 %v2792_v15, %v2254_v16  ;;  %v2230_v24 = vld [vmem:[#allocation9 + $0x10] sm:$0xf0] }
  0x60   : > { %682 = vmatpush.bf16.msra.mxu1 %v2281_v58  ;;  %711 = vmatpush.bf16.msra.mxu2 %v2285_v59  ;;  %v2236_v25 = vld [vmem:[#allocation9 + $0x8] sm:$0xf]  ;;  %v2790_v26 = vld [vmem:[#allocation9 + $0x14] sm:$0xf0]  ;;  %v2788_v27 = vld [vmem:[#allocation9 + $0xc] sm:$0xf]  ;;  %v2229_v29 = vor.u32 %v2789_v21, %v2228_v20  ;;  %v2233_v30 = vor.u32 %v2787_v22, %v2230_v24 }
  0x61   : > { %740 = vmatpush.bf16.msra.mxu3 %v2289_v63  ;;  %v2238_v28 = vld [vmem:[#allocation9 + $0x18] sm:$0xf0]  ;;  %v2237_v31 = vor.u32 %v2790_v26, %v2236_v25  ;;  %v2783_v33 = vld [vmem:[%s3604_s30] sm:$0xff]  ;;  %v2784_v34 = vld [vmem:[%s3604_s30 + $0x8] sm:$0xff]  ;;  %s3669_s2 = smov 0  }
  0x62   : > { %v2241_v32 = vor.u32 %v2788_v27, %v2238_v28  ;;  %v2785_v35 = vld [vmem:[%s3604_s30 + $0x10] sm:$0xff]  ;;  %v2786_v36 = vld [vmem:[%s3604_s30 + $0x18] sm:$0xff]  ;;  %v455_v37 = vld [vmem:[#allocation12] sm:$0xf] }
  0x63   : > { %654 = vmatpush.bf16.msra.mxu0 %v2261_v5  ;;  %v3629_v38 = vperm.slane %v455_v37, 0  ;;  %v3631_v39 = vperm.slane %v455_v37, 1  ;;  %v3635_v44 = vperm.slane %v455_v37, 2  ;;  %v3637_v45 = vperm.slane %v455_v37, 3 }
  0x64   : > { %683 = vmatpush.bf16.msra.mxu1 %v2265_v6  ;;  %712 = vmatpush.bf16.msra.mxu2 %v2269_v7 }
  0x65   : > { %741 = vmatpush.bf16.msra.mxu3 %v2273_v11 }
  0x67   : > { %655 = vmatpush.bf16.msra.mxu0 %v2245_v17 }
  0x68   : > { %684 = vmatpush.bf16.msra.mxu1 %v2249_v18  ;;  %713 = vmatpush.bf16.msra.mxu2 %v2253_v19 }
  0x69   : > { %742 = vmatpush.bf16.msra.mxu3 %v2257_v23 }
  0x6b   : > { %656 = vmatpush.bf16.msra.mxu0 %v2229_v29 }
  0x6c   : > { %685 = vmatpush.bf16.msra.mxu1 %v2233_v30  ;;  %714 = vmatpush.bf16.msra.mxu2 %v2237_v31 }
  0x6d   : > { %743 = vmatpush.bf16.msra.mxu3 %v2241_v32 }
  0x6e   : > { %657 = vmatmul.bf16.vlgmr.msra.gmra.mxu0 %v2783_v33 }
  0x6f   : > { %686 = vmatmul.bf16.vlgmr.msra.gmra.mxu1 %v2783_v33  ;;  %715 = vmatmul.bf16.vlgmr.msra.gmra.mxu2 %v2783_v33 }
  0x70   : > { %744 = vmatmul.bf16.vlgmr.msra.gmra.mxu3 %v2783_v33 }
  0x7e   : > { %662 = vmatmul.bf16.gmra.mxu0 %v2784_v34 }
  0x7f   : > { %691 = vmatmul.bf16.gmra.mxu1 %v2784_v34  ;;  %720 = vmatmul.bf16.gmra.mxu2 %v2784_v34 }
  0x80   : > { %749 = vmatmul.bf16.gmra.mxu3 %v2784_v34 }
  0x8e   : > { %667 = vmatmul.bf16.gmra.mxu0 %v2785_v35 }
  0x8f   : > { %696 = vmatmul.bf16.gmra.mxu1 %v2785_v35  ;;  %725 = vmatmul.bf16.gmra.mxu2 %v2785_v35 }
  0x90   : > { %754 = vmatmul.bf16.gmra.mxu3 %v2785_v35 }
  0x9e   : > { %672 = vmatmul.bf16.gmra.mxu0 %v2786_v36 }
  0x9f   : > { %701 = vmatmul.bf16.gmra.mxu1 %v2786_v36  ;;  %730 = vmatmul.bf16.gmra.mxu2 %v2786_v36 }
  0xa0   : > { %759 = vmatmul.bf16.gmra.mxu3 %v2786_v36 }
  0xeb   : > { %v658_v40 = vpop.f32.mrf.mxu0 }
  0xec   : > { %v659_v41 = vadd.f32 %v658_v40, %v3629_v38  ;;  %v687_v42 = vpop.f32.mrf.mxu1 }
  0xed   : > { %v688_v43 = vadd.f32 %v687_v42, %v3631_v39 }
  0xee   : > { %765 = vst [vmem:[#allocation5] sm:$0xff] %v659_v41 }
  0xef   : > { %766 = vst [vmem:[#allocation5 + $0x8] sm:$0xff] %v688_v43 }
  0xf2   : > { %v716_v46 = vpop.f32.mrf.mxu2 }
  0xf3   : > { %v717_v47 = vadd.f32 %v716_v46, %v3635_v44  ;;  %v745_v48 = vpop.f32.mrf.mxu3  ;;  %v660_v49 = vpop.f32.mrf.mxu0 }
  0xf4   : > { %v746_v50 = vadd.f32 %v745_v48, %v3637_v45  ;;  %v661_v51 = vadd.f32 %v660_v49, %v3629_v38  ;;  %v689_v52 = vpop.f32.mrf.mxu1 }
  0xf5   : > { %767 = vst [vmem:[#allocation5 + $0x10] sm:$0xff] %v717_v47  ;;  %v690_v53 = vadd.f32 %v689_v52, %v3631_v39 }
  0xf6   : > { %768 = vst [vmem:[#allocation5 + $0x18] sm:$0xff] %v746_v50 }
  0xf7   : > { %769 = vst [vmem:[#allocation5 + $0x20] sm:$0xff] %v661_v51 }
  0xf8   : > { %770 = vst [vmem:[#allocation5 + $0x28] sm:$0xff] %v690_v53 }
  0xfa   : > { %v718_v54 = vpop.f32.mrf.mxu2 }
  0xfb   : > { %v719_v55 = vadd.f32 %v718_v54, %v3635_v44  ;;  %v747_v56 = vpop.f32.mrf.mxu3  ;;  %v663_v57 = vpop.f32.mrf.mxu0 }
  0xfc   : > { %v748_v58 = vadd.f32 %v747_v56, %v3637_v45  ;;  %v664_v59 = vadd.f32 %v663_v57, %v3629_v38  ;;  %v692_v60 = vpop.f32.mrf.mxu1 }
  0xfd   : > { %771 = vst [vmem:[#allocation5 + $0x30] sm:$0xff] %v719_v55  ;;  %v693_v61 = vadd.f32 %v692_v60, %v3631_v39 }
  0xfe   : > { %772 = vst [vmem:[#allocation5 + $0x38] sm:$0xff] %v748_v58 }
  0xff   : > { %773 = vst [vmem:[#allocation5 + $0x40] sm:$0xff] %v664_v59 }
 0x100   : > { %774 = vst [vmem:[#allocation5 + $0x48] sm:$0xff] %v693_v61 }
 0x102   : > { %v721_v62 = vpop.f32.mrf.mxu2 }
 0x103   : > { %v722_v63 = vadd.f32 %v721_v62, %v3635_v44  ;;  %v750_v0 = vpop.f32.mrf.mxu3  ;;  %v665_v1 = vpop.f32.mrf.mxu0 }
 0x104   : > { %v751_v2 = vadd.f32 %v750_v0, %v3637_v45  ;;  %v666_v3 = vadd.f32 %v665_v1, %v3629_v38  ;;  %v694_v4 = vpop.f32.mrf.mxu1 }
 0x105   : > { %775 = vst [vmem:[#allocation5 + $0x50] sm:$0xff] %v722_v63  ;;  %v695_v5 = vadd.f32 %v694_v4, %v3631_v39 }
 0x106   : > { %776 = vst [vmem:[#allocation5 + $0x58] sm:$0xff] %v751_v2 }
 0x107   : > { %777 = vst [vmem:[#allocation5 + $0x60] sm:$0xff] %v666_v3 }
 0x108   : > { %778 = vst [vmem:[#allocation5 + $0x68] sm:$0xff] %v695_v5 }
 0x10a   : > { %v723_v6 = vpop.f32.mrf.mxu2 }
 0x10b   : > { %v724_v7 = vadd.f32 %v723_v6, %v3635_v44  ;;  %v752_v8 = vpop.f32.mrf.mxu3  ;;  %v668_v9 = vpop.f32.mrf.mxu0 }
 0x10c   : > { %v753_v10 = vadd.f32 %v752_v8, %v3637_v45  ;;  %v669_v11 = vadd.f32 %v668_v9, %v3629_v38  ;;  %v697_v12 = vpop.f32.mrf.mxu1 }
 0x10d   : > { %779 = vst [vmem:[#allocation5 + $0x70] sm:$0xff] %v724_v7  ;;  %v698_v13 = vadd.f32 %v697_v12, %v3631_v39 }
 0x10e   : > { %780 = vst [vmem:[#allocation5 + $0x78] sm:$0xff] %v753_v10 }
 0x10f   : > { %781 = vst [vmem:[#allocation5 + $0x80] sm:$0xff] %v669_v11 }
 0x110   : > { %782 = vst [vmem:[#allocation5 + $0x88] sm:$0xff] %v698_v13 }
 0x112   : > { %v726_v14 = vpop.f32.mrf.mxu2 }
 0x113   : > { %v727_v15 = vadd.f32 %v726_v14, %v3635_v44  ;;  %v755_v16 = vpop.f32.mrf.mxu3  ;;  %v670_v17 = vpop.f32.mrf.mxu0 }
 0x114   : > { %v756_v18 = vadd.f32 %v755_v16, %v3637_v45  ;;  %v671_v19 = vadd.f32 %v670_v17, %v3629_v38  ;;  %v699_v20 = vpop.f32.mrf.mxu1 }
 0x115   : > { %783 = vst [vmem:[#allocation5 + $0x90] sm:$0xff] %v727_v15  ;;  %v700_v21 = vadd.f32 %v699_v20, %v3631_v39 }
 0x116   : > { %784 = vst [vmem:[#allocation5 + $0x98] sm:$0xff] %v756_v18 }
 0x117   : > { %785 = vst [vmem:[#allocation5 + $0xa0] sm:$0xff] %v671_v19 }
 0x118   : > { %786 = vst [vmem:[#allocation5 + $0xa8] sm:$0xff] %v700_v21 }
 0x11a   : > { %v728_v22 = vpop.f32.mrf.mxu2 }
 0x11b   : > { %v729_v23 = vadd.f32 %v728_v22, %v3635_v44  ;;  %v757_v24 = vpop.f32.mrf.mxu3  ;;  %v673_v25 = vpop.f32.mrf.mxu0 }
 0x11c   : > { %v758_v26 = vadd.f32 %v757_v24, %v3637_v45  ;;  %v674_v27 = vadd.f32 %v673_v25, %v3629_v38  ;;  %v702_v28 = vpop.f32.mrf.mxu1 }
 0x11d   : > { %787 = vst [vmem:[#allocation5 + $0xb0] sm:$0xff] %v729_v23  ;;  %v703_v29 = vadd.f32 %v702_v28, %v3631_v39 }
 0x11e   : > { %788 = vst [vmem:[#allocation5 + $0xb8] sm:$0xff] %v758_v26 }
 0x11f   : > { %789 = vst [vmem:[#allocation5 + $0xc0] sm:$0xff] %v674_v27 }
 0x120   : > { %790 = vst [vmem:[#allocation5 + $0xc8] sm:$0xff] %v703_v29 }
 0x122   : > { %v731_v30 = vpop.f32.mrf.mxu2 }
 0x123   : > { %v732_v31 = vadd.f32 %v731_v30, %v3635_v44  ;;  %v760_v32 = vpop.f32.mrf.mxu3  ;;  %v675_v33 = vpop.f32.mrf.mxu0 }
 0x124   : > { %v761_v34 = vadd.f32 %v760_v32, %v3637_v45  ;;  %v676_v35 = vadd.f32 %v675_v33, %v3629_v38  ;;  %v704_v36 = vpop.f32.mrf.mxu1 }
 0x125   : > { %791 = vst [vmem:[#allocation5 + $0xd0] sm:$0xff] %v732_v31  ;;  %v705_v37 = vadd.f32 %v704_v36, %v3631_v39 }
 0x126   : > { %792 = vst [vmem:[#allocation5 + $0xd8] sm:$0xff] %v761_v34 }
 0x127   : > { %793 = vst [vmem:[#allocation5 + $0xe0] sm:$0xff] %v676_v35 }
 0x128   : > { %794 = vst [vmem:[#allocation5 + $0xe8] sm:$0xff] %v705_v37 }
 0x12a   : > { %v733_v40 = vpop.f32.mrf.mxu2 }
 0x12b   : > { %v734_v41 = vadd.f32 %v733_v40, %v3635_v44  ;;  %v762_v42 = vpop.f32.mrf.mxu3 }
 0x12c   : > { %v763_v43 = vadd.f32 %v762_v42, %v3637_v45 }
 0x12d   : > { %795 = vst [vmem:[#allocation5 + $0xf0] sm:$0xff] %v734_v41 }
 0x12e   : > { %796 = vst [vmem:[#allocation5 + $0xf8] sm:$0xff] %v763_v43 }
 0x12f LB: >> { %v2471_v38 = vld [vmem:[#allocation11 + $0xe0] sm:$0xf]  ;;  %v2850_v39 = vld [vmem:[#allocation11 + $0xec] sm:$0xf0]  ;;  %v2848_v46 = vld [vmem:[#allocation11 + $0xe4] sm:$0xf]  ;;  %s3420_s2 = sphi %s3669_s2, %s802_s2  }
 0x130   : >> { %v2472_v47 = vor.u32 %v2850_v39, %v2471_v38  ;;  %v2473_v48 = vld [vmem:[#allocation11 + $0xf0] sm:$0xf0]  ;;  %v2849_v49 = vld [vmem:[#allocation11 + $0xec] sm:$0xf]  ;;  %v2481_v50 = vld [vmem:[#allocation11 + $0xf8] sm:$0xf0] }
 0x131   : >> { %v2476_v44 = vor.u32 %v2848_v46, %v2473_v48  ;;  %v2484_v51 = vor.u32 %v2849_v49, %v2481_v50  ;;  %v2455_v52 = vld [vmem:[#allocation11 + $0xc0] sm:$0xf]  ;;  %v2846_v45 = vld [vmem:[#allocation11 + $0xcc] sm:$0xf0]  ;;  %v2844_v53 = vld [vmem:[#allocation11 + $0xc4] sm:$0xf] }
 0x132   : >> { %1012 = vmatpush.bf16.msra.mxu0 %v2472_v47  ;;  %v2456_v54 = vor.u32 %v2846_v45, %v2455_v52  ;;  %v2457_v55 = vld [vmem:[#allocation11 + $0xd0] sm:$0xf0]  ;;  %v2845_v56 = vld [vmem:[#allocation11 + $0xcc] sm:$0xf]  ;;  %v2465_v57 = vld [vmem:[#allocation11 + $0xd8] sm:$0xf0] }
 0x133   : >> { %1026 = vmatpush.bf16.msra.mxu1 %v2476_v44  ;;  %1054 = vmatpush.bf16.msra.mxu3 %v2484_v51  ;;  %v2460_v58 = vor.u32 %v2844_v53, %v2457_v55  ;;  %v2468_v59 = vor.u32 %v2845_v56, %v2465_v57  ;;  %v2479_v60 = vld [vmem:[#allocation11 + $0xe8] sm:$0xf]  ;;  %v2851_v61 = vld [vmem:[#allocation11 + $0xf4] sm:$0xf0]  ;;  %v2439_v62 = vld [vmem:[#allocation11 + $0xa0] sm:$0xf] }
 0x134   : >> { %v2480_v63 = vor.u32 %v2851_v61, %v2479_v60  ;;  %v2842_v0 = vld [vmem:[#allocation11 + $0xac] sm:$0xf0]  ;;  %v2840_v1 = vld [vmem:[#allocation11 + $0xa4] sm:$0xf]  ;;  %v2441_v2 = vld [vmem:[#allocation11 + $0xb0] sm:$0xf0] }
 0x135   : >> { %v2841_v3 = vld [vmem:[#allocation11 + $0xac] sm:$0xf]  ;;  %v2449_v4 = vld [vmem:[#allocation11 + $0xb8] sm:$0xf0]  ;;  %v2463_v5 = vld [vmem:[#allocation11 + $0xc8] sm:$0xf]  ;;  %v2440_v6 = vor.u32 %v2842_v0, %v2439_v62  ;;  %v2444_v10 = vor.u32 %v2840_v1, %v2441_v2 }
 0x136   : >> { %1013 = vmatpush.bf16.msra.mxu0 %v2456_v54  ;;  %1040 = vmatpush.bf16.msra.mxu2 %v2480_v63  ;;  %v2847_v7 = vld [vmem:[#allocation11 + $0xd4] sm:$0xf0]  ;;  %v2423_v8 = vld [vmem:[#allocation11 + $0x80] sm:$0xf]  ;;  %v2838_v9 = vld [vmem:[#allocation11 + $0x8c] sm:$0xf0]  ;;  %v2452_v11 = vor.u32 %v2841_v3, %v2449_v4 }
 0x137   : >> { %1027 = vmatpush.bf16.msra.mxu1 %v2460_v58  ;;  %1055 = vmatpush.bf16.msra.mxu3 %v2468_v59  ;;  %v2464_v12 = vor.u32 %v2847_v7, %v2463_v5  ;;  %v2836_v13 = vld [vmem:[#allocation11 + $0x84] sm:$0xf]  ;;  %v2425_v14 = vld [vmem:[#allocation11 + $0x90] sm:$0xf0]  ;;  %v2837_v15 = vld [vmem:[#allocation11 + $0x8c] sm:$0xf]  ;;  %v2424_v19 = vor.u32 %v2838_v9, %v2423_v8 }
 0x138   : >> { %v2433_v16 = vld [vmem:[#allocation11 + $0x98] sm:$0xf0]  ;;  %v2447_v17 = vld [vmem:[#allocation11 + $0xa8] sm:$0xf]  ;;  %v2843_v18 = vld [vmem:[#allocation11 + $0xb4] sm:$0xf0]  ;;  %v2428_v23 = vor.u32 %v2836_v13, %v2425_v14 }
 0x139   : >> { %v2448_v20 = vor.u32 %v2843_v18, %v2447_v17  ;;  %v2407_v21 = vld [vmem:[#allocation11 + $0x60] sm:$0xf]  ;;  %v2834_v22 = vld [vmem:[#allocation11 + $0x6c] sm:$0xf0]  ;;  %v2436_v24 = vor.u32 %v2837_v15, %v2433_v16  ;;  %v2832_v25 = vld [vmem:[#allocation11 + $0x64] sm:$0xf] }
 0x13a   : >> { %1014 = vmatpush.bf16.msra.mxu0 %v2440_v6  ;;  %1041 = vmatpush.bf16.msra.mxu2 %v2464_v12  ;;  %v2431_v26 = vld [vmem:[#allocation11 + $0x88] sm:$0xf]  ;;  %v2839_v27 = vld [vmem:[#allocation11 + $0x94] sm:$0xf0]  ;;  %v2409_v28 = vld [vmem:[#allocation11 + $0x70] sm:$0xf0]  ;;  %v2408_v31 = vor.u32 %v2834_v22, %v2407_v21 }
 0x13b   : >> { %1028 = vmatpush.bf16.msra.mxu1 %v2444_v10  ;;  %1056 = vmatpush.bf16.msra.mxu3 %v2452_v11  ;;  %v2833_v29 = vld [vmem:[#allocation11 + $0x6c] sm:$0xf]  ;;  %v2417_v30 = vld [vmem:[#allocation11 + $0x78] sm:$0xf0]  ;;  %v2432_v32 = vor.u32 %v2839_v27, %v2431_v26  ;;  %v2391_v33 = vld [vmem:[#allocation11 + $0x40] sm:$0xf]  ;;  %v2412_v35 = vor.u32 %v2832_v25, %v2409_v28 }
 0x13c   : >> { %v2830_v34 = vld [vmem:[#allocation11 + $0x4c] sm:$0xf0]  ;;  %v2420_v36 = vor.u32 %v2833_v29, %v2417_v30  ;;  %v2828_v37 = vld [vmem:[#allocation11 + $0x44] sm:$0xf]  ;;  %v2415_v40 = vld [vmem:[#allocation11 + $0x68] sm:$0xf] }
 0x13d   : >> { %v2835_v41 = vld [vmem:[#allocation11 + $0x74] sm:$0xf0]  ;;  %v2393_v42 = vld [vmem:[#allocation11 + $0x50] sm:$0xf0]  ;;  %v2829_v43 = vld [vmem:[#allocation11 + $0x4c] sm:$0xf]  ;;  %v2392_v39 = vor.u32 %v2830_v34, %v2391_v33 }
 0x13e   : >> { %1015 = vmatpush.bf16.msra.mxu0 %v2424_v19  ;;  %1042 = vmatpush.bf16.msra.mxu2 %v2448_v20  ;;  %v2401_v38 = vld [vmem:[#allocation11 + $0x58] sm:$0xf0]  ;;  %v2416_v46 = vor.u32 %v2835_v41, %v2415_v40  ;;  %v2375_v47 = vld [vmem:[#allocation11 + $0x20] sm:$0xf]  ;;  %v2826_v48 = vld [vmem:[#allocation11 + $0x2c] sm:$0xf0]  ;;  %v2396_v49 = vor.u32 %v2828_v37, %v2393_v42 }
 0x13f   : >> { %1029 = vmatpush.bf16.msra.mxu1 %v2428_v23  ;;  %1057 = vmatpush.bf16.msra.mxu3 %v2436_v24  ;;  %v2404_v50 = vor.u32 %v2829_v43, %v2401_v38  ;;  %v2824_v44 = vld [vmem:[#allocation11 + $0x24] sm:$0xf]  ;;  %v2399_v51 = vld [vmem:[#allocation11 + $0x48] sm:$0xf]  ;;  %v2831_v52 = vld [vmem:[#allocation11 + $0x54] sm:$0xf0]  ;;  %v2376_v55 = vor.u32 %v2826_v48, %v2375_v47 }
 0x140   : >> { %v2377_v45 = vld [vmem:[#allocation11 + $0x30] sm:$0xf0]  ;;  %v2825_v53 = vld [vmem:[#allocation11 + $0x2c] sm:$0xf]  ;;  %v2385_v54 = vld [vmem:[#allocation11 + $0x38] sm:$0xf0]  ;;  %v2400_v56 = vor.u32 %v2831_v52, %v2399_v51 }
 0x141   : >> { %v2359_v57 = vld [vmem:[#allocation11] sm:$0xf]  ;;  %v2822_v58 = vld [vmem:[#allocation11 + $0xc] sm:$0xf0]  ;;  %v2380_v59 = vor.u32 %v2824_v44, %v2377_v45  ;;  %v2388_v60 = vor.u32 %v2825_v53, %v2385_v54  ;;  %v2820_v61 = vld [vmem:[#allocation11 + $0x4] sm:$0xf] }
 0x142   : >> { %1016 = vmatpush.bf16.msra.mxu0 %v2408_v31  ;;  %1043 = vmatpush.bf16.msra.mxu2 %v2432_v32  ;;  %v2383_v62 = vld [vmem:[#allocation11 + $0x28] sm:$0xf]  ;;  %v2827_v63 = vld [vmem:[#allocation11 + $0x34] sm:$0xf0]  ;;  %v2361_v0 = vld [vmem:[#allocation11 + $0x10] sm:$0xf0]  ;;  %v2360_v3 = vor.u32 %v2822_v58, %v2359_v57 }
 0x143   : >> { %1030 = vmatpush.bf16.msra.mxu1 %v2412_v35  ;;  %1058 = vmatpush.bf16.msra.mxu3 %v2420_v36  ;;  %v2821_v1 = vld [vmem:[#allocation11 + $0xc] sm:$0xf]  ;;  %v2369_v2 = vld [vmem:[#allocation11 + $0x18] sm:$0xf0]  ;;  %v817_v4 = vld [vmem:[#allocation2 + $0x10] sm:$0xff]  ;;  %v2384_v6 = vor.u32 %v2827_v63, %v2383_v62  ;;  %v2364_v7 = vor.u32 %v2820_v61, %v2361_v0  ;;  %s2354_s3 = sshll.u32 %s3420_s2, 4 }
 0x144   : >> { %v818_v5 = vld [vmem:[#allocation2] sm:$0xff]  ;;  %v2372_v8 = vor.u32 %v2821_v1, %v2369_v2  ;;  %v2367_v9 = vld [vmem:[#allocation11 + $0x8] sm:$0xf]  ;;  %v2823_v10 = vld [vmem:[#allocation11 + $0x14] sm:$0xf0]  ;;  %s3675_s8 = sshra.s32 %s2354_s3, 3 }
 0x145   : >> { %v819_v11 = vpack.c.bf16 %v818_v5, %v817_v4  ;;  %v2368_v12 = vor.u32 %v2823_v10, %v2367_v9  ;;  %s2819_s12 = sshll.u32 %s3675_s8, 5  ;;  %s2491_s15 = sshll.u32 %s3675_s8, 2 }
 0x146   : >> { %1017 = vmatpush.bf16.msra.mxu0 %v2392_v39  ;;  %1044 = vmatpush.bf16.msra.mxu2 %v2416_v46  ;;  %s3678_s17 = scalar_lea.vmem [#allocation5], %s2819_s12  ;;  %s1211_s21 = scalar_lea.vmem [#allocation4], %s2491_s15 }
 0x147   : >> { %1031 = vmatpush.bf16.msra.mxu1 %v2396_v49  ;;  %1059 = vmatpush.bf16.msra.mxu3 %v2404_v50  ;;  %v809_v13 = vld [vmem:[%s3678_s17] sm:$0xff]  ;;  %v810_v14 = vld [vmem:[%s3678_s17 + $0x8] sm:$0xff]  ;;  %v812_v21 = vld [vmem:[%s3678_s17 + $0x18] sm:$0xff]  ;;  %s802_s2 = sadd.s32 1, %s3420_s2  }
 0x148   : >> { %v813_v22 = vld [vmem:[%s3678_s17 + $0x20] sm:$0xff]  ;;  %v814_v24 = vld [vmem:[%s3678_s17 + $0x28] sm:$0xff]  ;;  %v811_v36 = vld [vmem:[%s3678_s17 + $0x10] sm:$0xff]  ;;  %p799_p1 = scmp.ge.s32.totalorder %s802_s2, 4  }
 0x149   : >> { %v816_v40 = vld [vmem:[%s3678_s17 + $0x38] sm:$0xff]  ;;  %v815_v0 = vld [vmem:[%s3678_s17 + $0x30] sm:$0xff]  ;;  %v2622_v4 = vld [vmem:[#allocation14 + $0xe0] sm:$0xf] (%p799_p1)  ;;  %s3789_s19 = smov (%p799_p1), 0  }
 0x14a   : >> { %1018 = vmatpush.bf16.msra.mxu0 %v2376_v55  ;;  %1045 = vmatpush.bf16.msra.mxu2 %v2400_v56 }
 0x14b   : >> { %1032 = vmatpush.bf16.msra.mxu1 %v2380_v59  ;;  %1060 = vmatpush.bf16.msra.mxu3 %v2388_v60 }
 0x14e   : >> { %1019 = vmatpush.bf16.msra.mxu0 %v2360_v3  ;;  %1046 = vmatpush.bf16.msra.mxu2 %v2384_v6 }
 0x14f   : >> { %1033 = vmatpush.bf16.msra.mxu1 %v2364_v7  ;;  %1061 = vmatpush.bf16.msra.mxu3 %v2372_v8 }
 0x151   : >> { %1020 = vmatmul.bf16.vlgmr.msra.gmra.mxu0 %v819_v11 }
 0x152   : >> { %1034 = vmatmul.bf16.vlgmr.msra.gmra.mxu1 %v819_v11  ;;  %1062 = vmatmul.bf16.vlgmr.msra.gmra.mxu3 %v819_v11 }
 0x153   : >> { %1047 = vmatpush.bf16.msra.mxu2 %v2368_v12 }
 0x156   : >> { %1048 = vmatmul.bf16.vlgmr.msra.gmra.mxu2 %v819_v11 }
 0x1ce   : >> { %v1021_v15 = vpop.f32.mrf.mxu0 }
 0x1cf   : >> { %v1068_v16 = vadd.f32 %v1021_v15, %v809_v13  ;;  %v1035_v17 = vpop.f32.mrf.mxu1  ;;  %v1192_v13 = vld [vmem:[#allocation3] sm:$0xff] }
 0x1d0   : >> { %v1069_v18 = vadd.f32 %v1035_v17, %v810_v14 }
 0x1d1   : >> { %v2485_v19 = vmul.f32 -1.442695, %v1068_v16 }
 0x1d2   : >> { %v2487_v20 = vmul.f32 -1.442695, %v1069_v18 }
 0x1d3   : >> { %3070 = vpow2.f32 %v2485_v19 }
 0x1d4   : >> { %3072 = vpow2.f32 %v2487_v20 }
 0x1d5   : >> { %v1063_v23 = vpop.f32.mrf.mxu3 }
 0x1d6   : >> { %v1071_v25 = vadd.f32 %v1063_v23, %v812_v21  ;;  %v1023_v26 = vpop.f32.mrf.mxu0 }
 0x1d7   : >> { %v1072_v27 = vadd.f32 %v1023_v26, %v813_v22  ;;  %v1037_v28 = vpop.f32.mrf.mxu1 }
 0x1d8   : >> { %v2489_v29 = vmul.f32 -1.442695, %v1071_v25  ;;  %v1073_v30 = vadd.f32 %v1037_v28, %v814_v24 }
 0x1d9   : >> { %v3071_v31 = vpop.eup %3070  ;;  %v2486_v32 = vmul.f32 -1.442695, %v1072_v27  ;;  %v1049_v41 = vpop.f32.mrf.mxu2 }
 0x1da   : >> { %v3073_v33 = vpop.eup %3072  ;;  %v1082_v34 = vadd.f32 1.0, %v3071_v31  ;;  %3074 = vpow2.f32 %v2489_v29  ;;  %v2488_v35 = vmul.f32 -1.442695, %v1073_v30  ;;  %v1070_v42 = vadd.f32 %v1049_v41, %v811_v36 }
 0x1db   : >> { %v1120_v37 = vadd.f32 1.0, %v3073_v33  ;;  %3076 = vpow2.f32 %v2486_v32 }
 0x1dc   : >> { %3078 = vrcp.f32 %v1082_v34  ;;  %v1093_v55 = vand.u32 2147483647, %v1082_v34  ;;  %v1095_v56 = vand.u32 2147483648, %v1082_v34  ;;  %vm1089_vm3 = vweird.f32 %v1082_v34 }
 0x1dd   : >> { %3080 = vrcp.f32 %v1120_v37  ;;  %v1065_v43 = vpop.f32.mrf.mxu3  ;;  %v1133_v58 = vand.u32 2147483648, %v1120_v37  ;;  %v1131_v59 = vand.u32 2147483647, %v1120_v37  ;;  %vm1127_vm1 = vweird.f32 %v1120_v37 }
 0x1de   : >> { %3082 = vpow2.f32 %v2488_v35  ;;  %v1075_v38 = vadd.f32 %v1065_v43, %v816_v40  ;;  %vm3699_vm4 = vcmp.eq.f32.partialorder %v1093_v55, 8.507059e+37  ;;  %v1096_v5 = vor.u32 1.1754944e-38, %v1095_v56  ;;  %v2872_v43 = vld [vmem:[#allocation14 + $0x84] sm:$0xf] (%p799_p1) }
 0x1df   : >> { %3084 = vtanh.f32 %v1070_v42  ;;  %v1134_v8 = vor.u32 1.1754944e-38, %v1133_v58  ;;  %vm1132_vm6 = vcmp.eq.f32.partialorder %v1131_v59, 8.507059e+37 }
 0x1e0   : >> { %v3075_v39 = vpop.eup %3074  ;;  %v2490_v46 = vmul.f32 -1.442695, %v1075_v38 }
 0x1e1   : >> { %v3077_v47 = vpop.eup %3076  ;;  %v3687_v48 = vadd.f32 1.0, %v3075_v39  ;;  %v1051_v1 = vpop.f32.mrf.mxu2 }
 0x1e2   : >> { %v3079_v49 = vpop.eup %3078  ;;  %v3689_v50 = vadd.f32 1.0, %v3077_v47  ;;  %3086 = vpow2.f32 %v2490_v46  ;;  %v1074_v14 = vadd.f32 %v1051_v1, %v815_v0 }
 0x1e3   : >> { %v3081_v44 = vpop.eup %3080  ;;  %v1085_v51 = vmul.f32 %v3079_v49, %v1082_v34  ;;  %3088 = vrcp.f32 %v3687_v48  ;;  %vm1090_vm0 = vweird.f32 %v3079_v49  ;;  %v1173_v16 = vand.u32 2147483648, %v3687_v48 }
 0x1e4   : >> { %v3083_v52 = vpop.eup %3082  ;;  %v1123_v45 = vmul.f32 %v3081_v44, %v1120_v37  ;;  %3090 = vrcp.f32 %v3689_v50  ;;  %vm1128_vm2 = vweird.f32 %v3081_v44  ;;  %vm1091_vm5 = vmor %vm1089_vm3, %vm1090_vm0  ;;  %v1110_v23 = vand.u32 2147483648, %v3689_v50 }
 0x1e5   : >> { %v1086_v53 = vsub.f32 1.0, %v1085_v51  ;;  %v3693_v54 = vadd.f32 1.0, %v3083_v52  ;;  %v3085_v60 = vpop.eup %3084  ;;  %vm1129_vm7 = vmor %vm1127_vm1, %vm1128_vm2  ;;  %vm1104_vm8 = vweird.f32 %v3689_v50  ;;  %v1108_v28 = vand.u32 2147483647, %v3689_v50 }
 0x1e6   : >> { %v1124_v57 = vsub.f32 1.0, %v1123_v45  ;;  %v1111_v36 = vor.u32 1.1754944e-38, %v1110_v23  ;;  %vm1167_vm13 = vweird.f32 %v3687_v48  ;;  %v1171_v41 = vand.u32 2147483647, %v3687_v48  ;;  %v2883_v23 = vld [vmem:[#allocation14 + $0xd4] sm:$0xf0] (%p799_p1) }
 0x1e7   : >> { %3092 = vrcp.f32 %v3693_v54  ;;  %v1087_v61 = vmul.f32 %v3079_v49, %v1086_v53  ;;  %v1148_v30 = vand.u32 2147483648, %v3693_v54  ;;  %v1146_v32 = vand.u32 2147483647, %v3693_v54 }
 0x1e8   : >> { %v3087_v62 = vpop.eup %3086  ;;  %v1125_v63 = vmul.f32 %v3081_v44, %v1124_v57  ;;  %vm1109_vm14 = vcmp.eq.f32.partialorder %v1108_v28, 8.507059e+37  ;;  %vm1142_vm0 = vweird.f32 %v3693_v54  ;;  %vm1172_vm3 = vcmp.eq.f32.partialorder %v1171_v41, 8.507059e+37  ;;  %v2878_v28 = vld [vmem:[#allocation14 + $0xac] sm:$0xf0] (%p799_p1)  ;;  %v2574_v41 = vld [vmem:[#allocation14 + $0x80] sm:$0xf] (%p799_p1) }
 0x1e9   : >> { %v3697_v2 = vpop.eup %3088  ;;  %v1088_v3 = vadd.f32 %v3079_v49, %v1087_v61  ;;  %v3703_v6 = vadd.f32 1.0, %v3087_v62  ;;  %vm1147_vm2 = vcmp.eq.f32.partialorder %v1146_v32, 8.507059e+37  ;;  %v2598_v32 = vld [vmem:[#allocation14 + $0xa8] sm:$0xf] (%p799_p1) }
 0x1ea   : >> { %v3091_v7 = vpop.eup %3090  ;;  %v1163_v9 = vmul.f32 %v3697_v2, %v3687_v48  ;;  %v1126_v10 = vadd.f32 %v3081_v44, %v1125_v63  ;;  %vm1168_vm10 = vweird.f32 %v3697_v2  ;;  %v1193_v48 = vld [vmem:[#allocation3 + $0x18] sm:$0xff] }
 0x1eb   : >> { %v1100_v11 = vmul.f32 %v3091_v7, %v3689_v50  ;;  %v1092_v12 = vsel %vm1091_vm5, %v3079_v49, %v1088_v3  ;;  %3094 = vrcp.f32 %v3703_v6  ;;  %vm1105_vm9 = vweird.f32 %v3091_v7  ;;  %vm3730_vm15 = vmor %vm1167_vm13, %vm1168_vm10 }
 0x1ec   : >> { %v1164_v15 = vsub.f32 1.0, %v1163_v9  ;;  %v1097_v17 = vsel %vm3699_vm4, %v1096_v5, %v1092_v12  ;;  %v1130_v18 = vsel %vm1129_vm7, %v3081_v44, %v1126_v10  ;;  %3096 = vtanh.f32 %v1074_v14  ;;  %vm1106_vm12 = vmor %vm1104_vm8, %vm1105_vm9  ;;  %v2886_v5 = vld [vmem:[#allocation14 + $0xec] sm:$0xf0] (%p799_p1)  ;;  %v2630_v9 = vld [vmem:[#allocation14 + $0xe8] sm:$0xf] (%p799_p1) }
 0x1ed   : >> { %v3093_v19 = vpop.eup %3092  ;;  %v1101_v20 = vsub.f32 1.0, %v1100_v11  ;;  %v1135_v21 = vsel %vm1132_vm6, %v1134_v8, %v1130_v18  ;;  %v1196_v22 = vmul.f32 %v3085_v60, %v1097_v17  ;;  %v1149_v50 = vor.u32 1.1754944e-38, %v1148_v30  ;;  %v2624_v8 = vld [vmem:[#allocation14 + $0xf0] sm:$0xf0] (%p799_p1)  ;;  %v2887_v10 = vld [vmem:[#allocation14 + $0xf4] sm:$0xf0] (%p799_p1) }
 0x1ee   : >> { %v1165_v24 = vmul.f32 %v3697_v2, %v1164_v15  ;;  %v1138_v25 = vmul.f32 %v3093_v19, %v3693_v54  ;;  %v1194_v26 = vmul.f32 %v1192_v13, %v1135_v21  ;;  %vm1143_vm11 = vweird.f32 %v3093_v19  ;;  %v2885_v13 = vld [vmem:[#allocation14 + $0xec] sm:$0xf] (%p799_p1)  ;;  %v2632_v14 = vld [vmem:[#allocation14 + $0xf8] sm:$0xf0] (%p799_p1)  ;;  %v2606_v15 = vld [vmem:[#allocation14 + $0xc0] sm:$0xf] (%p799_p1) }
 0x1ef   : >> { %v1102_v27 = vmul.f32 %v3091_v7, %v1101_v20  ;;  %vm1144_vm1 = vmor %vm1142_vm0, %vm1143_vm11  ;;  %v1174_v44 = vor.u32 1.1754944e-38, %v1173_v16  ;;  %v1188_v60 = vand.u32 2147483648, %v3703_v6  ;;  %vm1182_vm5 = vweird.f32 %v3703_v6  ;;  %v2882_v17 = vld [vmem:[#allocation14 + $0xcc] sm:$0xf0] (%p799_p1)  ;;  %v2880_v18 = vld [vmem:[#allocation14 + $0xc4] sm:$0xf] (%p799_p1) }
 0x1f0   : >> { %v1139_v29 = vsub.f32 1.0, %v1138_v25  ;;  %v1198_v31 = vadd.f32 %v1196_v22, %v1194_v26  ;;  %v1166_v34 = vadd.f32 %v3697_v2, %v1165_v24  ;;  %v1186_v61 = vand.u32 2147483647, %v3703_v6  ;;  %v2614_v22 = vld [vmem:[#allocation14 + $0xc8] sm:$0xf] (%p799_p1) }
 0x1f1   : >> { %v3095_v33 = vpop.eup %3094  ;;  %v1103_v35 = vadd.f32 %v3091_v7, %v1102_v27  ;;  %v1189_v63 = vor.u32 1.1754944e-38, %v1188_v60  ;;  %v2631_v12 = vor.u32 (%p799_p1), %v2887_v10, %v2630_v9  ;;  %v2635_v16 = vor.u32 (%p799_p1), %v2885_v13, %v2632_v14  ;;  %v2881_v24 = vld [vmem:[#allocation14 + $0xcc] sm:$0xf] (%p799_p1)  ;;  %v2616_v26 = vld [vmem:[#allocation14 + $0xd8] sm:$0xf0] (%p799_p1) }
 0x1f2   : >> { %v1140_v37 = vmul.f32 %v3093_v19, %v1139_v29  ;;  %3098 = vtanh.f32 %v1198_v31  ;;  %1206 = vst [vmem:[#allocation3] sm:$0xff] %v1198_v31  ;;  %v1178_v40 = vmul.f32 %v3095_v33, %v3703_v6  ;;  %v3097_v47 = vpop.eup %3096  ;;  %v1170_v49 = vsel %vm3730_vm15, %v3697_v2, %v1166_v34  ;;  %v2884_v6 = vld [vmem:[#allocation14 + $0xe4] sm:$0xf] (%p799_p1)  ;;  %v2590_v27 = vld [vmem:[#allocation14 + $0xa0] sm:$0xf] (%p799_p1) }
 0x1f3   : >> { %v1107_v42 = vsel %vm1106_vm12, %v3091_v7, %v1103_v35  ;;  %v1175_v55 = vsel %vm1172_vm3, %v1174_v44, %v1170_v49  ;;  %vm1183_vm4 = vweird.f32 %v3095_v33  ;;  %vm1187_vm7 = vcmp.eq.f32.partialorder %v1186_v61, 8.507059e+37  ;;  %1506 = vmatpush.bf16.msra.mxu2 (%p799_p1), %v2631_v12  ;;  %1535 = vmatpush.bf16.msra.mxu3 (%p799_p1), %v2635_v16  ;;  %v2876_v30 = vld [vmem:[#allocation14 + $0xa4] sm:$0xf] (%p799_p1)  ;;  %v2592_v31 = vld [vmem:[#allocation14 + $0xb0] sm:$0xf0] (%p799_p1) }
 0x1f4   : >> { %v1179_v38 = vsub.f32 1.0, %v1178_v40  ;;  %v1112_v39 = vsel %vm1109_vm14, %v1111_v36, %v1107_v42  ;;  %v1141_v46 = vadd.f32 %v3093_v19, %v1140_v37  ;;  %vm1184_vm6 = vmor %vm1182_vm5, %vm1183_vm4  ;;  %v2623_v7 = vor.u32 (%p799_p1), %v2886_v5, %v2622_v4  ;;  %v2879_v34 = vld [vmem:[#allocation14 + $0xb4] sm:$0xf0] (%p799_p1)  ;;  %v2877_v35 = vld [vmem:[#allocation14 + $0xac] sm:$0xf] (%p799_p1) }
 0x1f5   : >> { %v1197_v52 = vmul.f32 %v3097_v47, %v1112_v39  ;;  %v2627_v11 = vor.u32 (%p799_p1), %v2884_v6, %v2624_v8  ;;  %v2607_v20 = vor.u32 (%p799_p1), %v2882_v17, %v2606_v15  ;;  %v2615_v25 = vor.u32 (%p799_p1), %v2883_v23, %v2614_v22  ;;  %v2600_v36 = vld [vmem:[#allocation14 + $0xb8] sm:$0xf0] (%p799_p1)  ;;  %v2874_v42 = vld [vmem:[#allocation14 + $0x8c] sm:$0xf0] (%p799_p1)  ;;  %v2576_v39 = vld [vmem:[#allocation14 + $0x90] sm:$0xf0] (%p799_p1) }
 0x1f6   : >> { %v1145_v51 = vsel %vm1144_vm1, %v3093_v19, %v1141_v46  ;;  %v1180_v45 = vmul.f32 %v3095_v33, %v1179_v38  ;;  %1448 = vmatpush.bf16.msra.mxu0 (%p799_p1), %v2623_v7  ;;  %v2608_v19 = vld [vmem:[#allocation14 + $0xd0] sm:$0xf0] (%p799_p1)  ;;  %v2619_v29 = vor.u32 (%p799_p1), %v2881_v24, %v2616_v26  ;;  %v2595_v37 = vor.u32 (%p799_p1), %v2876_v30, %v2592_v31  ;;  %v2582_v46 = vld [vmem:[#allocation14 + $0x88] sm:$0xf] (%p799_p1)  ;;  %v2875_v47 = vld [vmem:[#allocation14 + $0x94] sm:$0xf0] (%p799_p1) }
 0x1f7   : >> { %v1150_v53 = vsel %vm1147_vm2, %v1149_v50, %v1145_v51  ;;  %1477 = vmatpush.bf16.msra.mxu1 (%p799_p1), %v2627_v11  ;;  %v2611_v21 = vor.u32 (%p799_p1), %v2880_v18, %v2608_v19  ;;  %1507 = vmatpush.bf16.msra.mxu2 (%p799_p1), %v2615_v25  ;;  %v2599_v40 = vor.u32 (%p799_p1), %v2879_v34, %v2598_v32  ;;  %v2873_v49 = vld [vmem:[#allocation14 + $0x8c] sm:$0xf] (%p799_p1)  ;;  %v2584_v50 = vld [vmem:[#allocation14 + $0x98] sm:$0xf0] (%p799_p1)  ;;  %v2550_v4 = vld [vmem:[#allocation14 + $0x48] sm:$0xf] (%p799_p1) }
 0x1f8   : >> { %v3099_v54 = vpop.eup %3098  ;;  %v1195_v56 = vmul.f32 %v1193_v48, %v1150_v53  ;;  %v1181_v59 = vadd.f32 %v3095_v33, %v1180_v45  ;;  %1536 = vmatpush.bf16.msra.mxu3 (%p799_p1), %v2619_v29  ;;  %v2603_v38 = vor.u32 (%p799_p1), %v2877_v35, %v2600_v36  ;;  %v2575_v48 = vor.u32 (%p799_p1), %v2874_v42, %v2574_v41  ;;  %v2870_v45 = vld [vmem:[#allocation14 + $0x6c] sm:$0xf0] (%p799_p1)  ;;  %v2868_v53 = vld [vmem:[#allocation14 + $0x64] sm:$0xf] (%p799_p1)  ;;  %v2867_v5 = vld [vmem:[#allocation14 + $0x54] sm:$0xf0] (%p799_p1) }
 0x1f9   : >> { %v1202_v57 = vmul.f32 %v3099_v54, %v1175_v55  ;;  %v2579_v44 = vor.u32 (%p799_p1), %v2872_v43, %v2576_v39  ;;  %v2583_v51 = vor.u32 (%p799_p1), %v2875_v47, %v2582_v46  ;;  %v2587_v54 = vor.u32 (%p799_p1), %v2873_v49, %v2584_v50  ;;  %v2560_v55 = vld [vmem:[#allocation14 + $0x70] sm:$0xf0] (%p799_p1)  ;;  %v2865_v6 = vld [vmem:[#allocation14 + $0x4c] sm:$0xf] (%p799_p1)  ;;  %v2552_v7 = vld [vmem:[#allocation14 + $0x58] sm:$0xf0] (%p799_p1) }
 0x1fa   : >> { %v1199_v58 = vadd.f32 %v1197_v52, %v1195_v56  ;;  %v1185_v62 = vsel %vm1184_vm6, %v3095_v33, %v1181_v59  ;;  %1449 = vmatpush.bf16.msra.mxu0 (%p799_p1), %v2607_v20  ;;  %v2591_v33 = vor.u32 (%p799_p1), %v2878_v28, %v2590_v27  ;;  %v2558_v52 = vld [vmem:[#allocation14 + $0x60] sm:$0xf] (%p799_p1)  ;;  %v2566_v56 = vld [vmem:[#allocation14 + $0x68] sm:$0xf] (%p799_p1)  ;;  %v2568_v59 = vld [vmem:[#allocation14 + $0x78] sm:$0xf0] (%p799_p1)  ;;  %v2563_v61 = vor.u32 (%p799_p1), %v2868_v53, %v2560_v55 }
 0x1fb   : >> { %1204 = vst [vmem:[#allocation2 + $0x10] sm:$0xff] %v1202_v57  ;;  %v1190_v1 = vsel %vm1187_vm7, %v1189_v63, %v1185_v62  ;;  %1478 = vmatpush.bf16.msra.mxu1 (%p799_p1), %v2611_v21  ;;  %1508 = vmatpush.bf16.msra.mxu2 (%p799_p1), %v2599_v40  ;;  %v2559_v60 = vor.u32 (%p799_p1), %v2870_v45, %v2558_v52  ;;  %v2542_v63 = vld [vmem:[#allocation14 + $0x40] sm:$0xf] (%p799_p1)  ;;  %v2862_v12 = vld [vmem:[#allocation14 + $0x2c] sm:$0xf0] (%p799_p1) }
 0x1fc   : >> { %3100 = vtanh.f32 %v1199_v58  ;;  %1207 = vst [vmem:[#allocation3 + $0x18] sm:$0xff] %v1199_v58  ;;  %1537 = vmatpush.bf16.msra.mxu3 (%p799_p1), %v2603_v38  ;;  %v2869_v58 = vld [vmem:[#allocation14 + $0x6c] sm:$0xf] (%p799_p1)  ;;  %v2551_v10 = vor.u32 (%p799_p1), %v2867_v5, %v2550_v4  ;;  %v2526_v11 = vld [vmem:[#allocation14 + $0x20] sm:$0xf] (%p799_p1)  ;;  %v2555_v14 = vor.u32 (%p799_p1), %v2865_v6, %v2552_v7 }
 0x1fd   : > { %v2860_v13 = vld [vmem:[#allocation14 + $0x24] sm:$0xf] (%p799_p1)  ;;  %v2528_v15 = vld [vmem:[#allocation14 + $0x30] sm:$0xf0] (%p799_p1)  ;;  %v2534_v16 = vld [vmem:[#allocation14 + $0x28] sm:$0xf] (%p799_p1)  ;;  %v2527_v20 = vor.u32 (%p799_p1), %v2862_v12, %v2526_v11 }
 0x1fe   : > { %1450 = vmatpush.bf16.msra.mxu0 (%p799_p1), %v2591_v33  ;;  %v2863_v17 = vld [vmem:[#allocation14 + $0x34] sm:$0xf0] (%p799_p1)  ;;  %v2861_v18 = vld [vmem:[#allocation14 + $0x2c] sm:$0xf] (%p799_p1)  ;;  %v2536_v19 = vld [vmem:[#allocation14 + $0x38] sm:$0xf0] (%p799_p1)  ;;  %v2531_v21 = vor.u32 (%p799_p1), %v2860_v13, %v2528_v15 }
 0x1ff   : > { %1479 = vmatpush.bf16.msra.mxu1 (%p799_p1), %v2595_v37  ;;  %1509 = vmatpush.bf16.msra.mxu2 (%p799_p1), %v2583_v51  ;;  %v2535_v22 = vor.u32 (%p799_p1), %v2863_v17, %v2534_v16  ;;  %v2510_v23 = vld [vmem:[#allocation14] sm:$0xf] (%p799_p1)  ;;  %v2858_v24 = vld [vmem:[#allocation14 + $0xc] sm:$0xf0] (%p799_p1)  ;;  %v2856_v25 = vld [vmem:[#allocation14 + $0x4] sm:$0xf] (%p799_p1)  ;;  %v2539_v26 = vor.u32 (%p799_p1), %v2861_v18, %v2536_v19 }
 0x200   : > { %1538 = vmatpush.bf16.msra.mxu3 (%p799_p1), %v2587_v54  ;;  %v2512_v27 = vld [vmem:[#allocation14 + $0x10] sm:$0xf0] (%p799_p1)  ;;  %v2518_v28 = vld [vmem:[#allocation14 + $0x8] sm:$0xf] (%p799_p1)  ;;  %v2859_v29 = vld [vmem:[#allocation14 + $0x14] sm:$0xf0] (%p799_p1)  ;;  %v2511_v32 = vor.u32 (%p799_p1), %v2858_v24, %v2510_v23 }
 0x201   : > { %v2857_v30 = vld [vmem:[#allocation14 + $0xc] sm:$0xf] (%p799_p1)  ;;  %v2520_v31 = vld [vmem:[#allocation14 + $0x18] sm:$0xf0] (%p799_p1)  ;;  %v2515_v33 = vor.u32 (%p799_p1), %v2856_v25, %v2512_v27  ;;  %v2519_v34 = vor.u32 (%p799_p1), %v2859_v29, %v2518_v28 }
 0x202   : >> { %v3101_v0 = vpop.eup %3100  ;;  %1451 = vmatpush.bf16.msra.mxu0 (%p799_p1), %v2575_v48  ;;  %v2523_v35 = vor.u32 (%p799_p1), %v2857_v30, %v2520_v31  ;;  %v1254_v42 = vld [vmem:[%s3908_s6] sm:$0xf] (%p799_p1) }
 0x203   : >> { %v1203_v2 = vmul.f32 %v3101_v0, %v1190_v1  ;;  %801 = sbr.rel (!%p799_p1) target bundleno = 303 (0x12f), region = 137  ;;  %1480 = vmatpush.bf16.msra.mxu1 (%p799_p1), %v2579_v44  ;;  %v2866_v0 = vld [vmem:[#allocation14 + $0x4c] sm:$0xf0] (%p799_p1)  ;;  %v2864_v1 = vld [vmem:[#allocation14 + $0x44] sm:$0xf] (%p799_p1)  ;;  %v3749_v43 = vperm.slane (%p799_p1), %v1254_v42, 0 }
 0x204   : > { %v2543_v8 = vor.u32 (%p799_p1), %v2866_v0, %v2542_v63  ;;  %v3751_v38 = vperm.slane (%p799_p1), %v1254_v42, 1  ;;  %v3755_v50 = vperm.slane (%p799_p1), %v1254_v42, 2  ;;  %v3757_v48 = vperm.slane (%p799_p1), %v1254_v42, 3 }
 0x205   : >> { %1205 = vst [vmem:[#allocation2] sm:$0xff] %v1203_v2  ;;  %v2927_v3 = vpack.c.bf16 %v1203_v2, %v1202_v57  ;;  %v2871_v57 = vld [vmem:[#allocation14 + $0x74] sm:$0xf0] (%p799_p1)  ;;  %v2571_v2 = vor.u32 (%p799_p1), %v2869_v58, %v2568_v59 }
 0x206   : > { %v2567_v62 = vor.u32 (%p799_p1), %v2871_v57, %v2566_v56  ;;  %1452 = vmatpush.bf16.msra.mxu0 (%p799_p1), %v2559_v60 }
 0x207   : >> { %2928 = vst [vmem:[%s1211_s21] sm:$0xff] %v2927_v3   ;;  %v2544_v3 = vld [vmem:[#allocation14 + $0x50] sm:$0xf0] (%p799_p1)  ;;  %1481 = vmatpush.bf16.msra.mxu1 (%p799_p1), %v2563_v61  ;;  %1539 = vmatpush.bf16.msra.mxu3 (%p799_p1), %v2571_v2 }
 0x208   : > { %1510 = vmatpush.bf16.msra.mxu2 %v2567_v62  ;;  %v2547_v9 = vor.u32 %v2864_v1, %v2544_v3 }
 0x20a   : > { %1453 = vmatpush.bf16.msra.mxu0 %v2543_v8 }
 0x20b   : > { %1482 = vmatpush.bf16.msra.mxu1 %v2547_v9  ;;  %1540 = vmatpush.bf16.msra.mxu3 %v2555_v14 }
 0x20c   : > { %1511 = vmatpush.bf16.msra.mxu2 %v2551_v10 }
 0x20e   : > { %1454 = vmatpush.bf16.msra.mxu0 %v2527_v20  ;;  %v2852_v36 = vld [vmem:[#allocation4] sm:$0xff]  ;;  %v2853_v37 = vld [vmem:[#allocation4 + $0x8] sm:$0xff]  ;;  %v2854_v40 = vld [vmem:[#allocation4 + $0x10] sm:$0xff] }
 0x20f   : > { %1483 = vmatpush.bf16.msra.mxu1 %v2531_v21  ;;  %1541 = vmatpush.bf16.msra.mxu3 %v2539_v26  ;;  %v2855_v41 = vld [vmem:[#allocation4 + $0x18] sm:$0xff] }
 0x210   : > { %1512 = vmatpush.bf16.msra.mxu2 %v2535_v22 }
 0x212   : > { %1455 = vmatpush.bf16.msra.mxu0 %v2511_v32 }
 0x213   : > { %1484 = vmatpush.bf16.msra.mxu1 %v2515_v33  ;;  %1542 = vmatpush.bf16.msra.mxu3 %v2523_v35 }
 0x214   : > { %1513 = vmatpush.bf16.msra.mxu2 %v2519_v34 }
 0x215   : > { %1456 = vmatmul.bf16.vlgmr.msra.gmra.mxu0 %v2852_v36 }
 0x216   : > { %1485 = vmatmul.bf16.vlgmr.msra.gmra.mxu1 %v2852_v36  ;;  %1543 = vmatmul.bf16.vlgmr.msra.gmra.mxu3 %v2852_v36 }
 0x217   : > { %1514 = vmatmul.bf16.vlgmr.msra.gmra.mxu2 %v2852_v36 }
 0x225   : > { %1461 = vmatmul.bf16.gmra.mxu0 %v2853_v37 }
 0x226   : > { %1490 = vmatmul.bf16.gmra.mxu1 %v2853_v37  ;;  %1548 = vmatmul.bf16.gmra.mxu3 %v2853_v37 }
 0x227   : > { %1519 = vmatmul.bf16.gmra.mxu2 %v2853_v37 }
 0x235   : > { %1466 = vmatmul.bf16.gmra.mxu0 %v2854_v40 }
 0x236   : > { %1495 = vmatmul.bf16.gmra.mxu1 %v2854_v40  ;;  %1553 = vmatmul.bf16.gmra.mxu3 %v2854_v40 }
 0x237   : > { %1524 = vmatmul.bf16.gmra.mxu2 %v2854_v40 }
 0x245   : > { %1471 = vmatmul.bf16.gmra.mxu0 %v2855_v41 }
 0x246   : > { %1500 = vmatmul.bf16.gmra.mxu1 %v2855_v41  ;;  %1558 = vmatmul.bf16.gmra.mxu3 %v2855_v41 }
 0x247   : > { %1529 = vmatmul.bf16.gmra.mxu2 %v2855_v41 }
 0x292   : > { %v1457_v39 = vpop.f32.mrf.mxu0 }
 0x293   : > { %v1458_v46 = vadd.f32 %v1457_v39, %v3749_v43  ;;  %v1486_v47 = vpop.f32.mrf.mxu1 }
 0x294   : > { %v1487_v49 = vadd.f32 %v1486_v47, %v3751_v38 }
 0x295   : > { %1564 = vst [vmem:[#allocation5] sm:$0xff] %v1458_v46 }
 0x296   : > { %1565 = vst [vmem:[#allocation5 + $0x8] sm:$0xff] %v1487_v49 }
 0x299   : > { %v1544_v52 = vpop.f32.mrf.mxu3 }
 0x29a   : > { %v1515_v44 = vpop.f32.mrf.mxu2  ;;  %v1459_v45 = vpop.f32.mrf.mxu0  ;;  %v1545_v53 = vadd.f32 %v1544_v52, %v3757_v48 }
 0x29b   : > { %v1516_v51 = vadd.f32 %v1515_v44, %v3755_v50  ;;  %v1460_v54 = vadd.f32 %v1459_v45, %v3749_v43  ;;  %v1488_v55 = vpop.f32.mrf.mxu1 }
 0x29c   : > { %v1489_v56 = vadd.f32 %v1488_v55, %v3751_v38  ;;  %1567 = vst [vmem:[#allocation5 + $0x18] sm:$0xff] %v1545_v53 }
 0x29d   : > { %1566 = vst [vmem:[#allocation5 + $0x10] sm:$0xff] %v1516_v51 }
 0x29e   : > { %1568 = vst [vmem:[#allocation5 + $0x20] sm:$0xff] %v1460_v54 }
 0x29f   : > { %1569 = vst [vmem:[#allocation5 + $0x28] sm:$0xff] %v1489_v56 }
 0x2a1   : > { %v1546_v59 = vpop.f32.mrf.mxu3 }
 0x2a2   : > { %v1517_v57 = vpop.f32.mrf.mxu2  ;;  %v1462_v60 = vpop.f32.mrf.mxu0  ;;  %v1547_v61 = vadd.f32 %v1546_v59, %v3757_v48 }
 0x2a3   : > { %v1518_v58 = vadd.f32 %v1517_v57, %v3755_v50  ;;  %v1463_v62 = vadd.f32 %v1462_v60, %v3749_v43  ;;  %v1491_v63 = vpop.f32.mrf.mxu1 }
 0x2a4   : > { %v1492_v0 = vadd.f32 %v1491_v63, %v3751_v38  ;;  %1571 = vst [vmem:[#allocation5 + $0x38] sm:$0xff] %v1547_v61 }
 0x2a5   : > { %1570 = vst [vmem:[#allocation5 + $0x30] sm:$0xff] %v1518_v58 }
 0x2a6   : > { %1572 = vst [vmem:[#allocation5 + $0x40] sm:$0xff] %v1463_v62 }
 0x2a7   : > { %1573 = vst [vmem:[#allocation5 + $0x48] sm:$0xff] %v1492_v0 }
 0x2a9   : > { %v1549_v3 = vpop.f32.mrf.mxu3 }
 0x2aa   : > { %v1520_v1 = vpop.f32.mrf.mxu2  ;;  %v1464_v4 = vpop.f32.mrf.mxu0  ;;  %v1550_v5 = vadd.f32 %v1549_v3, %v3757_v48 }
 0x2ab   : > { %v1521_v2 = vadd.f32 %v1520_v1, %v3755_v50  ;;  %v1465_v6 = vadd.f32 %v1464_v4, %v3749_v43  ;;  %v1493_v7 = vpop.f32.mrf.mxu1 }
 0x2ac   : > { %v1494_v8 = vadd.f32 %v1493_v7, %v3751_v38  ;;  %1575 = vst [vmem:[#allocation5 + $0x58] sm:$0xff] %v1550_v5 }
 0x2ad   : > { %1574 = vst [vmem:[#allocation5 + $0x50] sm:$0xff] %v1521_v2 }
 0x2ae   : > { %1576 = vst [vmem:[#allocation5 + $0x60] sm:$0xff] %v1465_v6 }
 0x2af   : > { %1577 = vst [vmem:[#allocation5 + $0x68] sm:$0xff] %v1494_v8 }
 0x2b1   : > { %v1551_v11 = vpop.f32.mrf.mxu3 }
 0x2b2   : > { %v1522_v9 = vpop.f32.mrf.mxu2  ;;  %v1467_v12 = vpop.f32.mrf.mxu0  ;;  %v1552_v13 = vadd.f32 %v1551_v11, %v3757_v48 }
 0x2b3   : > { %v1523_v10 = vadd.f32 %v1522_v9, %v3755_v50  ;;  %v1468_v14 = vadd.f32 %v1467_v12, %v3749_v43  ;;  %v1496_v15 = vpop.f32.mrf.mxu1 }
 0x2b4   : > { %v1497_v16 = vadd.f32 %v1496_v15, %v3751_v38  ;;  %1579 = vst [vmem:[#allocation5 + $0x78] sm:$0xff] %v1552_v13 }
 0x2b5   : > { %1578 = vst [vmem:[#allocation5 + $0x70] sm:$0xff] %v1523_v10 }
 0x2b6   : > { %1580 = vst [vmem:[#allocation5 + $0x80] sm:$0xff] %v1468_v14 }
 0x2b7   : > { %1581 = vst [vmem:[#allocation5 + $0x88] sm:$0xff] %v1497_v16 }
 0x2b9   : > { %v1554_v19 = vpop.f32.mrf.mxu3 }
 0x2ba   : > { %v1525_v17 = vpop.f32.mrf.mxu2  ;;  %v1469_v20 = vpop.f32.mrf.mxu0  ;;  %v1555_v21 = vadd.f32 %v1554_v19, %v3757_v48 }
 0x2bb   : > { %v1526_v18 = vadd.f32 %v1525_v17, %v3755_v50  ;;  %v1470_v22 = vadd.f32 %v1469_v20, %v3749_v43  ;;  %v1498_v23 = vpop.f32.mrf.mxu1 }
 0x2bc   : > { %v1499_v24 = vadd.f32 %v1498_v23, %v3751_v38  ;;  %1583 = vst [vmem:[#allocation5 + $0x98] sm:$0xff] %v1555_v21 }
 0x2bd   : > { %1582 = vst [vmem:[#allocation5 + $0x90] sm:$0xff] %v1526_v18 }
 0x2be   : > { %1584 = vst [vmem:[#allocation5 + $0xa0] sm:$0xff] %v1470_v22 }
 0x2bf   : > { %1585 = vst [vmem:[#allocation5 + $0xa8] sm:$0xff] %v1499_v24 }
 0x2c1   : > { %v1556_v27 = vpop.f32.mrf.mxu3 }
 0x2c2   : > { %v1527_v25 = vpop.f32.mrf.mxu2  ;;  %v1472_v28 = vpop.f32.mrf.mxu0  ;;  %v1557_v29 = vadd.f32 %v1556_v27, %v3757_v48 }
 0x2c3   : > { %v1528_v26 = vadd.f32 %v1527_v25, %v3755_v50  ;;  %v1473_v30 = vadd.f32 %v1472_v28, %v3749_v43  ;;  %v1501_v31 = vpop.f32.mrf.mxu1 }
 0x2c4   : > { %v1502_v32 = vadd.f32 %v1501_v31, %v3751_v38  ;;  %1587 = vst [vmem:[#allocation5 + $0xb8] sm:$0xff] %v1557_v29 }
 0x2c5   : > { %1586 = vst [vmem:[#allocation5 + $0xb0] sm:$0xff] %v1528_v26 }
 0x2c6   : > { %1588 = vst [vmem:[#allocation5 + $0xc0] sm:$0xff] %v1473_v30 }
 0x2c7   : > { %1589 = vst [vmem:[#allocation5 + $0xc8] sm:$0xff] %v1502_v32 }
 0x2c9   : > { %v1559_v35 = vpop.f32.mrf.mxu3 }
 0x2ca   : > { %v1530_v33 = vpop.f32.mrf.mxu2  ;;  %v1474_v36 = vpop.f32.mrf.mxu0  ;;  %v1560_v37 = vadd.f32 %v1559_v35, %v3757_v48 }
 0x2cb   : > { %v1531_v34 = vadd.f32 %v1530_v33, %v3755_v50  ;;  %v1475_v40 = vadd.f32 %v1474_v36, %v3749_v43  ;;  %v1503_v41 = vpop.f32.mrf.mxu1 }
 0x2cc   : > { %v1504_v42 = vadd.f32 %v1503_v41, %v3751_v38  ;;  %1591 = vst [vmem:[#allocation5 + $0xd8] sm:$0xff] %v1560_v37 }
 0x2cd   : > { %1590 = vst [vmem:[#allocation5 + $0xd0] sm:$0xff] %v1531_v34 }
 0x2ce   : > { %1592 = vst [vmem:[#allocation5 + $0xe0] sm:$0xff] %v1475_v40 }
 0x2cf   : > { %1593 = vst [vmem:[#allocation5 + $0xe8] sm:$0xff] %v1504_v42 }
 0x2d1   : > { %v1561_v47 = vpop.f32.mrf.mxu3 }
 0x2d2   : > { %v1532_v39 = vpop.f32.mrf.mxu2  ;;  %v1562_v49 = vadd.f32 %v1561_v47, %v3757_v48 }
 0x2d3   : > { %v1533_v46 = vadd.f32 %v1532_v39, %v3755_v50 }
 0x2d4   : > { %1595 = vst [vmem:[#allocation5 + $0xf8] sm:$0xff] %v1562_v49 }
 0x2d5   : > { %1594 = vst [vmem:[#allocation5 + $0xf0] sm:$0xff] %v1533_v46 }
 0x2d6 LB: >> { %v2753_v43 = vld [vmem:[#allocation15 + $0xe0] sm:$0xf]  ;;  %v2919_v38 = vld [vmem:[#allocation15 + $0xec] sm:$0xf0]  ;;  %v2917_v44 = vld [vmem:[#allocation15 + $0xe4] sm:$0xf]  ;;  %s3424_s19 = sphi %s3789_s19, %s1601_s19  }
 0x2d7   : >> { %v2754_v51 = vor.u32 %v2919_v38, %v2753_v43  ;;  %v2755_v52 = vld [vmem:[#allocation15 + $0xf0] sm:$0xf0]  ;;  %v2918_v45 = vld [vmem:[#allocation15 + $0xec] sm:$0xf]  ;;  %v2763_v53 = vld [vmem:[#allocation15 + $0xf8] sm:$0xf0] }
 0x2d8   : >> { %v2758_v50 = vor.u32 %v2917_v44, %v2755_v52  ;;  %v2766_v54 = vor.u32 %v2918_v45, %v2763_v53  ;;  %v2737_v55 = vld [vmem:[#allocation15 + $0xc0] sm:$0xf]  ;;  %v2915_v48 = vld [vmem:[#allocation15 + $0xcc] sm:$0xf0]  ;;  %v2913_v56 = vld [vmem:[#allocation15 + $0xc4] sm:$0xf] }
 0x2d9   : >> { %1812 = vmatpush.bf16.msra.mxu0 %v2754_v51  ;;  %v2738_v57 = vor.u32 %v2915_v48, %v2737_v55  ;;  %v2739_v58 = vld [vmem:[#allocation15 + $0xd0] sm:$0xf0]  ;;  %v2914_v59 = vld [vmem:[#allocation15 + $0xcc] sm:$0xf]  ;;  %v2747_v60 = vld [vmem:[#allocation15 + $0xd8] sm:$0xf0] }
 0x2da   : >> { %1826 = vmatpush.bf16.msra.mxu1 %v2758_v50  ;;  %1854 = vmatpush.bf16.msra.mxu3 %v2766_v54  ;;  %v2742_v61 = vor.u32 %v2913_v56, %v2739_v58  ;;  %v2750_v62 = vor.u32 %v2914_v59, %v2747_v60  ;;  %v2761_v63 = vld [vmem:[#allocation15 + $0xe8] sm:$0xf]  ;;  %v2920_v0 = vld [vmem:[#allocation15 + $0xf4] sm:$0xf0]  ;;  %v2721_v1 = vld [vmem:[#allocation15 + $0xa0] sm:$0xf] }
 0x2db   : >> { %v2762_v2 = vor.u32 %v2920_v0, %v2761_v63  ;;  %v2911_v3 = vld [vmem:[#allocation15 + $0xac] sm:$0xf0]  ;;  %v2909_v4 = vld [vmem:[#allocation15 + $0xa4] sm:$0xf]  ;;  %v2723_v5 = vld [vmem:[#allocation15 + $0xb0] sm:$0xf0] }
 0x2dc   : >> { %v2910_v6 = vld [vmem:[#allocation15 + $0xac] sm:$0xf]  ;;  %v2731_v7 = vld [vmem:[#allocation15 + $0xb8] sm:$0xf0]  ;;  %v2745_v8 = vld [vmem:[#allocation15 + $0xc8] sm:$0xf]  ;;  %v2722_v9 = vor.u32 %v2911_v3, %v2721_v1  ;;  %v2726_v13 = vor.u32 %v2909_v4, %v2723_v5 }
 0x2dd   : >> { %1813 = vmatpush.bf16.msra.mxu0 %v2738_v57  ;;  %1840 = vmatpush.bf16.msra.mxu2 %v2762_v2  ;;  %v2916_v10 = vld [vmem:[#allocation15 + $0xd4] sm:$0xf0]  ;;  %v2705_v11 = vld [vmem:[#allocation15 + $0x80] sm:$0xf]  ;;  %v2907_v12 = vld [vmem:[#allocation15 + $0x8c] sm:$0xf0]  ;;  %v2734_v14 = vor.u32 %v2910_v6, %v2731_v7 }
 0x2de   : >> { %1827 = vmatpush.bf16.msra.mxu1 %v2742_v61  ;;  %1855 = vmatpush.bf16.msra.mxu3 %v2750_v62  ;;  %v2746_v15 = vor.u32 %v2916_v10, %v2745_v8  ;;  %v2905_v16 = vld [vmem:[#allocation15 + $0x84] sm:$0xf]  ;;  %v2707_v17 = vld [vmem:[#allocation15 + $0x90] sm:$0xf0]  ;;  %v2906_v18 = vld [vmem:[#allocation15 + $0x8c] sm:$0xf]  ;;  %v2706_v22 = vor.u32 %v2907_v12, %v2705_v11 }
 0x2df   : >> { %v2715_v19 = vld [vmem:[#allocation15 + $0x98] sm:$0xf0]  ;;  %v2729_v20 = vld [vmem:[#allocation15 + $0xa8] sm:$0xf]  ;;  %v2912_v21 = vld [vmem:[#allocation15 + $0xb4] sm:$0xf0]  ;;  %v2710_v26 = vor.u32 %v2905_v16, %v2707_v17 }
 0x2e0   : >> { %v2730_v23 = vor.u32 %v2912_v21, %v2729_v20  ;;  %v2689_v24 = vld [vmem:[#allocation15 + $0x60] sm:$0xf]  ;;  %v2903_v25 = vld [vmem:[#allocation15 + $0x6c] sm:$0xf0]  ;;  %v2718_v27 = vor.u32 %v2906_v18, %v2715_v19  ;;  %v2901_v28 = vld [vmem:[#allocation15 + $0x64] sm:$0xf] }
 0x2e1   : >> { %1814 = vmatpush.bf16.msra.mxu0 %v2722_v9  ;;  %1841 = vmatpush.bf16.msra.mxu2 %v2746_v15  ;;  %v2713_v29 = vld [vmem:[#allocation15 + $0x88] sm:$0xf]  ;;  %v2908_v30 = vld [vmem:[#allocation15 + $0x94] sm:$0xf0]  ;;  %v2691_v31 = vld [vmem:[#allocation15 + $0x70] sm:$0xf0]  ;;  %v2690_v34 = vor.u32 %v2903_v25, %v2689_v24 }
 0x2e2   : >> { %1828 = vmatpush.bf16.msra.mxu1 %v2726_v13  ;;  %1856 = vmatpush.bf16.msra.mxu3 %v2734_v14  ;;  %v2902_v32 = vld [vmem:[#allocation15 + $0x6c] sm:$0xf]  ;;  %v2699_v33 = vld [vmem:[#allocation15 + $0x78] sm:$0xf0]  ;;  %v2714_v35 = vor.u32 %v2908_v30, %v2713_v29  ;;  %v2673_v36 = vld [vmem:[#allocation15 + $0x40] sm:$0xf]  ;;  %v2694_v40 = vor.u32 %v2901_v28, %v2691_v31 }
 0x2e3   : >> { %v2899_v37 = vld [vmem:[#allocation15 + $0x4c] sm:$0xf0]  ;;  %v2702_v41 = vor.u32 %v2902_v32, %v2699_v33  ;;  %v2897_v42 = vld [vmem:[#allocation15 + $0x44] sm:$0xf]  ;;  %v2697_v39 = vld [vmem:[#allocation15 + $0x68] sm:$0xf] }
 0x2e4   : >> { %v2904_v46 = vld [vmem:[#allocation15 + $0x74] sm:$0xf0]  ;;  %v2675_v47 = vld [vmem:[#allocation15 + $0x50] sm:$0xf0]  ;;  %v2898_v49 = vld [vmem:[#allocation15 + $0x4c] sm:$0xf]  ;;  %v2674_v38 = vor.u32 %v2899_v37, %v2673_v36 }
 0x2e5   : >> { %1815 = vmatpush.bf16.msra.mxu0 %v2706_v22  ;;  %1842 = vmatpush.bf16.msra.mxu2 %v2730_v23  ;;  %v2683_v43 = vld [vmem:[#allocation15 + $0x58] sm:$0xf0]  ;;  %v2698_v44 = vor.u32 %v2904_v46, %v2697_v39  ;;  %v2657_v51 = vld [vmem:[#allocation15 + $0x20] sm:$0xf]  ;;  %v2895_v52 = vld [vmem:[#allocation15 + $0x2c] sm:$0xf0]  ;;  %v2678_v45 = vor.u32 %v2897_v42, %v2675_v47 }
 0x2e6   : >> { %1829 = vmatpush.bf16.msra.mxu1 %v2710_v26  ;;  %1857 = vmatpush.bf16.msra.mxu3 %v2718_v27  ;;  %v2686_v53 = vor.u32 %v2898_v49, %v2683_v43  ;;  %v2893_v50 = vld [vmem:[#allocation15 + $0x24] sm:$0xf]  ;;  %v2681_v54 = vld [vmem:[#allocation15 + $0x48] sm:$0xf]  ;;  %v2900_v55 = vld [vmem:[#allocation15 + $0x54] sm:$0xf0]  ;;  %v2658_v58 = vor.u32 %v2895_v52, %v2657_v51 }
 0x2e7   : >> { %v2659_v48 = vld [vmem:[#allocation15 + $0x30] sm:$0xf0]  ;;  %v2894_v56 = vld [vmem:[#allocation15 + $0x2c] sm:$0xf]  ;;  %v2667_v57 = vld [vmem:[#allocation15 + $0x38] sm:$0xf0]  ;;  %v2682_v59 = vor.u32 %v2900_v55, %v2681_v54 }
 0x2e8   : >> { %v2641_v60 = vld [vmem:[#allocation15] sm:$0xf]  ;;  %v2891_v61 = vld [vmem:[#allocation15 + $0xc] sm:$0xf0]  ;;  %v2662_v62 = vor.u32 %v2893_v50, %v2659_v48  ;;  %v2670_v63 = vor.u32 %v2894_v56, %v2667_v57  ;;  %v2889_v0 = vld [vmem:[#allocation15 + $0x4] sm:$0xf] }
 0x2e9   : >> { %1816 = vmatpush.bf16.msra.mxu0 %v2690_v34  ;;  %1843 = vmatpush.bf16.msra.mxu2 %v2714_v35  ;;  %v2665_v1 = vld [vmem:[#allocation15 + $0x28] sm:$0xf]  ;;  %v2896_v2 = vld [vmem:[#allocation15 + $0x34] sm:$0xf0]  ;;  %v2643_v3 = vld [vmem:[#allocation15 + $0x10] sm:$0xf0]  ;;  %v2642_v6 = vor.u32 %v2891_v61, %v2641_v60 }
 0x2ea   : >> { %1830 = vmatpush.bf16.msra.mxu1 %v2694_v40  ;;  %1858 = vmatpush.bf16.msra.mxu3 %v2702_v41  ;;  %v2890_v4 = vld [vmem:[#allocation15 + $0xc] sm:$0xf]  ;;  %v2651_v5 = vld [vmem:[#allocation15 + $0x18] sm:$0xf0]  ;;  %v1617_v7 = vld [vmem:[#allocation2 + $0x18] sm:$0xff]  ;;  %v2666_v9 = vor.u32 %v2896_v2, %v2665_v1  ;;  %v2646_v10 = vor.u32 %v2889_v0, %v2643_v3  ;;  %s2636_s10 = sshll.u32 %s3424_s19, 4 }
 0x2eb   : >> { %v1618_v8 = vld [vmem:[#allocation2 + $0x8] sm:$0xff]  ;;  %v2654_v11 = vor.u32 %v2890_v4, %v2651_v5  ;;  %v2892_v13 = vld [vmem:[#allocation15 + $0x14] sm:$0xf0]  ;;  %s1603_s16 = sshra.s32 %s2636_s10, 3  ;;  %s2921_s30 = sshll.u32 %s3424_s19, 3 }
 0x2ec   : >> { %v2649_v12 = vld [vmem:[#allocation15 + $0x8] sm:$0xf]  ;;  %v1619_v14 = vpack.c.bf16 %v1618_v8, %v1617_v7  ;;  %s2888_s22 = sshll.u32 %s1603_s16, 5  ;;  %s2013_s2 = scalar_lea.vmem %s3622_s1, %s2921_s30 [#allocation17] }
 0x2ed   : >> { %1817 = vmatpush.bf16.msra.mxu0 %v2674_v38  ;;  %1844 = vmatpush.bf16.msra.mxu2 %v2698_v44  ;;  %v2650_v15 = vor.u32 %v2892_v13, %v2649_v12  ;;  %s3795_s23 = scalar_lea.vmem [#allocation5], %s2888_s22  ;;  %s1601_s19 = sadd.s32 1, %s3424_s19  }
 0x2ee   : >> { %1831 = vmatpush.bf16.msra.mxu1 %v2678_v45  ;;  %1859 = vmatpush.bf16.msra.mxu3 %v2686_v53  ;;  %v1608_v16 = vld [vmem:[%s3795_s23] sm:$0xff]  ;;  %v1609_v17 = vld [vmem:[%s3795_s23 + $0x8] sm:$0xff]  ;;  %v1611_v24 = vld [vmem:[%s3795_s23 + $0x18] sm:$0xff]  ;;  %p1598_p7 = scmp.ge.s32.totalorder %s1601_s19, 4  }
 0x2ef   : >> { %v1612_v25 = vld [vmem:[%s3795_s23 + $0x20] sm:$0xff]  ;;  %v1613_v27 = vld [vmem:[%s3795_s23 + $0x28] sm:$0xff]  ;;  %v1610_v41 = vld [vmem:[%s3795_s23 + $0x10] sm:$0xff]  ;;  %s2923_s3 = sshll.u32 (%p1598_p7), %s3408_s27, 5  ;;  %s2032_s15 = sshll.u32 (%p1598_p7), %s3622_s1, 4  ;;  %s2033_s15 = int_to_ptr.vmem [resolvable:$true] %s2032_s15 }
 0x2f0   : >> { %v1615_v39 = vld [vmem:[%s3795_s23 + $0x38] sm:$0xff]  ;;  %v1614_v3 = vld [vmem:[%s3795_s23 + $0x30] sm:$0xff]  ;;  %s2031_s17 = scalar_lea.hbm (%p1598_p7), %s3909_s7, %s2923_s3  ;;  %s2017_s9 = scalar_lea.sflag (%p1598_p7), [#allocation8], %s3600_s4 }
 0x2f1   : >> { %1818 = vmatpush.bf16.msra.mxu0 %v2658_v58  ;;  %1845 = vmatpush.bf16.msra.mxu2 %v2682_v59  ;;  %s2034_s21 = sshll.u32 (%p1598_p7), %s2031_s17, 4  ;;  %s3334_s27 = scalar_lea.hbm (%p1598_p7), %s3909_s7, 96  ;;  %s2035_s21 = int_to_ptr.hbm [resolvable:$true] %s2034_s21 }
 0x2f2   : >> { %1832 = vmatpush.bf16.msra.mxu1 %v2662_v62  ;;  %1860 = vmatpush.bf16.msra.mxu3 %v2670_v63  ;;  %s3328_s20 = sshra.s32 (%p1598_p7), %s2035_s21, 4  ;;  %s3329_s20 = int_to_ptr.hbm [resolvable:$true] %s3328_s20 }
 0x2f3   : > { %s3330_s10 = scalar_lea.hbm (%p1598_p7), %s3329_s20, 32  ;;  %p3335_p11 = scmp.lt.s32.totalorder (%p1598_p7), %s3329_s20, %s3909_s7 }
 0x2f4   : > { %p3331_p8 = scmp.ne.s32.totalorder (%p1598_p7), %s3329_s20, %s3330_s10  ;;  %p3336_p12 = scmp.lt.s32.totalorder (%p1598_p7), %s3334_s27, %s3330_s10 }
 0x2f5   : >> { %1819 = vmatpush.bf16.msra.mxu0 %v2642_v6  ;;  %1846 = vmatpush.bf16.msra.mxu2 %v2666_v9 }
 0x2f6   : >> { %1833 = vmatpush.bf16.msra.mxu1 %v2646_v10  ;;  %1861 = vmatpush.bf16.msra.mxu3 %v2654_v11  ;;  %p3332_p9 = pnand (%p1598_p7), %p3331_p8, %p3578_p2  ;;  %p3337_p13 = por (%p1598_p7), %p3336_p12, %p3335_p11 }
 0x2f8   : >> { %1820 = vmatmul.bf16.vlgmr.msra.gmra.mxu0 %v1619_v14  ;;  %p3333_p10 = pneg (%p1598_p7), %p3332_p9 }
 0x2f9   : >> { %1834 = vmatmul.bf16.vlgmr.msra.gmra.mxu1 %v1619_v14  ;;  %1862 = vmatmul.bf16.vlgmr.msra.gmra.mxu3 %v1619_v14 }
 0x2fa   : >> { %1847 = vmatpush.bf16.msra.mxu2 %v2650_v15  ;;  %p3338_p0 = pnand (%p1598_p7), %p3337_p13, %p3333_p10 }
 0x2fd   : >> { %1848 = vmatmul.bf16.vlgmr.msra.gmra.mxu2 %v1619_v14 }
 0x375   : >> { %v1821_v18 = vpop.f32.mrf.mxu0 }
 0x376   : >> { %v1868_v19 = vadd.f32 %v1821_v18, %v1608_v16  ;;  %v1835_v20 = vpop.f32.mrf.mxu1  ;;  %v1993_v16 = vld [vmem:[#allocation3 + $0x8] sm:$0xff] }
 0x377   : >> { %v1869_v21 = vadd.f32 %v1835_v20, %v1609_v17 }
 0x378   : >> { %v2767_v22 = vmul.f32 -1.442695, %v1868_v19 }
 0x379   : >> { %v2769_v23 = vmul.f32 -1.442695, %v1869_v21 }
 0x37a   : >> { %3102 = vpow2.f32 %v2767_v22 }
 0x37b   : >> { %3104 = vpow2.f32 %v2769_v23 }
 0x37c   : >> { %v1863_v26 = vpop.f32.mrf.mxu3 }
 0x37d   : >> { %v1871_v28 = vadd.f32 %v1863_v26, %v1611_v24  ;;  %v1823_v29 = vpop.f32.mrf.mxu0 }
 0x37e   : >> { %v1872_v30 = vadd.f32 %v1823_v29, %v1612_v25  ;;  %v1837_v31 = vpop.f32.mrf.mxu1 }
 0x37f   : >> { %v2771_v32 = vmul.f32 -1.442695, %v1871_v28  ;;  %v1873_v33 = vadd.f32 %v1837_v31, %v1613_v27 }
 0x380   : >> { %v3103_v34 = vpop.eup %3102  ;;  %v2768_v35 = vmul.f32 -1.442695, %v1872_v30  ;;  %v1849_v46 = vpop.f32.mrf.mxu2 }
 0x381   : >> { %v3105_v36 = vpop.eup %3104  ;;  %v1882_v37 = vadd.f32 1.0, %v3103_v34  ;;  %3106 = vpow2.f32 %v2771_v32  ;;  %v2770_v40 = vmul.f32 -1.442695, %v1873_v33  ;;  %v1870_v47 = vadd.f32 %v1849_v46, %v1610_v41 }
 0x382   : >> { %v1920_v42 = vadd.f32 1.0, %v3105_v36  ;;  %3108 = vpow2.f32 %v2768_v35 }
 0x383   : >> { %3110 = vrcp.f32 %v1882_v37  ;;  %v1893_v58 = vand.u32 2147483647, %v1882_v37  ;;  %v1895_v59 = vand.u32 2147483648, %v1882_v37  ;;  %vm1889_vm11 = vweird.f32 %v1882_v37 }
 0x384   : >> { %3112 = vrcp.f32 %v1920_v42  ;;  %v1865_v49 = vpop.f32.mrf.mxu3  ;;  %v1933_v61 = vand.u32 2147483648, %v1920_v42  ;;  %v1931_v62 = vand.u32 2147483647, %v1920_v42  ;;  %vm1927_vm9 = vweird.f32 %v1920_v42 }
 0x385   : >> { %3114 = vpow2.f32 %v2770_v40  ;;  %v1875_v43 = vadd.f32 %v1865_v49, %v1615_v39  ;;  %vm3816_vm12 = vcmp.eq.f32.partialorder %v1893_v58, 8.507059e+37  ;;  %v1896_v8 = vor.u32 1.1754944e-38, %v1895_v59 }
 0x386   : >> { %3116 = vtanh.f32 %v1870_v47  ;;  %v1934_v11 = vor.u32 1.1754944e-38, %v1933_v61  ;;  %vm1932_vm14 = vcmp.eq.f32.partialorder %v1931_v62, 8.507059e+37 }
 0x387   : >> { %v3107_v38 = vpop.eup %3106  ;;  %v2772_v44 = vmul.f32 -1.442695, %v1875_v43 }
 0x388   : >> { %v3109_v51 = vpop.eup %3108  ;;  %v3804_v52 = vadd.f32 1.0, %v3107_v38  ;;  %v1851_v4 = vpop.f32.mrf.mxu2 }
 0x389   : >> { %v3111_v45 = vpop.eup %3110  ;;  %v3806_v53 = vadd.f32 1.0, %v3109_v51  ;;  %3118 = vpow2.f32 %v2772_v44  ;;  %v1874_v17 = vadd.f32 %v1851_v4, %v1614_v3 }
 0x38a   : >> { %v3113_v50 = vpop.eup %3112  ;;  %v1885_v54 = vmul.f32 %v3111_v45, %v1882_v37  ;;  %3120 = vrcp.f32 %v3804_v52  ;;  %vm1890_vm8 = vweird.f32 %v3111_v45  ;;  %v1973_v19 = vand.u32 2147483648, %v3804_v52 }
 0x38b   : >> { %v3115_v55 = vpop.eup %3114  ;;  %v1923_v48 = vmul.f32 %v3113_v50, %v1920_v42  ;;  %3122 = vrcp.f32 %v3806_v53  ;;  %vm1928_vm10 = vweird.f32 %v3113_v50  ;;  %vm1891_vm13 = vmor %vm1889_vm11, %vm1890_vm8  ;;  %v1910_v26 = vand.u32 2147483648, %v3806_v53 }
 0x38c   : >> { %v1886_v56 = vsub.f32 1.0, %v1885_v54  ;;  %v3810_v57 = vadd.f32 1.0, %v3115_v55  ;;  %v3117_v63 = vpop.eup %3116  ;;  %vm1929_vm15 = vmor %vm1927_vm9, %vm1928_vm10  ;;  %vm1904_vm0 = vweird.f32 %v3806_v53  ;;  %v1908_v31 = vand.u32 2147483647, %v3806_v53 }
 0x38d   : >> { %v1924_v60 = vsub.f32 1.0, %v1923_v48  ;;  %v1911_v41 = vor.u32 1.1754944e-38, %v1910_v26  ;;  %vm1967_vm5 = vweird.f32 %v3804_v52  ;;  %v1971_v46 = vand.u32 2147483647, %v3804_v52 }
 0x38e   : >> { %3124 = vrcp.f32 %v3810_v57  ;;  %v1887_v0 = vmul.f32 %v3111_v45, %v1886_v56  ;;  %v1948_v33 = vand.u32 2147483648, %v3810_v57  ;;  %v1946_v35 = vand.u32 2147483647, %v3810_v57 }
 0x38f   : >> { %v3119_v1 = vpop.eup %3118  ;;  %v1925_v2 = vmul.f32 %v3113_v50, %v1924_v60  ;;  %vm1909_vm6 = vcmp.eq.f32.partialorder %v1908_v31, 8.507059e+37  ;;  %vm1942_vm8 = vweird.f32 %v3810_v57  ;;  %vm1972_vm11 = vcmp.eq.f32.partialorder %v1971_v46, 8.507059e+37 }
 0x390   : >> { %v3814_v5 = vpop.eup %3120  ;;  %v1888_v6 = vadd.f32 %v3111_v45, %v1887_v0  ;;  %v3820_v9 = vadd.f32 1.0, %v3119_v1  ;;  %vm1947_vm10 = vcmp.eq.f32.partialorder %v1946_v35, 8.507059e+37 }
 0x391   : >> { %v3123_v10 = vpop.eup %3122  ;;  %v1963_v12 = vmul.f32 %v3814_v5, %v3804_v52  ;;  %v1926_v13 = vadd.f32 %v3113_v50, %v1925_v2  ;;  %vm1968_vm2 = vweird.f32 %v3814_v5  ;;  %v1994_v52 = vld [vmem:[#allocation3 + $0x10] sm:$0xff] }
 0x392   : >> { %v1900_v14 = vmul.f32 %v3123_v10, %v3806_v53  ;;  %v1892_v15 = vsel %vm1891_vm13, %v3111_v45, %v1888_v6  ;;  %3126 = vrcp.f32 %v3820_v9  ;;  %vm1905_vm1 = vweird.f32 %v3123_v10  ;;  %vm3847_vm7 = vmor %vm1967_vm5, %vm1968_vm2 }
 0x393   : >> { %v1964_v18 = vsub.f32 1.0, %v1963_v12  ;;  %v1897_v20 = vsel %vm3816_vm12, %v1896_v8, %v1892_v15  ;;  %v1930_v21 = vsel %vm1929_vm15, %v3113_v50, %v1926_v13  ;;  %3128 = vtanh.f32 %v1874_v17  ;;  %vm1906_vm4 = vmor %vm1904_vm0, %vm1905_vm1 }
 0x394   : >> { %v3125_v22 = vpop.eup %3124  ;;  %v1901_v23 = vsub.f32 1.0, %v1900_v14  ;;  %v1935_v24 = vsel %vm1932_vm14, %v1934_v11, %v1930_v21  ;;  %v1997_v25 = vmul.f32 %v3117_v63, %v1897_v20  ;;  %v1949_v53 = vor.u32 1.1754944e-38, %v1948_v33 }
 0x395   : >> { %v1965_v27 = vmul.f32 %v3814_v5, %v1964_v18  ;;  %v1938_v28 = vmul.f32 %v3125_v22, %v3810_v57  ;;  %v1995_v29 = vmul.f32 %v1993_v16, %v1935_v24  ;;  %vm1943_vm3 = vweird.f32 %v3125_v22 }
 0x396   : >> { %v1902_v30 = vmul.f32 %v3123_v10, %v1901_v23  ;;  %vm1944_vm9 = vmor %vm1942_vm8, %vm1943_vm3  ;;  %v1974_v50 = vor.u32 1.1754944e-38, %v1973_v19  ;;  %v1988_v63 = vand.u32 2147483648, %v3820_v9  ;;  %vm1982_vm13 = vweird.f32 %v3820_v9 }
 0x397   : >> { %v1939_v32 = vsub.f32 1.0, %v1938_v28  ;;  %v1999_v34 = vadd.f32 %v1997_v25, %v1995_v29  ;;  %v1966_v37 = vadd.f32 %v3814_v5, %v1965_v27  ;;  %v1986_v0 = vand.u32 2147483647, %v3820_v9 }
 0x398   : >> { %v3127_v36 = vpop.eup %3126  ;;  %v1903_v40 = vadd.f32 %v3123_v10, %v1902_v30  ;;  %v1989_v2 = vor.u32 1.1754944e-38, %v1988_v63 }
 0x399   : >> { %v1940_v42 = vmul.f32 %v3125_v22, %v1939_v32  ;;  %3130 = vtanh.f32 %v1999_v34  ;;  %2007 = vst [vmem:[#allocation3 + $0x8] sm:$0xff] %v1999_v34  ;;  %v1978_v39 = vmul.f32 %v3127_v36, %v3820_v9  ;;  %v3129_v51 = vpop.eup %3128  ;;  %v1970_v45 = vsel %vm3847_vm7, %v3814_v5, %v1966_v37 }
 0x39a   : >> { %v1907_v47 = vsel %vm1906_vm4, %v3123_v10, %v1903_v40  ;;  %v1975_v58 = vsel %vm1972_vm11, %v1974_v50, %v1970_v45  ;;  %vm1983_vm12 = vweird.f32 %v3127_v36  ;;  %vm1987_vm15 = vcmp.eq.f32.partialorder %v1986_v0, 8.507059e+37 }
 0x39b   : >> { %v1979_v43 = vsub.f32 1.0, %v1978_v39  ;;  %v1912_v38 = vsel %vm1909_vm6, %v1911_v41, %v1907_v47  ;;  %v1941_v44 = vadd.f32 %v3125_v22, %v1940_v42  ;;  %vm1984_vm14 = vmor %vm1982_vm13, %vm1983_vm12 }
 0x39c   : >> { %v1998_v55 = vmul.f32 %v3129_v51, %v1912_v38 }
 0x39d   : >> { %v1945_v54 = vsel %vm1944_vm9, %v3125_v22, %v1941_v44  ;;  %v1980_v48 = vmul.f32 %v3127_v36, %v1979_v43 }
 0x39e   : >> { %v1950_v56 = vsel %vm1947_vm10, %v1949_v53, %v1945_v54 }
 0x39f   : >> { %v3131_v57 = vpop.eup %3130  ;;  %v1996_v59 = vmul.f32 %v1994_v52, %v1950_v56  ;;  %v1981_v62 = vadd.f32 %v3127_v36, %v1980_v48 }
 0x3a0   : >> { %v2003_v60 = vmul.f32 %v3131_v57, %v1975_v58 }
 0x3a1   : >> { %v2000_v61 = vadd.f32 %v1998_v55, %v1996_v59  ;;  %v1985_v1 = vsel %vm1984_vm14, %v3127_v36, %v1981_v62 }
 0x3a2   : >> { %2005 = vst [vmem:[#allocation2 + $0x18] sm:$0xff] %v2003_v60  ;;  %v1990_v4 = vsel %vm1987_vm15, %v1989_v2, %v1985_v1 }
 0x3a3   : >> { %3132 = vtanh.f32 %v2000_v61  ;;  %2008 = vst [vmem:[#allocation3 + $0x10] sm:$0xff] %v2000_v61 }
 0x3a9   : >> { %v3133_v3 = vpop.eup %3132 }
 0x3aa   : >> { %v2004_v5 = vmul.f32 %v3133_v3, %v1990_v4  ;;  %1600 = sbr.rel (!%p1598_p7) target bundleno = 726 (0x2d6), region = 148 }
 0x3ac   : >> { %2006 = vst [vmem:[#allocation2 + $0x8] sm:$0xff] %v2004_v5  ;;  %v2932_v6 = vpack.c.bf16 %v2004_v5, %v2003_v60 }
 0x3ae   : >> { %2933 = vst [vmem:[%s2013_s2] sm:$0xff] %v2932_v6  }
 0x3af   : > { %3341 = shalt.err (!%p3338_p0)
}
 0x3b0   : > { %s3436_s4 = smov 64   ;;  %s3437_s1 = smov 4  }
 0x3b1   : > { %2956 = dma.vmem_to_hbm [thread:$0]  (%p3578_p2), %s2033_s15, 512, %s2035_s21, %s2017_s9, %s3436_s4, %s3436_s4, %s3437_s1  }
 0x3b2 PF: > { %p2993_p4 = scmp.ge.s32.totalorder %s3416_s29, 2  ;;  %s2049_s30 = sand.u32 1, %s3396_s24  }
 0x3b3   : > { %s2050_s2 = scalar_lea.sflag [#allocation8], %s2049_s30 }
 0x3b4   : > { %p2979_p6 = pnand %p2993_p4, %p3586_p5 }
 0x3b6   : > { %p2980_p3 = pneg %p2979_p6 }
 0x3b8   : > { %3391 = dma.done.wait (%p2980_p3), %s2050_s2, 512  }
 0x3b9   : > { %3393 = vsyncadd (%p2980_p3), %s2050_s2, 4294966784  ;;  %s26_s29 = sadd.s32 1, %s3416_s29   ;;  %s3935_s24 = smov %s3400_s25 }
 0x3ba   : > { %p23_p1 = scmp.ge.s32.totalorder %s26_s29, 5   ;;  %s3936_s25 = smov %s3404_s26 }
 0x3bb   : > { %s3937_s26 = smov %s3584_s14  ;;  %s3938_s27 = smov %s3412_s28 }
 0x3bc   : > { %s3939_s28 = smov %s3941_s13  ;;  %25 = sbr.rel (!%p23_p1) target bundleno = 14 (0xe), region = 159 }
 0x3c1   :  { %2056 = vsyncpa [#allocation7], 1 }
 0x3c2   :  { %2058 = vsyncpa [#allocation7 + $0x1], 1 }
 0x3c3   :  { %2059 = vsyncpa [#allocation10], 1 }
 0x3c4   :  { %2060 = vsyncpa [#allocation13], 1 }
 0x3c5   :  { %2061 = vsyncpa [#allocation16], 1 }
 0x3c6   :  { %2062 = vsyncpa [#allocation8], 1 }
 0x3c7   :  { %2064 = vsyncpa [#allocation8 + $0x1], 1 }

// kernel: tpu_custom_call.1
= control target key start
LH: loop header
LB: loop body
LE: loop exit
PB: predicated region body
PF: predicated region fallthrough
CT: control target
= control target key end

     0   :  { %s3902_s0 = inlined_call_operand.hbm [shape: bf16[12,16,128], index: 0, kind: input, shape index: {}]   ;;  %s3903_s1 = inlined_call_operand.hbm [shape: bf16[128,512], index: 1, kind: input, shape index: {}]   ;;  %s3904_s2 = inlined_call_operand.hbm [shape: bf16[128,512], index: 2, kind: input, shape index: {}]   ;;  %s3905_s3 = inlined_call_operand.hbm [shape: f32[1,512], index: 3, kind: input, shape index: {}]   ;;  %s3906_s4 = inlined_call_operand.hbm [shape: bf16[128,512], index: 4, kind: input, shape index: {}]   ;;  %s3907_s5 = inlined_call_operand.hbm [shape: bf16[128,512], index: 5, kind: input, shape index: {}]   ;;  %s3908_s6 = inlined_call_operand.vmem [shape: f32[1,512], index: 6, kind: input, shape index: {}]   ;;  %s3909_s7 = inlined_call_operand.hbm [shape: bf16[12,16,128], index: 7, kind: output, shape index: {}]  }
   0x1   :  { %3911 = sst [smem:[#allocation23_spill]] %s3903_s1 }
   0x2   :  { %3912 = sst [smem:[#allocation24_spill]] %s3904_s2 }
   0x3   :  { %3913 = sst [smem:[#allocation25_spill]] %s3905_s3 }
   0x4   :  { %3914 = sst [smem:[#allocation26_spill]] %s3906_s4 }
   0x5   :  { %12 = vsyncpa [#allocation7], 0 }
   0x6   :  { %14 = vsyncpa [#allocation7 + $0x1], 0 }
   0x7   :  { %15 = vsyncpa [#allocation10], 0 }
   0x8   :  { %16 = vsyncpa [#allocation13], 0 }
   0x9   :  { %17 = vsyncpa [#allocation16], 0 }
   0xa   :  { %18 = vsyncpa [#allocation8], 0 }
   0xb   :  { %20 = vsyncpa [#allocation8 + $0x1], 0  ;;  %s3478_s24 = smov 0   ;;  %s3480_s25 = smov 0  }
   0xc   :  { %s3482_s26 = smov 0   ;;  %s3484_s27 = smov 0  }
   0xd   :  { %s3486_s28 = smov 0   ;;  %s3488_s29 = smov 0  }
   0xe LB: > { %s3910_s30 = sadd.s32 4294967295, %s3416_s29   ;;  %p2190_p0 = scmp.ge.s32.totalorder %s3416_s29, 1  ;;  %s3416_s29 = sphi %s3488_s29, %s26_s29   ;;  %s3412_s28 = sphi %s3486_s28, %s3939_s28   ;;  %s3408_s27 = sphi %s3484_s27, %s3938_s27   ;;  %s3404_s26 = sphi %s3482_s26, %s3937_s26   ;;  %s3400_s25 = sphi %s3480_s25, %s3936_s25   ;;  %s3396_s24 = sphi %s3478_s24, %s3935_s24  }
   0xf   : > { %p3512_p1 = scmp.eq.s32.totalorder %s3910_s30, 0  ;;  %p225_p2 = scmp.lt.s32.totalorder %s3416_s29, 4 }
  0x10   : > { %s3916_s1 = sld [smem:[#allocation23_spill]]  ;;  %s3426_s13 = smov [#allocation9]  }
  0x11   : > { %p3520_p3 = pnand %p2190_p0, %p225_p2  ;;  %s238_s14 = sshll.u32 %s3426_s13, 4  ;;  %s239_s14 = int_to_ptr.vmem [resolvable:$true] %s238_s14 }
  0x12   : > { %s3919_s3 = sld [smem:[#allocation25_spill]]  ;;  %s3427_s19 = smov 256  }
  0x13   : > { %p2958_p4 = pneg %p3520_p3  ;;  %s3428_s20 = smov 16  }
  0x14   : > { %s3429_s21 = smov [#allocation12]   ;;  %s3920_s2 = sld [smem:[#allocation24_spill]] }
  0x15   : > { %p3528_p5 = pnand %p2958_p4, %p3512_p1  ;;  %s267_s22 = sshll.u32 %s3429_s21, 4  ;;  %s268_s22 = int_to_ptr.vmem [resolvable:$true] %s267_s22 }
  0x16   : > { %s236_s11 = sshll.u32 %s3916_s1, 4  ;;  %s3921_s4 = sld [smem:[#allocation26_spill]]  ;;  %s237_s11 = int_to_ptr.hbm [resolvable:$true] %s236_s11 }
  0x17   : > { %2961 = dma.hbm_to_vmem [thread:$0]  (!%p3528_p5), %s237_s11, 4096, %s239_s14, [#allocation10], %s3427_s19, %s3427_s19, %s3428_s20  }
  0x18   : > { %s265_s18 = sshll.u32 %s3919_s3, 4  ;;  %s3430_s30 = smov [#allocation11]   ;;  %s266_s18 = int_to_ptr.hbm [resolvable:$true] %s265_s18 }
  0x19   : > { %2967 = dma.hbm_to_vmem [thread:$0]  (!%p3528_p5), %s266_s18, 64, %s268_s22, [#allocation13]  }
  0x1a   : > { %s250_s10 = sshll.u32 %s3920_s2, 4  ;;  %s252_s11 = sshll.u32 %s3430_s30, 4  ;;  %s251_s10 = int_to_ptr.hbm [resolvable:$true] %s250_s10  ;;  %s253_s11 = int_to_ptr.vmem [resolvable:$true] %s252_s11 }
  0x1b   : > { %2964 = dma.hbm_to_vmem [thread:$0]  (!%p3528_p5), %s251_s10, 4096, %s253_s11, [#allocation10], %s3427_s19, %s3427_s19, %s3428_s20  }
  0x1c   : > { %s276_s17 = sshll.u32 %s3921_s4, 4  ;;  %s3431_s14 = smov [#allocation14]   ;;  %s277_s17 = int_to_ptr.hbm [resolvable:$true] %s276_s17 }
  0x1d   : > { %s278_s18 = sshll.u32 %s3431_s14, 4  ;;  %s290_s23 = sshll.u32 %s3907_s5, 4  ;;  %s279_s18 = int_to_ptr.vmem [resolvable:$true] %s278_s18  ;;  %s291_s23 = int_to_ptr.hbm [resolvable:$true] %s290_s23 }
  0x1e   : > { %2970 = dma.hbm_to_vmem [thread:$0]  (!%p3528_p5), %s277_s17, 4096, %s279_s18, [#allocation13], %s3427_s19, %s3427_s19, %s3428_s20  }
  0x1f   : > { %s3432_s30 = smov [#allocation15]   ;;  %s2189_s10 = sadd.s32 4294967294, %s3416_s29  }
  0x20   : > { %s292_s9 = sshll.u32 %s3432_s30, 4  ;;  %s35_s13 = sadd.s32 1, %s3412_s28  ;;  %s293_s9 = int_to_ptr.vmem [resolvable:$true] %s292_s9 }
  0x21   : > { %2973 = dma.hbm_to_vmem [thread:$0]  (!%p3528_p5), %s291_s23, 4096, %s293_s9, [#allocation16], %s3427_s19, %s3427_s19, %s3428_s20  }
  0x22   : > { %s47_s16 = sadd.s32 1, %s3404_s26  ;;  %p36_p6 = scmp.ge.s32.totalorder %s35_s13, 3 }
  0x23   : > { %p54_p7 = scmp.ne.s32.totalorder %s3404_s26, %s3400_s25  ;;  %p55_p8 = scmp.eq.s32.totalorder %s3416_s29, 0 }
  0x24   : > { %p60_p9 = scmp.ne.s32.totalorder %s3400_s25, %s3396_s24  ;;  %s3941_s13 = smov (%p36_p6, %s35_s13), 0 }
  0x25   : > { %p3564_p10 = por %p55_p8, %p54_p7  ;;  %s42_s19 = ssub.s32 %s3412_s28, %s3941_s13 }
  0x26   : > { %p3570_p11 = por %p3512_p1, %p60_p9  ;;  %s3924_s20 = sadd.s32 4294967295, %s3416_s29  }
  0x27   : > { %p212_p12 = scmp.eq.s32.totalorder %s3924_s20, 2  ;;  %p45_p13 = scmp.eq.s32.totalorder %s42_s19, 0 }
  0x28   : > { %p218_p0 = scmp.eq.s32.totalorder %s2189_s10, 2  ;;  %p2987_p4 = scmp.lt.s32.totalorder %s3416_s29, 3 }
  0x29   : > { %p3578_p2 = por %p212_p12, %p54_p7  ;;  %s309_s21 = sand.u32 1, %s3404_s26  }
  0x2a   : > { %s3584_s14 = scalar_select %p45_p13, %s3404_s26, %s47_s16  }
  0x2b   : > { %p3586_p5 = por %p218_p0, %p60_p9  ;;  %s2197_s22 = sshll.u32 %s309_s21, 5 }
  0x2c   : > { %s2782_s23 = sshll.u32 %s3412_s28, 5  ;;  %s313_s19 = scalar_lea.vmem [#allocation6], %s2197_s22 }
  0x2d   : > { %s321_s20 = scalar_lea.hbm %s3902_s0, %s2782_s23  ;;  %s324_s10 = sshll.u32 %s313_s19, 4  ;;  %s325_s10 = int_to_ptr.vmem [resolvable:$true] %s324_s10 }
  0x2e   : > { %s322_s1 = sshll.u32 %s321_s20, 4  ;;  %p2975_p6 = pnand %p2987_p4, %p3564_p10  ;;  %s323_s1 = int_to_ptr.hbm [resolvable:$true] %s322_s1 }
  0x2f   : > { %s310_s16 = scalar_lea.sflag [#allocation7], %s309_s21  ;;  %s3433_s2 = smov 64  }
  0x30   : > { %s3434_s3 = smov 4   ;;  %336 = sbr.rel (%p3520_p3) target bundleno = 946 (0x3b2), region = 48 }
  0x31   : > { %2977 = dma.hbm_to_vmem [thread:$0]  (!%p2975_p6), %s323_s1, 512, %s325_s10, %s310_s16, %s3433_s2, %s3433_s2, %s3434_s3  }
  0x32   : > { %s3600_s4 = sand.u32 (!%p3520_p3), 1, %s3400_s25  }
  0x33   : > { %s2202_s22 = sshll.u32 (!%p3520_p3), %s3600_s4, 5  ;;  %s339_s23 = scalar_lea.sflag (!%p3520_p3), [#allocation7], %s3600_s4 }
  0x34   : > { %s3604_s30 = scalar_lea.vmem (!%p3520_p3), [#allocation6], %s2202_s22 }
  0x35   : > { %3375 = dma.done.wait (%p3570_p11), %s339_s23, 512  }
  0x36   : > { %3377 = vsyncadd (%p3570_p11), %s339_s23, 4294966784 }
  0x37   : > { %3379 = dma.done.wait (%p3512_p1), [#allocation10], 8192  }
  0x38   : > { %3381 = vsyncadd (%p3512_p1), [#allocation10], 4294959104 }
  0x39   : > { %3383 = dma.done.wait (%p3512_p1), [#allocation13], 4160  }
  0x3a   : > { %3385 = vsyncadd (%p3512_p1), [#allocation13], 4294963136 }
  0x3b   : > { %3387 = dma.done.wait (%p3512_p1), [#allocation16], 4096  }
  0x3c   : > { %3389 = vsyncadd (%p3512_p1), [#allocation16], 4294963200  ;;  %s3622_s1 = scalar_lea.vmem [#allocation17], %s2202_s22  ;;  %p2209_p3 = scmp.ne.s32.totalorder %s3408_s27, 0 }
  0x3e   : > { %406 = sbr.rel (%p2209_p3) target bundleno = 76 (0x4c), region = 76 }
  0x43   : > { %v3435_v0 = vmov 0.0  }
  0x44   : > { %407 = vst [vmem:[#allocation2 + $0x10] sm:$0xff] %v3435_v0 }
  0x45   : > { %408 = vst [vmem:[#allocation2] sm:$0xff] %v3435_v0 }
  0x46   : > { %409 = vst [vmem:[#allocation2 + $0x18] sm:$0xff] %v3435_v0 }
  0x47   : > { %410 = vst [vmem:[#allocation2 + $0x8] sm:$0xff] %v3435_v0 }
  0x48   : > { %411 = vst [vmem:[#allocation3] sm:$0xff] %v3435_v0 }
  0x49   : > { %412 = vst [vmem:[#allocation3 + $0x18] sm:$0xff] %v3435_v0 }
  0x4a   : > { %413 = vst [vmem:[#allocation3 + $0x8] sm:$0xff] %v3435_v0 }
  0x4b   : > { %414 = vst [vmem:[#allocation3 + $0x10] sm:$0xff] %v3435_v0 }
  0x4c PF: > { %v2340_v1 = vld [vmem:[#allocation9 + $0xe0] sm:$0xf]  ;;  %v2817_v2 = vld [vmem:[#allocation9 + $0xec] sm:$0xf0]  ;;  %v2815_v3 = vld [vmem:[#allocation9 + $0xe4] sm:$0xf] }
  0x4d   : > { %v2341_v4 = vor.u32 %v2817_v2, %v2340_v1  ;;  %v2342_v5 = vld [vmem:[#allocation9 + $0xf0] sm:$0xf0]  ;;  %v2348_v6 = vld [vmem:[#allocation9 + $0xe8] sm:$0xf]  ;;  %v2818_v7 = vld [vmem:[#allocation9 + $0xf4] sm:$0xf0] }
  0x4e   : > { %v2345_v8 = vor.u32 %v2815_v3, %v2342_v5  ;;  %v2349_v9 = vor.u32 %v2818_v7, %v2348_v6  ;;  %v2816_v10 = vld [vmem:[#allocation9 + $0xec] sm:$0xf]  ;;  %v2350_v11 = vld [vmem:[#allocation9 + $0xf8] sm:$0xf0]  ;;  %v2324_v12 = vld [vmem:[#allocation9 + $0xc0] sm:$0xf] }
  0x4f   : > { %649 = vmatpush.bf16.msra.mxu0 %v2341_v4  ;;  %v2353_v13 = vor.u32 %v2816_v10, %v2350_v11  ;;  %v2813_v14 = vld [vmem:[#allocation9 + $0xcc] sm:$0xf0]  ;;  %v2811_v15 = vld [vmem:[#allocation9 + $0xc4] sm:$0xf]  ;;  %v2326_v16 = vld [vmem:[#allocation9 + $0xd0] sm:$0xf0] }
  0x50   : > { %678 = vmatpush.bf16.msra.mxu1 %v2345_v8  ;;  %707 = vmatpush.bf16.msra.mxu2 %v2349_v9  ;;  %v2325_v17 = vor.u32 %v2813_v14, %v2324_v12  ;;  %v2329_v18 = vor.u32 %v2811_v15, %v2326_v16  ;;  %v2332_v19 = vld [vmem:[#allocation9 + $0xc8] sm:$0xf]  ;;  %v2814_v20 = vld [vmem:[#allocation9 + $0xd4] sm:$0xf0]  ;;  %v2812_v21 = vld [vmem:[#allocation9 + $0xcc] sm:$0xf] }
  0x51   : > { %736 = vmatpush.bf16.msra.mxu3 %v2353_v13  ;;  %v2333_v22 = vor.u32 %v2814_v20, %v2332_v19  ;;  %v2334_v23 = vld [vmem:[#allocation9 + $0xd8] sm:$0xf0]  ;;  %v2308_v24 = vld [vmem:[#allocation9 + $0xa0] sm:$0xf]  ;;  %v2809_v25 = vld [vmem:[#allocation9 + $0xac] sm:$0xf0] }
  0x52   : > { %v2337_v26 = vor.u32 %v2812_v21, %v2334_v23  ;;  %v2807_v27 = vld [vmem:[#allocation9 + $0xa4] sm:$0xf]  ;;  %v2310_v28 = vld [vmem:[#allocation9 + $0xb0] sm:$0xf0]  ;;  %v2316_v29 = vld [vmem:[#allocation9 + $0xa8] sm:$0xf]  ;;  %v2309_v30 = vor.u32 %v2809_v25, %v2308_v24 }
  0x53   : > { %650 = vmatpush.bf16.msra.mxu0 %v2325_v17  ;;  %v2810_v31 = vld [vmem:[#allocation9 + $0xb4] sm:$0xf0]  ;;  %v2808_v32 = vld [vmem:[#allocation9 + $0xac] sm:$0xf]  ;;  %v2318_v33 = vld [vmem:[#allocation9 + $0xb8] sm:$0xf0]  ;;  %v2313_v34 = vor.u32 %v2807_v27, %v2310_v28 }
  0x54   : > { %679 = vmatpush.bf16.msra.mxu1 %v2329_v18  ;;  %708 = vmatpush.bf16.msra.mxu2 %v2333_v22  ;;  %v2317_v35 = vor.u32 %v2810_v31, %v2316_v29  ;;  %v2292_v36 = vld [vmem:[#allocation9 + $0x80] sm:$0xf]  ;;  %v2805_v37 = vld [vmem:[#allocation9 + $0x8c] sm:$0xf0]  ;;  %v2803_v38 = vld [vmem:[#allocation9 + $0x84] sm:$0xf]  ;;  %v2321_v39 = vor.u32 %v2808_v32, %v2318_v33 }
  0x55   : > { %737 = vmatpush.bf16.msra.mxu3 %v2337_v26  ;;  %v2294_v40 = vld [vmem:[#allocation9 + $0x90] sm:$0xf0]  ;;  %v2300_v41 = vld [vmem:[#allocation9 + $0x88] sm:$0xf]  ;;  %v2806_v42 = vld [vmem:[#allocation9 + $0x94] sm:$0xf0]  ;;  %v2293_v45 = vor.u32 %v2805_v37, %v2292_v36 }
  0x56   : > { %v2804_v43 = vld [vmem:[#allocation9 + $0x8c] sm:$0xf]  ;;  %v2302_v44 = vld [vmem:[#allocation9 + $0x98] sm:$0xf0]  ;;  %v2297_v46 = vor.u32 %v2803_v38, %v2294_v40  ;;  %v2301_v47 = vor.u32 %v2806_v42, %v2300_v41  ;;  %v2276_v48 = vld [vmem:[#allocation9 + $0x60] sm:$0xf] }
  0x57   : > { %651 = vmatpush.bf16.msra.mxu0 %v2309_v30  ;;  %v2801_v49 = vld [vmem:[#allocation9 + $0x6c] sm:$0xf0]  ;;  %v2799_v50 = vld [vmem:[#allocation9 + $0x64] sm:$0xf]  ;;  %v2305_v51 = vor.u32 %v2804_v43, %v2302_v44  ;;  %v2278_v52 = vld [vmem:[#allocation9 + $0x70] sm:$0xf0] }
  0x58   : > { %680 = vmatpush.bf16.msra.mxu1 %v2313_v34  ;;  %709 = vmatpush.bf16.msra.mxu2 %v2317_v35  ;;  %v2284_v53 = vld [vmem:[#allocation9 + $0x68] sm:$0xf]  ;;  %v2802_v54 = vld [vmem:[#allocation9 + $0x74] sm:$0xf0]  ;;  %v2800_v55 = vld [vmem:[#allocation9 + $0x6c] sm:$0xf]  ;;  %v2277_v57 = vor.u32 %v2801_v49, %v2276_v48  ;;  %v2281_v58 = vor.u32 %v2799_v50, %v2278_v52 }
  0x59   : > { %738 = vmatpush.bf16.msra.mxu3 %v2321_v39  ;;  %v2286_v56 = vld [vmem:[#allocation9 + $0x78] sm:$0xf0]  ;;  %v2285_v59 = vor.u32 %v2802_v54, %v2284_v53  ;;  %v2260_v60 = vld [vmem:[#allocation9 + $0x40] sm:$0xf]  ;;  %v2797_v61 = vld [vmem:[#allocation9 + $0x4c] sm:$0xf0] }
  0x5a   : > { %v2795_v62 = vld [vmem:[#allocation9 + $0x44] sm:$0xf]  ;;  %v2289_v63 = vor.u32 %v2800_v55, %v2286_v56  ;;  %v2262_v0 = vld [vmem:[#allocation9 + $0x50] sm:$0xf0]  ;;  %v2268_v1 = vld [vmem:[#allocation9 + $0x48] sm:$0xf]  ;;  %v2261_v5 = vor.u32 %v2797_v61, %v2260_v60 }
  0x5b   : > { %652 = vmatpush.bf16.msra.mxu0 %v2293_v45  ;;  %v2798_v2 = vld [vmem:[#allocation9 + $0x54] sm:$0xf0]  ;;  %v2796_v3 = vld [vmem:[#allocation9 + $0x4c] sm:$0xf]  ;;  %v2270_v4 = vld [vmem:[#allocation9 + $0x58] sm:$0xf0]  ;;  %v2265_v6 = vor.u32 %v2795_v62, %v2262_v0 }
  0x5c   : > { %681 = vmatpush.bf16.msra.mxu1 %v2297_v46  ;;  %710 = vmatpush.bf16.msra.mxu2 %v2301_v47  ;;  %v2269_v7 = vor.u32 %v2798_v2, %v2268_v1  ;;  %v2244_v8 = vld [vmem:[#allocation9 + $0x20] sm:$0xf]  ;;  %v2793_v9 = vld [vmem:[#allocation9 + $0x2c] sm:$0xf0]  ;;  %v2791_v10 = vld [vmem:[#allocation9 + $0x24] sm:$0xf]  ;;  %v2273_v11 = vor.u32 %v2796_v3, %v2270_v4 }
  0x5d   : > { %739 = vmatpush.bf16.msra.mxu3 %v2305_v51  ;;  %v2246_v12 = vld [vmem:[#allocation9 + $0x30] sm:$0xf0]  ;;  %v2252_v13 = vld [vmem:[#allocation9 + $0x28] sm:$0xf]  ;;  %v2794_v14 = vld [vmem:[#allocation9 + $0x34] sm:$0xf0]  ;;  %v2245_v17 = vor.u32 %v2793_v9, %v2244_v8 }
  0x5e   : > { %v2792_v15 = vld [vmem:[#allocation9 + $0x2c] sm:$0xf]  ;;  %v2254_v16 = vld [vmem:[#allocation9 + $0x38] sm:$0xf0]  ;;  %v2249_v18 = vor.u32 %v2791_v10, %v2246_v12  ;;  %v2253_v19 = vor.u32 %v2794_v14, %v2252_v13  ;;  %v2228_v20 = vld [vmem:[#allocation9] sm:$0xf] }
  0x5f   : > { %653 = vmatpush.bf16.msra.mxu0 %v2277_v57  ;;  %v2789_v21 = vld [vmem:[#allocation9 + $0xc] sm:$0xf0]  ;;  %v2787_v22 = vld [vmem:[#allocation9 + $0x4] sm:$0xf]  ;;  %v2257_v23 = vor.u32 %v2792_v15, %v2254_v16  ;;  %v2230_v24 = vld [vmem:[#allocation9 + $0x10] sm:$0xf0] }
  0x60   : > { %682 = vmatpush.bf16.msra.mxu1 %v2281_v58  ;;  %711 = vmatpush.bf16.msra.mxu2 %v2285_v59  ;;  %v2236_v25 = vld [vmem:[#allocation9 + $0x8] sm:$0xf]  ;;  %v2790_v26 = vld [vmem:[#allocation9 + $0x14] sm:$0xf0]  ;;  %v2788_v27 = vld [vmem:[#allocation9 + $0xc] sm:$0xf]  ;;  %v2229_v29 = vor.u32 %v2789_v21, %v2228_v20  ;;  %v2233_v30 = vor.u32 %v2787_v22, %v2230_v24 }
  0x61   : > { %740 = vmatpush.bf16.msra.mxu3 %v2289_v63  ;;  %v2238_v28 = vld [vmem:[#allocation9 + $0x18] sm:$0xf0]  ;;  %v2237_v31 = vor.u32 %v2790_v26, %v2236_v25  ;;  %v2783_v33 = vld [vmem:[%s3604_s30] sm:$0xff]  ;;  %v2784_v34 = vld [vmem:[%s3604_s30 + $0x8] sm:$0xff]  ;;  %s3669_s2 = smov 0  }
  0x62   : > { %v2241_v32 = vor.u32 %v2788_v27, %v2238_v28  ;;  %v2785_v35 = vld [vmem:[%s3604_s30 + $0x10] sm:$0xff]  ;;  %v2786_v36 = vld [vmem:[%s3604_s30 + $0x18] sm:$0xff]  ;;  %v455_v37 = vld [vmem:[#allocation12] sm:$0xf] }
  0x63   : > { %654 = vmatpush.bf16.msra.mxu0 %v2261_v5  ;;  %v3629_v38 = vperm.slane %v455_v37, 0  ;;  %v3631_v39 = vperm.slane %v455_v37, 1  ;;  %v3635_v44 = vperm.slane %v455_v37, 2  ;;  %v3637_v45 = vperm.slane %v455_v37, 3 }
  0x64   : > { %683 = vmatpush.bf16.msra.mxu1 %v2265_v6  ;;  %712 = vmatpush.bf16.msra.mxu2 %v2269_v7 }
  0x65   : > { %741 = vmatpush.bf16.msra.mxu3 %v2273_v11 }
  0x67   : > { %655 = vmatpush.bf16.msra.mxu0 %v2245_v17 }
  0x68   : > { %684 = vmatpush.bf16.msra.mxu1 %v2249_v18  ;;  %713 = vmatpush.bf16.msra.mxu2 %v2253_v19 }
  0x69   : > { %742 = vmatpush.bf16.msra.mxu3 %v2257_v23 }
  0x6b   : > { %656 = vmatpush.bf16.msra.mxu0 %v2229_v29 }
  0x6c   : > { %685 = vmatpush.bf16.msra.mxu1 %v2233_v30  ;;  %714 = vmatpush.bf16.msra.mxu2 %v2237_v31 }
  0x6d   : > { %743 = vmatpush.bf16.msra.mxu3 %v2241_v32 }
  0x6e   : > { %657 = vmatmul.bf16.vlgmr.msra.gmra.mxu0 %v2783_v33 }
  0x6f   : > { %686 = vmatmul.bf16.vlgmr.msra.gmra.mxu1 %v2783_v33  ;;  %715 = vmatmul.bf16.vlgmr.msra.gmra.mxu2 %v2783_v33 }
  0x70   : > { %744 = vmatmul.bf16.vlgmr.msra.gmra.mxu3 %v2783_v33 }
  0x7e   : > { %662 = vmatmul.bf16.gmra.mxu0 %v2784_v34 }
  0x7f   : > { %691 = vmatmul.bf16.gmra.mxu1 %v2784_v34  ;;  %720 = vmatmul.bf16.gmra.mxu2 %v2784_v34 }
  0x80   : > { %749 = vmatmul.bf16.gmra.mxu3 %v2784_v34 }
  0x8e   : > { %667 = vmatmul.bf16.gmra.mxu0 %v2785_v35 }
  0x8f   : > { %696 = vmatmul.bf16.gmra.mxu1 %v2785_v35  ;;  %725 = vmatmul.bf16.gmra.mxu2 %v2785_v35 }
  0x90   : > { %754 = vmatmul.bf16.gmra.mxu3 %v2785_v35 }
  0x9e   : > { %672 = vmatmul.bf16.gmra.mxu0 %v2786_v36 }
  0x9f   : > { %701 = vmatmul.bf16.gmra.mxu1 %v2786_v36  ;;  %730 = vmatmul.bf16.gmra.mxu2 %v2786_v36 }
  0xa0   : > { %759 = vmatmul.bf16.gmra.mxu3 %v2786_v36 }
  0xeb   : > { %v658_v40 = vpop.f32.mrf.mxu0 }
  0xec   : > { %v659_v41 = vadd.f32 %v658_v40, %v3629_v38  ;;  %v687_v42 = vpop.f32.mrf.mxu1 }
  0xed   : > { %v688_v43 = vadd.f32 %v687_v42, %v3631_v39 }
  0xee   : > { %765 = vst [vmem:[#allocation5] sm:$0xff] %v659_v41 }
  0xef   : > { %766 = vst [vmem:[#allocation5 + $0x8] sm:$0xff] %v688_v43 }
  0xf2   : > { %v716_v46 = vpop.f32.mrf.mxu2 }
  0xf3   : > { %v717_v47 = vadd.f32 %v716_v46, %v3635_v44  ;;  %v745_v48 = vpop.f32.mrf.mxu3  ;;  %v660_v49 = vpop.f32.mrf.mxu0 }
  0xf4   : > { %v746_v50 = vadd.f32 %v745_v48, %v3637_v45  ;;  %v661_v51 = vadd.f32 %v660_v49, %v3629_v38  ;;  %v689_v52 = vpop.f32.mrf.mxu1 }
  0xf5   : > { %767 = vst [vmem:[#allocation5 + $0x10] sm:$0xff] %v717_v47  ;;  %v690_v53 = vadd.f32 %v689_v52, %v3631_v39 }
  0xf6   : > { %768 = vst [vmem:[#allocation5 + $0x18] sm:$0xff] %v746_v50 }
  0xf7   : > { %769 = vst [vmem:[#allocation5 + $0x20] sm:$0xff] %v661_v51 }
  0xf8   : > { %770 = vst [vmem:[#allocation5 + $0x28] sm:$0xff] %v690_v53 }
  0xfa   : > { %v718_v54 = vpop.f32.mrf.mxu2 }
  0xfb   : > { %v719_v55 = vadd.f32 %v718_v54, %v3635_v44  ;;  %v747_v56 = vpop.f32.mrf.mxu3  ;;  %v663_v57 = vpop.f32.mrf.mxu0 }
  0xfc   : > { %v748_v58 = vadd.f32 %v747_v56, %v3637_v45  ;;  %v664_v59 = vadd.f32 %v663_v57, %v3629_v38  ;;  %v692_v60 = vpop.f32.mrf.mxu1 }
  0xfd   : > { %771 = vst [vmem:[#allocation5 + $0x30] sm:$0xff] %v719_v55  ;;  %v693_v61 = vadd.f32 %v692_v60, %v3631_v39 }
  0xfe   : > { %772 = vst [vmem:[#allocation5 + $0x38] sm:$0xff] %v748_v58 }
  0xff   : > { %773 = vst [vmem:[#allocation5 + $0x40] sm:$0xff] %v664_v59 }
 0x100   : > { %774 = vst [vmem:[#allocation5 + $0x48] sm:$0xff] %v693_v61 }
 0x102   : > { %v721_v62 = vpop.f32.mrf.mxu2 }
 0x103   : > { %v722_v63 = vadd.f32 %v721_v62, %v3635_v44  ;;  %v750_v0 = vpop.f32.mrf.mxu3  ;;  %v665_v1 = vpop.f32.mrf.mxu0 }
 0x104   : > { %v751_v2 = vadd.f32 %v750_v0, %v3637_v45  ;;  %v666_v3 = vadd.f32 %v665_v1, %v3629_v38  ;;  %v694_v4 = vpop.f32.mrf.mxu1 }
 0x105   : > { %775 = vst [vmem:[#allocation5 + $0x50] sm:$0xff] %v722_v63  ;;  %v695_v5 = vadd.f32 %v694_v4, %v3631_v39 }
 0x106   : > { %776 = vst [vmem:[#allocation5 + $0x58] sm:$0xff] %v751_v2 }
 0x107   : > { %777 = vst [vmem:[#allocation5 + $0x60] sm:$0xff] %v666_v3 }
 0x108   : > { %778 = vst [vmem:[#allocation5 + $0x68] sm:$0xff] %v695_v5 }
 0x10a   : > { %v723_v6 = vpop.f32.mrf.mxu2 }
 0x10b   : > { %v724_v7 = vadd.f32 %v723_v6, %v3635_v44  ;;  %v752_v8 = vpop.f32.mrf.mxu3  ;;  %v668_v9 = vpop.f32.mrf.mxu0 }
 0x10c   : > { %v753_v10 = vadd.f32 %v752_v8, %v3637_v45  ;;  %v669_v11 = vadd.f32 %v668_v9, %v3629_v38  ;;  %v697_v12 = vpop.f32.mrf.mxu1 }
 0x10d   : > { %779 = vst [vmem:[#allocation5 + $0x70] sm:$0xff] %v724_v7  ;;  %v698_v13 = vadd.f32 %v697_v12, %v3631_v39 }
 0x10e   : > { %780 = vst [vmem:[#allocation5 + $0x78] sm:$0xff] %v753_v10 }
 0x10f   : > { %781 = vst [vmem:[#allocation5 + $0x80] sm:$0xff] %v669_v11 }
 0x110   : > { %782 = vst [vmem:[#allocation5 + $0x88] sm:$0xff] %v698_v13 }
 0x112   : > { %v726_v14 = vpop.f32.mrf.mxu2 }
 0x113   : > { %v727_v15 = vadd.f32 %v726_v14, %v3635_v44  ;;  %v755_v16 = vpop.f32.mrf.mxu3  ;;  %v670_v17 = vpop.f32.mrf.mxu0 }
 0x114   : > { %v756_v18 = vadd.f32 %v755_v16, %v3637_v45  ;;  %v671_v19 = vadd.f32 %v670_v17, %v3629_v38  ;;  %v699_v20 = vpop.f32.mrf.mxu1 }
 0x115   : > { %783 = vst [vmem:[#allocation5 + $0x90] sm:$0xff] %v727_v15  ;;  %v700_v21 = vadd.f32 %v699_v20, %v3631_v39 }
 0x116   : > { %784 = vst [vmem:[#allocation5 + $0x98] sm:$0xff] %v756_v18 }
 0x117   : > { %785 = vst [vmem:[#allocation5 + $0xa0] sm:$0xff] %v671_v19 }
 0x118   : > { %786 = vst [vmem:[#allocation5 + $0xa8] sm:$0xff] %v700_v21 }
 0x11a   : > { %v728_v22 = vpop.f32.mrf.mxu2 }
 0x11b   : > { %v729_v23 = vadd.f32 %v728_v22, %v3635_v44  ;;  %v757_v24 = vpop.f32.mrf.mxu3  ;;  %v673_v25 = vpop.f32.mrf.mxu0 }
 0x11c   : > { %v758_v26 = vadd.f32 %v757_v24, %v3637_v45  ;;  %v674_v27 = vadd.f32 %v673_v25, %v3629_v38  ;;  %v702_v28 = vpop.f32.mrf.mxu1 }
 0x11d   : > { %787 = vst [vmem:[#allocation5 + $0xb0] sm:$0xff] %v729_v23  ;;  %v703_v29 = vadd.f32 %v702_v28, %v3631_v39 }
 0x11e   : > { %788 = vst [vmem:[#allocation5 + $0xb8] sm:$0xff] %v758_v26 }
 0x11f   : > { %789 = vst [vmem:[#allocation5 + $0xc0] sm:$0xff] %v674_v27 }
 0x120   : > { %790 = vst [vmem:[#allocation5 + $0xc8] sm:$0xff] %v703_v29 }
 0x122   : > { %v731_v30 = vpop.f32.mrf.mxu2 }
 0x123   : > { %v732_v31 = vadd.f32 %v731_v30, %v3635_v44  ;;  %v760_v32 = vpop.f32.mrf.mxu3  ;;  %v675_v33 = vpop.f32.mrf.mxu0 }
 0x124   : > { %v761_v34 = vadd.f32 %v760_v32, %v3637_v45  ;;  %v676_v35 = vadd.f32 %v675_v33, %v3629_v38  ;;  %v704_v36 = vpop.f32.mrf.mxu1 }
 0x125   : > { %791 = vst [vmem:[#allocation5 + $0xd0] sm:$0xff] %v732_v31  ;;  %v705_v37 = vadd.f32 %v704_v36, %v3631_v39 }
 0x126   : > { %792 = vst [vmem:[#allocation5 + $0xd8] sm:$0xff] %v761_v34 }
 0x127   : > { %793 = vst [vmem:[#allocation5 + $0xe0] sm:$0xff] %v676_v35 }
 0x128   : > { %794 = vst [vmem:[#allocation5 + $0xe8] sm:$0xff] %v705_v37 }
 0x12a   : > { %v733_v40 = vpop.f32.mrf.mxu2 }
 0x12b   : > { %v734_v41 = vadd.f32 %v733_v40, %v3635_v44  ;;  %v762_v42 = vpop.f32.mrf.mxu3 }
 0x12c   : > { %v763_v43 = vadd.f32 %v762_v42, %v3637_v45 }
 0x12d   : > { %795 = vst [vmem:[#allocation5 + $0xf0] sm:$0xff] %v734_v41 }
 0x12e   : > { %796 = vst [vmem:[#allocation5 + $0xf8] sm:$0xff] %v763_v43 }
 0x12f LB: >> { %v2471_v38 = vld [vmem:[#allocation11 + $0xe0] sm:$0xf]  ;;  %v2850_v39 = vld [vmem:[#allocation11 + $0xec] sm:$0xf0]  ;;  %v2848_v46 = vld [vmem:[#allocation11 + $0xe4] sm:$0xf]  ;;  %s3420_s2 = sphi %s3669_s2, %s802_s2  }
 0x130   : >> { %v2472_v47 = vor.u32 %v2850_v39, %v2471_v38  ;;  %v2473_v48 = vld [vmem:[#allocation11 + $0xf0] sm:$0xf0]  ;;  %v2849_v49 = vld [vmem:[#allocation11 + $0xec] sm:$0xf]  ;;  %v2481_v50 = vld [vmem:[#allocation11 + $0xf8] sm:$0xf0] }
 0x131   : >> { %v2476_v44 = vor.u32 %v2848_v46, %v2473_v48  ;;  %v2484_v51 = vor.u32 %v2849_v49, %v2481_v50  ;;  %v2455_v52 = vld [vmem:[#allocation11 + $0xc0] sm:$0xf]  ;;  %v2846_v45 = vld [vmem:[#allocation11 + $0xcc] sm:$0xf0]  ;;  %v2844_v53 = vld [vmem:[#allocation11 + $0xc4] sm:$0xf] }
 0x132   : >> { %1012 = vmatpush.bf16.msra.mxu0 %v2472_v47  ;;  %v2456_v54 = vor.u32 %v2846_v45, %v2455_v52  ;;  %v2457_v55 = vld [vmem:[#allocation11 + $0xd0] sm:$0xf0]  ;;  %v2845_v56 = vld [vmem:[#allocation11 + $0xcc] sm:$0xf]  ;;  %v2465_v57 = vld [vmem:[#allocation11 + $0xd8] sm:$0xf0] }
 0x133   : >> { %1026 = vmatpush.bf16.msra.mxu1 %v2476_v44  ;;  %1054 = vmatpush.bf16.msra.mxu3 %v2484_v51  ;;  %v2460_v58 = vor.u32 %v2844_v53, %v2457_v55  ;;  %v2468_v59 = vor.u32 %v2845_v56, %v2465_v57  ;;  %v2479_v60 = vld [vmem:[#allocation11 + $0xe8] sm:$0xf]  ;;  %v2851_v61 = vld [vmem:[#allocation11 + $0xf4] sm:$0xf0]  ;;  %v2439_v62 = vld [vmem:[#allocation11 + $0xa0] sm:$0xf] }
 0x134   : >> { %v2480_v63 = vor.u32 %v2851_v61, %v2479_v60  ;;  %v2842_v0 = vld [vmem:[#allocation11 + $0xac] sm:$0xf0]  ;;  %v2840_v1 = vld [vmem:[#allocation11 + $0xa4] sm:$0xf]  ;;  %v2441_v2 = vld [vmem:[#allocation11 + $0xb0] sm:$0xf0] }
 0x135   : >> { %v2841_v3 = vld [vmem:[#allocation11 + $0xac] sm:$0xf]  ;;  %v2449_v4 = vld [vmem:[#allocation11 + $0xb8] sm:$0xf0]  ;;  %v2463_v5 = vld [vmem:[#allocation11 + $0xc8] sm:$0xf]  ;;  %v2440_v6 = vor.u32 %v2842_v0, %v2439_v62  ;;  %v2444_v10 = vor.u32 %v2840_v1, %v2441_v2 }
 0x136   : >> { %1013 = vmatpush.bf16.msra.mxu0 %v2456_v54  ;;  %1040 = vmatpush.bf16.msra.mxu2 %v2480_v63  ;;  %v2847_v7 = vld [vmem:[#allocation11 + $0xd4] sm:$0xf0]  ;;  %v2423_v8 = vld [vmem:[#allocation11 + $0x80] sm:$0xf]  ;;  %v2838_v9 = vld [vmem:[#allocation11 + $0x8c] sm:$0xf0]  ;;  %v2452_v11 = vor.u32 %v2841_v3, %v2449_v4 }
 0x137   : >> { %1027 = vmatpush.bf16.msra.mxu1 %v2460_v58  ;;  %1055 = vmatpush.bf16.msra.mxu3 %v2468_v59  ;;  %v2464_v12 = vor.u32 %v2847_v7, %v2463_v5  ;;  %v2836_v13 = vld [vmem:[#allocation11 + $0x84] sm:$0xf]  ;;  %v2425_v14 = vld [vmem:[#allocation11 + $0x90] sm:$0xf0]  ;;  %v2837_v15 = vld [vmem:[#allocation11 + $0x8c] sm:$0xf]  ;;  %v2424_v19 = vor.u32 %v2838_v9, %v2423_v8 }
 0x138   : >> { %v2433_v16 = vld [vmem:[#allocation11 + $0x98] sm:$0xf0]  ;;  %v2447_v17 = vld [vmem:[#allocation11 + $0xa8] sm:$0xf]  ;;  %v2843_v18 = vld [vmem:[#allocation11 + $0xb4] sm:$0xf0]  ;;  %v2428_v23 = vor.u32 %v2836_v13, %v2425_v14 }
 0x139   : >> { %v2448_v20 = vor.u32 %v2843_v18, %v2447_v17  ;;  %v2407_v21 = vld [vmem:[#allocation11 + $0x60] sm:$0xf]  ;;  %v2834_v22 = vld [vmem:[#allocation11 + $0x6c] sm:$0xf0]  ;;  %v2436_v24 = vor.u32 %v2837_v15, %v2433_v16  ;;  %v2832_v25 = vld [vmem:[#allocation11 + $0x64] sm:$0xf] }
 0x13a   : >> { %1014 = vmatpush.bf16.msra.mxu0 %v2440_v6  ;;  %1041 = vmatpush.bf16.msra.mxu2 %v2464_v12  ;;  %v2431_v26 = vld [vmem:[#allocation11 + $0x88] sm:$0xf]  ;;  %v2839_v27 = vld [vmem:[#allocation11 + $0x94] sm:$0xf0]  ;;  %v2409_v28 = vld [vmem:[#allocation11 + $0x70] sm:$0xf0]  ;;  %v2408_v31 = vor.u32 %v2834_v22, %v2407_v21 }
 0x13b   : >> { %1028 = vmatpush.bf16.msra.mxu1 %v2444_v10  ;;  %1056 = vmatpush.bf16.msra.mxu3 %v2452_v11  ;;  %v2833_v29 = vld [vmem:[#allocation11 + $0x6c] sm:$0xf]  ;;  %v2417_v30 = vld [vmem:[#allocation11 + $0x78] sm:$0xf0]  ;;  %v2432_v32 = vor.u32 %v2839_v27, %v2431_v26  ;;  %v2391_v33 = vld [vmem:[#allocation11 + $0x40] sm:$0xf]  ;;  %v2412_v35 = vor.u32 %v2832_v25, %v2409_v28 }
 0x13c   : >> { %v2830_v34 = vld [vmem:[#allocation11 + $0x4c] sm:$0xf0]  ;;  %v2420_v36 = vor.u32 %v2833_v29, %v2417_v30  ;;  %v2828_v37 = vld [vmem:[#allocation11 + $0x44] sm:$0xf]  ;;  %v2415_v40 = vld [vmem:[#allocation11 + $0x68] sm:$0xf] }
 0x13d   : >> { %v2835_v41 = vld [vmem:[#allocation11 + $0x74] sm:$0xf0]  ;;  %v2393_v42 = vld [vmem:[#allocation11 + $0x50] sm:$0xf0]  ;;  %v2829_v43 = vld [vmem:[#allocation11 + $0x4c] sm:$0xf]  ;;  %v2392_v39 = vor.u32 %v2830_v34, %v2391_v33 }
 0x13e   : >> { %1015 = vmatpush.bf16.msra.mxu0 %v2424_v19  ;;  %1042 = vmatpush.bf16.msra.mxu2 %v2448_v20  ;;  %v2401_v38 = vld [vmem:[#allocation11 + $0x58] sm:$0xf0]  ;;  %v2416_v46 = vor.u32 %v2835_v41, %v2415_v40  ;;  %v2375_v47 = vld [vmem:[#allocation11 + $0x20] sm:$0xf]  ;;  %v2826_v48 = vld [vmem:[#allocation11 + $0x2c] sm:$0xf0]  ;;  %v2396_v49 = vor.u32 %v2828_v37, %v2393_v42 }
 0x13f   : >> { %1029 = vmatpush.bf16.msra.mxu1 %v2428_v23  ;;  %1057 = vmatpush.bf16.msra.mxu3 %v2436_v24  ;;  %v2404_v50 = vor.u32 %v2829_v43, %v2401_v38  ;;  %v2824_v44 = vld [vmem:[#allocation11 + $0x24] sm:$0xf]  ;;  %v2399_v51 = vld [vmem:[#allocation11 + $0x48] sm:$0xf]  ;;  %v2831_v52 = vld [vmem:[#allocation11 + $0x54] sm:$0xf0]  ;;  %v2376_v55 = vor.u32 %v2826_v48, %v2375_v47 }
 0x140   : >> { %v2377_v45 = vld [vmem:[#allocation11 + $0x30] sm:$0xf0]  ;;  %v2825_v53 = vld [vmem:[#allocation11 + $0x2c] sm:$0xf]  ;;  %v2385_v54 = vld [vmem:[#allocation11 + $0x38] sm:$0xf0]  ;;  %v2400_v56 = vor.u32 %v2831_v52, %v2399_v51 }
 0x141   : >> { %v2359_v57 = vld [vmem:[#allocation11] sm:$0xf]  ;;  %v2822_v58 = vld [vmem:[#allocation11 + $0xc] sm:$0xf0]  ;;  %v2380_v59 = vor.u32 %v2824_v44, %v2377_v45  ;;  %v2388_v60 = vor.u32 %v2825_v53, %v2385_v54  ;;  %v2820_v61 = vld [vmem:[#allocation11 + $0x4] sm:$0xf] }
 0x142   : >> { %1016 = vmatpush.bf16.msra.mxu0 %v2408_v31  ;;  %1043 = vmatpush.bf16.msra.mxu2 %v2432_v32  ;;  %v2383_v62 = vld [vmem:[#allocation11 + $0x28] sm:$0xf]  ;;  %v2827_v63 = vld [vmem:[#allocation11 + $0x34] sm:$0xf0]  ;;  %v2361_v0 = vld [vmem:[#allocation11 + $0x10] sm:$0xf0]  ;;  %v2360_v3 = vor.u32 %v2822_v58, %v2359_v57 }
 0x143   : >> { %1030 = vmatpush.bf16.msra.mxu1 %v2412_v35  ;;  %1058 = vmatpush.bf16.msra.mxu3 %v2420_v36  ;;  %v2821_v1 = vld [vmem:[#allocation11 + $0xc] sm:$0xf]  ;;  %v2369_v2 = vld [vmem:[#allocation11 + $0x18] sm:$0xf0]  ;;  %v817_v4 = vld [vmem:[#allocation2 + $0x10] sm:$0xff]  ;;  %v2384_v6 = vor.u32 %v2827_v63, %v2383_v62  ;;  %v2364_v7 = vor.u32 %v2820_v61, %v2361_v0  ;;  %s2354_s3 = sshll.u32 %s3420_s2, 4 }
 0x144   : >> { %v818_v5 = vld [vmem:[#allocation2] sm:$0xff]  ;;  %v2372_v8 = vor.u32 %v2821_v1, %v2369_v2  ;;  %v2367_v9 = vld [vmem:[#allocation11 + $0x8] sm:$0xf]  ;;  %v2823_v10 = vld [vmem:[#allocation11 + $0x14] sm:$0xf0]  ;;  %s3675_s8 = sshra.s32 %s2354_s3, 3 }
 0x145   : >> { %v819_v11 = vpack.c.bf16 %v818_v5, %v817_v4  ;;  %v2368_v12 = vor.u32 %v2823_v10, %v2367_v9  ;;  %s2819_s12 = sshll.u32 %s3675_s8, 5  ;;  %s2491_s15 = sshll.u32 %s3675_s8, 2 }
 0x146   : >> { %1017 = vmatpush.bf16.msra.mxu0 %v2392_v39  ;;  %1044 = vmatpush.bf16.msra.mxu2 %v2416_v46  ;;  %s3678_s17 = scalar_lea.vmem [#allocation5], %s2819_s12  ;;  %s1211_s21 = scalar_lea.vmem [#allocation4], %s2491_s15 }
 0x147   : >> { %1031 = vmatpush.bf16.msra.mxu1 %v2396_v49  ;;  %1059 = vmatpush.bf16.msra.mxu3 %v2404_v50  ;;  %v809_v13 = vld [vmem:[%s3678_s17] sm:$0xff]  ;;  %v810_v14 = vld [vmem:[%s3678_s17 + $0x8] sm:$0xff]  ;;  %v812_v21 = vld [vmem:[%s3678_s17 + $0x18] sm:$0xff]  ;;  %s802_s2 = sadd.s32 1, %s3420_s2  }
 0x148   : >> { %v813_v22 = vld [vmem:[%s3678_s17 + $0x20] sm:$0xff]  ;;  %v814_v24 = vld [vmem:[%s3678_s17 + $0x28] sm:$0xff]  ;;  %v811_v36 = vld [vmem:[%s3678_s17 + $0x10] sm:$0xff]  ;;  %p799_p1 = scmp.ge.s32.totalorder %s802_s2, 4  }
 0x149   : >> { %v816_v40 = vld [vmem:[%s3678_s17 + $0x38] sm:$0xff]  ;;  %v815_v0 = vld [vmem:[%s3678_s17 + $0x30] sm:$0xff]  ;;  %v2622_v4 = vld [vmem:[#allocation14 + $0xe0] sm:$0xf] (%p799_p1)  ;;  %s3789_s19 = smov (%p799_p1), 0  }
 0x14a   : >> { %1018 = vmatpush.bf16.msra.mxu0 %v2376_v55  ;;  %1045 = vmatpush.bf16.msra.mxu2 %v2400_v56 }
 0x14b   : >> { %1032 = vmatpush.bf16.msra.mxu1 %v2380_v59  ;;  %1060 = vmatpush.bf16.msra.mxu3 %v2388_v60 }
 0x14e   : >> { %1019 = vmatpush.bf16.msra.mxu0 %v2360_v3  ;;  %1046 = vmatpush.bf16.msra.mxu2 %v2384_v6 }
 0x14f   : >> { %1033 = vmatpush.bf16.msra.mxu1 %v2364_v7  ;;  %1061 = vmatpush.bf16.msra.mxu3 %v2372_v8 }
 0x151   : >> { %1020 = vmatmul.bf16.vlgmr.msra.gmra.mxu0 %v819_v11 }
 0x152   : >> { %1034 = vmatmul.bf16.vlgmr.msra.gmra.mxu1 %v819_v11  ;;  %1062 = vmatmul.bf16.vlgmr.msra.gmra.mxu3 %v819_v11 }
 0x153   : >> { %1047 = vmatpush.bf16.msra.mxu2 %v2368_v12 }
 0x156   : >> { %1048 = vmatmul.bf16.vlgmr.msra.gmra.mxu2 %v819_v11 }
 0x1ce   : >> { %v1021_v15 = vpop.f32.mrf.mxu0 }
 0x1cf   : >> { %v1068_v16 = vadd.f32 %v1021_v15, %v809_v13  ;;  %v1035_v17 = vpop.f32.mrf.mxu1  ;;  %v1192_v13 = vld [vmem:[#allocation3] sm:$0xff] }
 0x1d0   : >> { %v1069_v18 = vadd.f32 %v1035_v17, %v810_v14 }
 0x1d1   : >> { %v2485_v19 = vmul.f32 -1.442695, %v1068_v16 }
 0x1d2   : >> { %v2487_v20 = vmul.f32 -1.442695, %v1069_v18 }
 0x1d3   : >> { %3070 = vpow2.f32 %v2485_v19 }
 0x1d4   : >> { %3072 = vpow2.f32 %v2487_v20 }
 0x1d5   : >> { %v1063_v23 = vpop.f32.mrf.mxu3 }
 0x1d6   : >> { %v1071_v25 = vadd.f32 %v1063_v23, %v812_v21  ;;  %v1023_v26 = vpop.f32.mrf.mxu0 }
 0x1d7   : >> { %v1072_v27 = vadd.f32 %v1023_v26, %v813_v22  ;;  %v1037_v28 = vpop.f32.mrf.mxu1 }
 0x1d8   : >> { %v2489_v29 = vmul.f32 -1.442695, %v1071_v25  ;;  %v1073_v30 = vadd.f32 %v1037_v28, %v814_v24 }
 0x1d9   : >> { %v3071_v31 = vpop.eup %3070  ;;  %v2486_v32 = vmul.f32 -1.442695, %v1072_v27  ;;  %v1049_v41 = vpop.f32.mrf.mxu2 }
 0x1da   : >> { %v3073_v33 = vpop.eup %3072  ;;  %v1082_v34 = vadd.f32 1.0, %v3071_v31  ;;  %3074 = vpow2.f32 %v2489_v29  ;;  %v2488_v35 = vmul.f32 -1.442695, %v1073_v30  ;;  %v1070_v42 = vadd.f32 %v1049_v41, %v811_v36 }
 0x1db   : >> { %v1120_v37 = vadd.f32 1.0, %v3073_v33  ;;  %3076 = vpow2.f32 %v2486_v32 }
 0x1dc   : >> { %3078 = vrcp.f32 %v1082_v34  ;;  %v1093_v55 = vand.u32 2147483647, %v1082_v34  ;;  %v1095_v56 = vand.u32 2147483648, %v1082_v34  ;;  %vm1089_vm3 = vweird.f32 %v1082_v34 }
 0x1dd   : >> { %3080 = vrcp.f32 %v1120_v37  ;;  %v1065_v43 = vpop.f32.mrf.mxu3  ;;  %v1133_v58 = vand.u32 2147483648, %v1120_v37  ;;  %v1131_v59 = vand.u32 2147483647, %v1120_v37  ;;  %vm1127_vm1 = vweird.f32 %v1120_v37 }
 0x1de   : >> { %3082 = vpow2.f32 %v2488_v35  ;;  %v1075_v38 = vadd.f32 %v1065_v43, %v816_v40  ;;  %vm3699_vm4 = vcmp.eq.f32.partialorder %v1093_v55, 8.507059e+37  ;;  %v1096_v5 = vor.u32 1.1754944e-38, %v1095_v56  ;;  %v2872_v43 = vld [vmem:[#allocation14 + $0x84] sm:$0xf] (%p799_p1) }
 0x1df   : >> { %3084 = vtanh.f32 %v1070_v42  ;;  %v1134_v8 = vor.u32 1.1754944e-38, %v1133_v58  ;;  %vm1132_vm6 = vcmp.eq.f32.partialorder %v1131_v59, 8.507059e+37 }
 0x1e0   : >> { %v3075_v39 = vpop.eup %3074  ;;  %v2490_v46 = vmul.f32 -1.442695, %v1075_v38 }
 0x1e1   : >> { %v3077_v47 = vpop.eup %3076  ;;  %v3687_v48 = vadd.f32 1.0, %v3075_v39  ;;  %v1051_v1 = vpop.f32.mrf.mxu2 }
 0x1e2   : >> { %v3079_v49 = vpop.eup %3078  ;;  %v3689_v50 = vadd.f32 1.0, %v3077_v47  ;;  %3086 = vpow2.f32 %v2490_v46  ;;  %v1074_v14 = vadd.f32 %v1051_v1, %v815_v0 }
 0x1e3   : >> { %v3081_v44 = vpop.eup %3080  ;;  %v1085_v51 = vmul.f32 %v3079_v49, %v1082_v34  ;;  %3088 = vrcp.f32 %v3687_v48  ;;  %vm1090_vm0 = vweird.f32 %v3079_v49  ;;  %v1173_v16 = vand.u32 2147483648, %v3687_v48 }
 0x1e4   : >> { %v3083_v52 = vpop.eup %3082  ;;  %v1123_v45 = vmul.f32 %v3081_v44, %v1120_v37  ;;  %3090 = vrcp.f32 %v3689_v50  ;;  %vm1128_vm2 = vweird.f32 %v3081_v44  ;;  %vm1091_vm5 = vmor %vm1089_vm3, %vm1090_vm0  ;;  %v1110_v23 = vand.u32 2147483648, %v3689_v50 }
 0x1e5   : >> { %v1086_v53 = vsub.f32 1.0, %v1085_v51  ;;  %v3693_v54 = vadd.f32 1.0, %v3083_v52  ;;  %v3085_v60 = vpop.eup %3084  ;;  %vm1129_vm7 = vmor %vm1127_vm1, %vm1128_vm2  ;;  %vm1104_vm8 = vweird.f32 %v3689_v50  ;;  %v1108_v28 = vand.u32 2147483647, %v3689_v50 }
 0x1e6   : >> { %v1124_v57 = vsub.f32 1.0, %v1123_v45  ;;  %v1111_v36 = vor.u32 1.1754944e-38, %v1110_v23  ;;  %vm1167_vm13 = vweird.f32 %v3687_v48  ;;  %v1171_v41 = vand.u32 2147483647, %v3687_v48  ;;  %v2883_v23 = vld [vmem:[#allocation14 + $0xd4] sm:$0xf0] (%p799_p1) }
 0x1e7   : >> { %3092 = vrcp.f32 %v3693_v54  ;;  %v1087_v61 = vmul.f32 %v3079_v49, %v1086_v53  ;;  %v1148_v30 = vand.u32 2147483648, %v3693_v54  ;;  %v1146_v32 = vand.u32 2147483647, %v3693_v54 }
 0x1e8   : >> { %v3087_v62 = vpop.eup %3086  ;;  %v1125_v63 = vmul.f32 %v3081_v44, %v1124_v57  ;;  %vm1109_vm14 = vcmp.eq.f32.partialorder %v1108_v28, 8.507059e+37  ;;  %vm1142_vm0 = vweird.f32 %v3693_v54  ;;  %vm1172_vm3 = vcmp.eq.f32.partialorder %v1171_v41, 8.507059e+37  ;;  %v2878_v28 = vld [vmem:[#allocation14 + $0xac] sm:$0xf0] (%p799_p1)  ;;  %v2574_v41 = vld [vmem:[#allocation14 + $0x80] sm:$0xf] (%p799_p1) }
 0x1e9   : >> { %v3697_v2 = vpop.eup %3088  ;;  %v1088_v3 = vadd.f32 %v3079_v49, %v1087_v61  ;;  %v3703_v6 = vadd.f32 1.0, %v3087_v62  ;;  %vm1147_vm2 = vcmp.eq.f32.partialorder %v1146_v32, 8.507059e+37  ;;  %v2598_v32 = vld [vmem:[#allocation14 + $0xa8] sm:$0xf] (%p799_p1) }
 0x1ea   : >> { %v3091_v7 = vpop.eup %3090  ;;  %v1163_v9 = vmul.f32 %v3697_v2, %v3687_v48  ;;  %v1126_v10 = vadd.f32 %v3081_v44, %v1125_v63  ;;  %vm1168_vm10 = vweird.f32 %v3697_v2  ;;  %v1193_v48 = vld [vmem:[#allocation3 + $0x18] sm:$0xff] }
 0x1eb   : >> { %v1100_v11 = vmul.f32 %v3091_v7, %v3689_v50  ;;  %v1092_v12 = vsel %vm1091_vm5, %v3079_v49, %v1088_v3  ;;  %3094 = vrcp.f32 %v3703_v6  ;;  %vm1105_vm9 = vweird.f32 %v3091_v7  ;;  %vm3730_vm15 = vmor %vm1167_vm13, %vm1168_vm10 }
 0x1ec   : >> { %v1164_v15 = vsub.f32 1.0, %v1163_v9  ;;  %v1097_v17 = vsel %vm3699_vm4, %v1096_v5, %v1092_v12  ;;  %v1130_v18 = vsel %vm1129_vm7, %v3081_v44, %v1126_v10  ;;  %3096 = vtanh.f32 %v1074_v14  ;;  %vm1106_vm12 = vmor %vm1104_vm8, %vm1105_vm9  ;;  %v2886_v5 = vld [vmem:[#allocation14 + $0xec] sm:$0xf0] (%p799_p1)  ;;  %v2630_v9 = vld [vmem:[#allocation14 + $0xe8] sm:$0xf] (%p799_p1) }
 0x1ed   : >> { %v3093_v19 = vpop.eup %3092  ;;  %v1101_v20 = vsub.f32 1.0, %v1100_v11  ;;  %v1135_v21 = vsel %vm1132_vm6, %v1134_v8, %v1130_v18  ;;  %v1196_v22 = vmul.f32 %v3085_v60, %v1097_v17  ;;  %v1149_v50 = vor.u32 1.1754944e-38, %v1148_v30  ;;  %v2624_v8 = vld [vmem:[#allocation14 + $0xf0] sm:$0xf0] (%p799_p1)  ;;  %v2887_v10 = vld [vmem:[#allocation14 + $0xf4] sm:$0xf0] (%p799_p1) }
 0x1ee   : >> { %v1165_v24 = vmul.f32 %v3697_v2, %v1164_v15  ;;  %v1138_v25 = vmul.f32 %v3093_v19, %v3693_v54  ;;  %v1194_v26 = vmul.f32 %v1192_v13, %v1135_v21  ;;  %vm1143_vm11 = vweird.f32 %v3093_v19  ;;  %v2885_v13 = vld [vmem:[#allocation14 + $0xec] sm:$0xf] (%p799_p1)  ;;  %v2632_v14 = vld [vmem:[#allocation14 + $0xf8] sm:$0xf0] (%p799_p1)  ;;  %v2606_v15 = vld [vmem:[#allocation14 + $0xc0] sm:$0xf] (%p799_p1) }
 0x1ef   : >> { %v1102_v27 = vmul.f32 %v3091_v7, %v1101_v20  ;;  %vm1144_vm1 = vmor %vm1142_vm0, %vm1143_vm11  ;;  %v1174_v44 = vor.u32 1.1754944e-38, %v1173_v16  ;;  %v1188_v60 = vand.u32 2147483648, %v3703_v6  ;;  %vm1182_vm5 = vweird.f32 %v3703_v6  ;;  %v2882_v17 = vld [vmem:[#allocation14 + $0xcc] sm:$0xf0] (%p799_p1)  ;;  %v2880_v18 = vld [vmem:[#allocation14 + $0xc4] sm:$0xf] (%p799_p1) }
 0x1f0   : >> { %v1139_v29 = vsub.f32 1.0, %v1138_v25  ;;  %v1198_v31 = vadd.f32 %v1196_v22, %v1194_v26  ;;  %v1166_v34 = vadd.f32 %v3697_v2, %v1165_v24  ;;  %v1186_v61 = vand.u32 2147483647, %v3703_v6  ;;  %v2614_v22 = vld [vmem:[#allocation14 + $0xc8] sm:$0xf] (%p799_p1) }
 0x1f1   : >> { %v3095_v33 = vpop.eup %3094  ;;  %v1103_v35 = vadd.f32 %v3091_v7, %v1102_v27  ;;  %v1189_v63 = vor.u32 1.1754944e-38, %v1188_v60  ;;  %v2631_v12 = vor.u32 (%p799_p1), %v2887_v10, %v2630_v9  ;;  %v2635_v16 = vor.u32 (%p799_p1), %v2885_v13, %v2632_v14  ;;  %v2881_v24 = vld [vmem:[#allocation14 + $0xcc] sm:$0xf] (%p799_p1)  ;;  %v2616_v26 = vld [vmem:[#allocation14 + $0xd8] sm:$0xf0] (%p799_p1) }
 0x1f2   : >> { %v1140_v37 = vmul.f32 %v3093_v19, %v1139_v29  ;;  %3098 = vtanh.f32 %v1198_v31  ;;  %1206 = vst [vmem:[#allocation3] sm:$0xff] %v1198_v31  ;;  %v1178_v40 = vmul.f32 %v3095_v33, %v3703_v6  ;;  %v3097_v47 = vpop.eup %3096  ;;  %v1170_v49 = vsel %vm3730_vm15, %v3697_v2, %v1166_v34  ;;  %v2884_v6 = vld [vmem:[#allocation14 + $0xe4] sm:$0xf] (%p799_p1)  ;;  %v2590_v27 = vld [vmem:[#allocation14 + $0xa0] sm:$0xf] (%p799_p1) }
 0x1f3   : >> { %v1107_v42 = vsel %vm1106_vm12, %v3091_v7, %v1103_v35  ;;  %v1175_v55 = vsel %vm1172_vm3, %v1174_v44, %v1170_v49  ;;  %vm1183_vm4 = vweird.f32 %v3095_v33  ;;  %vm1187_vm7 = vcmp.eq.f32.partialorder %v1186_v61, 8.507059e+37  ;;  %1506 = vmatpush.bf16.msra.mxu2 (%p799_p1), %v2631_v12  ;;  %1535 = vmatpush.bf16.msra.mxu3 (%p799_p1), %v2635_v16  ;;  %v2876_v30 = vld [vmem:[#allocation14 + $0xa4] sm:$0xf] (%p799_p1)  ;;  %v2592_v31 = vld [vmem:[#allocation14 + $0xb0] sm:$0xf0] (%p799_p1) }
 0x1f4   : >> { %v1179_v38 = vsub.f32 1.0, %v1178_v40  ;;  %v1112_v39 = vsel %vm1109_vm14, %v1111_v36, %v1107_v42  ;;  %v1141_v46 = vadd.f32 %v3093_v19, %v1140_v37  ;;  %vm1184_vm6 = vmor %vm1182_vm5, %vm1183_vm4  ;;  %v2623_v7 = vor.u32 (%p799_p1), %v2886_v5, %v2622_v4  ;;  %v2879_v34 = vld [vmem:[#allocation14 + $0xb4] sm:$0xf0] (%p799_p1)  ;;  %v2877_v35 = vld [vmem:[#allocation14 + $0xac] sm:$0xf] (%p799_p1) }
 0x1f5   : >> { %v1197_v52 = vmul.f32 %v3097_v47, %v1112_v39  ;;  %v2627_v11 = vor.u32 (%p799_p1), %v2884_v6, %v2624_v8  ;;  %v2607_v20 = vor.u32 (%p799_p1), %v2882_v17, %v2606_v15  ;;  %v2615_v25 = vor.u32 (%p799_p1), %v2883_v23, %v2614_v22  ;;  %v2600_v36 = vld [vmem:[#allocation14 + $0xb8] sm:$0xf0] (%p799_p1)  ;;  %v2874_v42 = vld [vmem:[#allocation14 + $0x8c] sm:$0xf0] (%p799_p1)  ;;  %v2576_v39 = vld [vmem:[#allocation14 + $0x90] sm:$0xf0] (%p799_p1) }
 0x1f6   : >> { %v1145_v51 = vsel %vm1144_vm1, %v3093_v19, %v1141_v46  ;;  %v1180_v45 = vmul.f32 %v3095_v33, %v1179_v38  ;;  %1448 = vmatpush.bf16.msra.mxu0 (%p799_p1), %v2623_v7  ;;  %v2608_v19 = vld [vmem:[#allocation14 + $0xd0] sm:$0xf0] (%p799_p1)  ;;  %v2619_v29 = vor.u32 (%p799_p1), %v2881_v24, %v2616_v26  ;;  %v2595_v37 = vor.u32 (%p799_p1), %v2876_v30, %v2592_v31  ;;  %v2582_v46 = vld [vmem:[#allocation14 + $0x88] sm:$0xf] (%p799_p1)  ;;  %v2875_v47 = vld [vmem:[#allocation14 + $0x94] sm:$0xf0] (%p799_p1) }
 0x1f7   : >> { %v1150_v53 = vsel %vm1147_vm2, %v1149_v50, %v1145_v51  ;;  %1477 = vmatpush.bf16.msra.mxu1 (%p799_p1), %v2627_v11  ;;  %v2611_v21 = vor.u32 (%p799_p1), %v2880_v18, %v2608_v19  ;;  %1507 = vmatpush.bf16.msra.mxu2 (%p799_p1), %v2615_v25  ;;  %v2599_v40 = vor.u32 (%p799_p1), %v2879_v34, %v2598_v32  ;;  %v2873_v49 = vld [vmem:[#allocation14 + $0x8c] sm:$0xf] (%p799_p1)  ;;  %v2584_v50 = vld [vmem:[#allocation14 + $0x98] sm:$0xf0] (%p799_p1)  ;;  %v2550_v4 = vld [vmem:[#allocation14 + $0x48] sm:$0xf] (%p799_p1) }
 0x1f8   : >> { %v3099_v54 = vpop.eup %3098  ;;  %v1195_v56 = vmul.f32 %v1193_v48, %v1150_v53  ;;  %v1181_v59 = vadd.f32 %v3095_v33, %v1180_v45  ;;  %1536 = vmatpush.bf16.msra.mxu3 (%p799_p1), %v2619_v29  ;;  %v2603_v38 = vor.u32 (%p799_p1), %v2877_v35, %v2600_v36  ;;  %v2575_v48 = vor.u32 (%p799_p1), %v2874_v42, %v2574_v41  ;;  %v2870_v45 = vld [vmem:[#allocation14 + $0x6c] sm:$0xf0] (%p799_p1)  ;;  %v2868_v53 = vld [vmem:[#allocation14 + $0x64] sm:$0xf] (%p799_p1)  ;;  %v2867_v5 = vld [vmem:[#allocation14 + $0x54] sm:$0xf0] (%p799_p1) }
 0x1f9   : >> { %v1202_v57 = vmul.f32 %v3099_v54, %v1175_v55  ;;  %v2579_v44 = vor.u32 (%p799_p1), %v2872_v43, %v2576_v39  ;;  %v2583_v51 = vor.u32 (%p799_p1), %v2875_v47, %v2582_v46  ;;  %v2587_v54 = vor.u32 (%p799_p1), %v2873_v49, %v2584_v50  ;;  %v2560_v55 = vld [vmem:[#allocation14 + $0x70] sm:$0xf0] (%p799_p1)  ;;  %v2865_v6 = vld [vmem:[#allocation14 + $0x4c] sm:$0xf] (%p799_p1)  ;;  %v2552_v7 = vld [vmem:[#allocation14 + $0x58] sm:$0xf0] (%p799_p1) }
 0x1fa   : >> { %v1199_v58 = vadd.f32 %v1197_v52, %v1195_v56  ;;  %v1185_v62 = vsel %vm1184_vm6, %v3095_v33, %v1181_v59  ;;  %1449 = vmatpush.bf16.msra.mxu0 (%p799_p1), %v2607_v20  ;;  %v2591_v33 = vor.u32 (%p799_p1), %v2878_v28, %v2590_v27  ;;  %v2558_v52 = vld [vmem:[#allocation14 + $0x60] sm:$0xf] (%p799_p1)  ;;  %v2566_v56 = vld [vmem:[#allocation14 + $0x68] sm:$0xf] (%p799_p1)  ;;  %v2568_v59 = vld [vmem:[#allocation14 + $0x78] sm:$0xf0] (%p799_p1)  ;;  %v2563_v61 = vor.u32 (%p799_p1), %v2868_v53, %v2560_v55 }
 0x1fb   : >> { %1204 = vst [vmem:[#allocation2 + $0x10] sm:$0xff] %v1202_v57  ;;  %v1190_v1 = vsel %vm1187_vm7, %v1189_v63, %v1185_v62  ;;  %1478 = vmatpush.bf16.msra.mxu1 (%p799_p1), %v2611_v21  ;;  %1508 = vmatpush.bf16.msra.mxu2 (%p799_p1), %v2599_v40  ;;  %v2559_v60 = vor.u32 (%p799_p1), %v2870_v45, %v2558_v52  ;;  %v2542_v63 = vld [vmem:[#allocation14 + $0x40] sm:$0xf] (%p799_p1)  ;;  %v2862_v12 = vld [vmem:[#allocation14 + $0x2c] sm:$0xf0] (%p799_p1) }
 0x1fc   : >> { %3100 = vtanh.f32 %v1199_v58  ;;  %1207 = vst [vmem:[#allocation3 + $0x18] sm:$0xff] %v1199_v58  ;;  %1537 = vmatpush.bf16.msra.mxu3 (%p799_p1), %v2603_v38  ;;  %v2869_v58 = vld [vmem:[#allocation14 + $0x6c] sm:$0xf] (%p799_p1)  ;;  %v2551_v10 = vor.u32 (%p799_p1), %v2867_v5, %v2550_v4  ;;  %v2526_v11 = vld [vmem:[#allocation14 + $0x20] sm:$0xf] (%p799_p1)  ;;  %v2555_v14 = vor.u32 (%p799_p1), %v2865_v6, %v2552_v7 }
 0x1fd   : > { %v2860_v13 = vld [vmem:[#allocation14 + $0x24] sm:$0xf] (%p799_p1)  ;;  %v2528_v15 = vld [vmem:[#allocation14 + $0x30] sm:$0xf0] (%p799_p1)  ;;  %v2534_v16 = vld [vmem:[#allocation14 + $0x28] sm:$0xf] (%p799_p1)  ;;  %v2527_v20 = vor.u32 (%p799_p1), %v2862_v12, %v2526_v11 }
 0x1fe   : > { %1450 = vmatpush.bf16.msra.mxu0 (%p799_p1), %v2591_v33  ;;  %v2863_v17 = vld [vmem:[#allocation14 + $0x34] sm:$0xf0] (%p799_p1)  ;;  %v2861_v18 = vld [vmem:[#allocation14 + $0x2c] sm:$0xf] (%p799_p1)  ;;  %v2536_v19 = vld [vmem:[#allocation14 + $0x38] sm:$0xf0] (%p799_p1)  ;;  %v2531_v21 = vor.u32 (%p799_p1), %v2860_v13, %v2528_v15 }
 0x1ff   : > { %1479 = vmatpush.bf16.msra.mxu1 (%p799_p1), %v2595_v37  ;;  %1509 = vmatpush.bf16.msra.mxu2 (%p799_p1), %v2583_v51  ;;  %v2535_v22 = vor.u32 (%p799_p1), %v2863_v17, %v2534_v16  ;;  %v2510_v23 = vld [vmem:[#allocation14] sm:$0xf] (%p799_p1)  ;;  %v2858_v24 = vld [vmem:[#allocation14 + $0xc] sm:$0xf0] (%p799_p1)  ;;  %v2856_v25 = vld [vmem:[#allocation14 + $0x4] sm:$0xf] (%p799_p1)  ;;  %v2539_v26 = vor.u32 (%p799_p1), %v2861_v18, %v2536_v19 }
 0x200   : > { %1538 = vmatpush.bf16.msra.mxu3 (%p799_p1), %v2587_v54  ;;  %v2512_v27 = vld [vmem:[#allocation14 + $0x10] sm:$0xf0] (%p799_p1)  ;;  %v2518_v28 = vld [vmem:[#allocation14 + $0x8] sm:$0xf] (%p799_p1)  ;;  %v2859_v29 = vld [vmem:[#allocation14 + $0x14] sm:$0xf0] (%p799_p1)  ;;  %v2511_v32 = vor.u32 (%p799_p1), %v2858_v24, %v2510_v23 }
 0x201   : > { %v2857_v30 = vld [vmem:[#allocation14 + $0xc] sm:$0xf] (%p799_p1)  ;;  %v2520_v31 = vld [vmem:[#allocation14 + $0x18] sm:$0xf0] (%p799_p1)  ;;  %v2515_v33 = vor.u32 (%p799_p1), %v2856_v25, %v2512_v27  ;;  %v2519_v34 = vor.u32 (%p799_p1), %v2859_v29, %v2518_v28 }
 0x202   : >> { %v3101_v0 = vpop.eup %3100  ;;  %1451 = vmatpush.bf16.msra.mxu0 (%p799_p1), %v2575_v48  ;;  %v2523_v35 = vor.u32 (%p799_p1), %v2857_v30, %v2520_v31  ;;  %v1254_v42 = vld [vmem:[%s3908_s6] sm:$0xf] (%p799_p1) }
 0x203   : >> { %v1203_v2 = vmul.f32 %v3101_v0, %v1190_v1  ;;  %801 = sbr.rel (!%p799_p1) target bundleno = 303 (0x12f), region = 137  ;;  %1480 = vmatpush.bf16.msra.mxu1 (%p799_p1), %v2579_v44  ;;  %v2866_v0 = vld [vmem:[#allocation14 + $0x4c] sm:$0xf0] (%p799_p1)  ;;  %v2864_v1 = vld [vmem:[#allocation14 + $0x44] sm:$0xf] (%p799_p1)  ;;  %v3749_v43 = vperm.slane (%p799_p1), %v1254_v42, 0 }
 0x204   : > { %v2543_v8 = vor.u32 (%p799_p1), %v2866_v0, %v2542_v63  ;;  %v3751_v38 = vperm.slane (%p799_p1), %v1254_v42, 1  ;;  %v3755_v50 = vperm.slane (%p799_p1), %v1254_v42, 2  ;;  %v3757_v48 = vperm.slane (%p799_p1), %v1254_v42, 3 }
 0x205   : >> { %1205 = vst [vmem:[#allocation2] sm:$0xff] %v1203_v2  ;;  %v2927_v3 = vpack.c.bf16 %v1203_v2, %v1202_v57  ;;  %v2871_v57 = vld [vmem:[#allocation14 + $0x74] sm:$0xf0] (%p799_p1)  ;;  %v2571_v2 = vor.u32 (%p799_p1), %v2869_v58, %v2568_v59 }
 0x206   : > { %v2567_v62 = vor.u32 (%p799_p1), %v2871_v57, %v2566_v56  ;;  %1452 = vmatpush.bf16.msra.mxu0 (%p799_p1), %v2559_v60 }
 0x207   : >> { %2928 = vst [vmem:[%s1211_s21] sm:$0xff] %v2927_v3   ;;  %v2544_v3 = vld [vmem:[#allocation14 + $0x50] sm:$0xf0] (%p799_p1)  ;;  %1481 = vmatpush.bf16.msra.mxu1 (%p799_p1), %v2563_v61  ;;  %1539 = vmatpush.bf16.msra.mxu3 (%p799_p1), %v2571_v2 }
 0x208   : > { %1510 = vmatpush.bf16.msra.mxu2 %v2567_v62  ;;  %v2547_v9 = vor.u32 %v2864_v1, %v2544_v3 }
 0x20a   : > { %1453 = vmatpush.bf16.msra.mxu0 %v2543_v8 }
 0x20b   : > { %1482 = vmatpush.bf16.msra.mxu1 %v2547_v9  ;;  %1540 = vmatpush.bf16.msra.mxu3 %v2555_v14 }
 0x20c   : > { %1511 = vmatpush.bf16.msra.mxu2 %v2551_v10 }
 0x20e   : > { %1454 = vmatpush.bf16.msra.mxu0 %v2527_v20  ;;  %v2852_v36 = vld [vmem:[#allocation4] sm:$0xff]  ;;  %v2853_v37 = vld [vmem:[#allocation4 + $0x8] sm:$0xff]  ;;  %v2854_v40 = vld [vmem:[#allocation4 + $0x10] sm:$0xff] }
 0x20f   : > { %1483 = vmatpush.bf16.msra.mxu1 %v2531_v21  ;;  %1541 = vmatpush.bf16.msra.mxu3 %v2539_v26  ;;  %v2855_v41 = vld [vmem:[#allocation4 + $0x18] sm:$0xff] }
 0x210   : > { %1512 = vmatpush.bf16.msra.mxu2 %v2535_v22 }
 0x212   : > { %1455 = vmatpush.bf16.msra.mxu0 %v2511_v32 }
 0x213   : > { %1484 = vmatpush.bf16.msra.mxu1 %v2515_v33  ;;  %1542 = vmatpush.bf16.msra.mxu3 %v2523_v35 }
 0x214   : > { %1513 = vmatpush.bf16.msra.mxu2 %v2519_v34 }
 0x215   : > { %1456 = vmatmul.bf16.vlgmr.msra.gmra.mxu0 %v2852_v36 }
 0x216   : > { %1485 = vmatmul.bf16.vlgmr.msra.gmra.mxu1 %v2852_v36  ;;  %1543 = vmatmul.bf16.vlgmr.msra.gmra.mxu3 %v2852_v36 }
 0x217   : > { %1514 = vmatmul.bf16.vlgmr.msra.gmra.mxu2 %v2852_v36 }
 0x225   : > { %1461 = vmatmul.bf16.gmra.mxu0 %v2853_v37 }
 0x226   : > { %1490 = vmatmul.bf16.gmra.mxu1 %v2853_v37  ;;  %1548 = vmatmul.bf16.gmra.mxu3 %v2853_v37 }
 0x227   : > { %1519 = vmatmul.bf16.gmra.mxu2 %v2853_v37 }
 0x235   : > { %1466 = vmatmul.bf16.gmra.mxu0 %v2854_v40 }
 0x236   : > { %1495 = vmatmul.bf16.gmra.mxu1 %v2854_v40  ;;  %1553 = vmatmul.bf16.gmra.mxu3 %v2854_v40 }
 0x237   : > { %1524 = vmatmul.bf16.gmra.mxu2 %v2854_v40 }
 0x245   : > { %1471 = vmatmul.bf16.gmra.mxu0 %v2855_v41 }
 0x246   : > { %1500 = vmatmul.bf16.gmra.mxu1 %v2855_v41  ;;  %1558 = vmatmul.bf16.gmra.mxu3 %v2855_v41 }
 0x247   : > { %1529 = vmatmul.bf16.gmra.mxu2 %v2855_v41 }
 0x292   : > { %v1457_v39 = vpop.f32.mrf.mxu0 }
 0x293   : > { %v1458_v46 = vadd.f32 %v1457_v39, %v3749_v43  ;;  %v1486_v47 = vpop.f32.mrf.mxu1 }
 0x294   : > { %v1487_v49 = vadd.f32 %v1486_v47, %v3751_v38 }
 0x295   : > { %1564 = vst [vmem:[#allocation5] sm:$0xff] %v1458_v46 }
 0x296   : > { %1565 = vst [vmem:[#allocation5 + $0x8] sm:$0xff] %v1487_v49 }
 0x299   : > { %v1544_v52 = vpop.f32.mrf.mxu3 }
 0x29a   : > { %v1515_v44 = vpop.f32.mrf.mxu2  ;;  %v1459_v45 = vpop.f32.mrf.mxu0  ;;  %v1545_v53 = vadd.f32 %v1544_v52, %v3757_v48 }
 0x29b   : > { %v1516_v51 = vadd.f32 %v1515_v44, %v3755_v50  ;;  %v1460_v54 = vadd.f32 %v1459_v45, %v3749_v43  ;;  %v1488_v55 = vpop.f32.mrf.mxu1 }
 0x29c   : > { %v1489_v56 = vadd.f32 %v1488_v55, %v3751_v38  ;;  %1567 = vst [vmem:[#allocation5 + $0x18] sm:$0xff] %v1545_v53 }
 0x29d   : > { %1566 = vst [vmem:[#allocation5 + $0x10] sm:$0xff] %v1516_v51 }
 0x29e   : > { %1568 = vst [vmem:[#allocation5 + $0x20] sm:$0xff] %v1460_v54 }
 0x29f   : > { %1569 = vst [vmem:[#allocation5 + $0x28] sm:$0xff] %v1489_v56 }
 0x2a1   : > { %v1546_v59 = vpop.f32.mrf.mxu3 }
 0x2a2   : > { %v1517_v57 = vpop.f32.mrf.mxu2  ;;  %v1462_v60 = vpop.f32.mrf.mxu0  ;;  %v1547_v61 = vadd.f32 %v1546_v59, %v3757_v48 }
 0x2a3   : > { %v1518_v58 = vadd.f32 %v1517_v57, %v3755_v50  ;;  %v1463_v62 = vadd.f32 %v1462_v60, %v3749_v43  ;;  %v1491_v63 = vpop.f32.mrf.mxu1 }
 0x2a4   : > { %v1492_v0 = vadd.f32 %v1491_v63, %v3751_v38  ;;  %1571 = vst [vmem:[#allocation5 + $0x38] sm:$0xff] %v1547_v61 }
 0x2a5   : > { %1570 = vst [vmem:[#allocation5 + $0x30] sm:$0xff] %v1518_v58 }
 0x2a6   : > { %1572 = vst [vmem:[#allocation5 + $0x40] sm:$0xff] %v1463_v62 }
 0x2a7   : > { %1573 = vst [vmem:[#allocation5 + $0x48] sm:$0xff] %v1492_v0 }
 0x2a9   : > { %v1549_v3 = vpop.f32.mrf.mxu3 }
 0x2aa   : > { %v1520_v1 = vpop.f32.mrf.mxu2  ;;  %v1464_v4 = vpop.f32.mrf.mxu0  ;;  %v1550_v5 = vadd.f32 %v1549_v3, %v3757_v48 }
 0x2ab   : > { %v1521_v2 = vadd.f32 %v1520_v1, %v3755_v50  ;;  %v1465_v6 = vadd.f32 %v1464_v4, %v3749_v43  ;;  %v1493_v7 = vpop.f32.mrf.mxu1 }
 0x2ac   : > { %v1494_v8 = vadd.f32 %v1493_v7, %v3751_v38  ;;  %1575 = vst [vmem:[#allocation5 + $0x58] sm:$0xff] %v1550_v5 }
 0x2ad   : > { %1574 = vst [vmem:[#allocation5 + $0x50] sm:$0xff] %v1521_v2 }
 0x2ae   : > { %1576 = vst [vmem:[#allocation5 + $0x60] sm:$0xff] %v1465_v6 }
 0x2af   : > { %1577 = vst [vmem:[#allocation5 + $0x68] sm:$0xff] %v1494_v8 }
 0x2b1   : > { %v1551_v11 = vpop.f32.mrf.mxu3 }
 0x2b2   : > { %v1522_v9 = vpop.f32.mrf.mxu2  ;;  %v1467_v12 = vpop.f32.mrf.mxu0  ;;  %v1552_v13 = vadd.f32 %v1551_v11, %v3757_v48 }
 0x2b3   : > { %v1523_v10 = vadd.f32 %v1522_v9, %v3755_v50  ;;  %v1468_v14 = vadd.f32 %v1467_v12, %v3749_v43  ;;  %v1496_v15 = vpop.f32.mrf.mxu1 }
 0x2b4   : > { %v1497_v16 = vadd.f32 %v1496_v15, %v3751_v38  ;;  %1579 = vst [vmem:[#allocation5 + $0x78] sm:$0xff] %v1552_v13 }
 0x2b5   : > { %1578 = vst [vmem:[#allocation5 + $0x70] sm:$0xff] %v1523_v10 }
 0x2b6   : > { %1580 = vst [vmem:[#allocation5 + $0x80] sm:$0xff] %v1468_v14 }
 0x2b7   : > { %1581 = vst [vmem:[#allocation5 + $0x88] sm:$0xff] %v1497_v16 }
 0x2b9   : > { %v1554_v19 = vpop.f32.mrf.mxu3 }
 0x2ba   : > { %v1525_v17 = vpop.f32.mrf.mxu2  ;;  %v1469_v20 = vpop.f32.mrf.mxu0  ;;  %v1555_v21 = vadd.f32 %v1554_v19, %v3757_v48 }
 0x2bb   : > { %v1526_v18 = vadd.f32 %v1525_v17, %v3755_v50  ;;  %v1470_v22 = vadd.f32 %v1469_v20, %v3749_v43  ;;  %v1498_v23 = vpop.f32.mrf.mxu1 }
 0x2bc   : > { %v1499_v24 = vadd.f32 %v1498_v23, %v3751_v38  ;;  %1583 = vst [vmem:[#allocation5 + $0x98] sm:$0xff] %v1555_v21 }
 0x2bd   : > { %1582 = vst [vmem:[#allocation5 + $0x90] sm:$0xff] %v1526_v18 }
 0x2be   : > { %1584 = vst [vmem:[#allocation5 + $0xa0] sm:$0xff] %v1470_v22 }
 0x2bf   : > { %1585 = vst [vmem:[#allocation5 + $0xa8] sm:$0xff] %v1499_v24 }
 0x2c1   : > { %v1556_v27 = vpop.f32.mrf.mxu3 }
 0x2c2   : > { %v1527_v25 = vpop.f32.mrf.mxu2  ;;  %v1472_v28 = vpop.f32.mrf.mxu0  ;;  %v1557_v29 = vadd.f32 %v1556_v27, %v3757_v48 }
 0x2c3   : > { %v1528_v26 = vadd.f32 %v1527_v25, %v3755_v50  ;;  %v1473_v30 = vadd.f32 %v1472_v28, %v3749_v43  ;;  %v1501_v31 = vpop.f32.mrf.mxu1 }
 0x2c4   : > { %v1502_v32 = vadd.f32 %v1501_v31, %v3751_v38  ;;  %1587 = vst [vmem:[#allocation5 + $0xb8] sm:$0xff] %v1557_v29 }
 0x2c5   : > { %1586 = vst [vmem:[#allocation5 + $0xb0] sm:$0xff] %v1528_v26 }
 0x2c6   : > { %1588 = vst [vmem:[#allocation5 + $0xc0] sm:$0xff] %v1473_v30 }
 0x2c7   : > { %1589 = vst [vmem:[#allocation5 + $0xc8] sm:$0xff] %v1502_v32 }
 0x2c9   : > { %v1559_v35 = vpop.f32.mrf.mxu3 }
 0x2ca   : > { %v1530_v33 = vpop.f32.mrf.mxu2  ;;  %v1474_v36 = vpop.f32.mrf.mxu0  ;;  %v1560_v37 = vadd.f32 %v1559_v35, %v3757_v48 }
 0x2cb   : > { %v1531_v34 = vadd.f32 %v1530_v33, %v3755_v50  ;;  %v1475_v40 = vadd.f32 %v1474_v36, %v3749_v43  ;;  %v1503_v41 = vpop.f32.mrf.mxu1 }
 0x2cc   : > { %v1504_v42 = vadd.f32 %v1503_v41, %v3751_v38  ;;  %1591 = vst [vmem:[#allocation5 + $0xd8] sm:$0xff] %v1560_v37 }
 0x2cd   : > { %1590 = vst [vmem:[#allocation5 + $0xd0] sm:$0xff] %v1531_v34 }
 0x2ce   : > { %1592 = vst [vmem:[#allocation5 + $0xe0] sm:$0xff] %v1475_v40 }
 0x2cf   : > { %1593 = vst [vmem:[#allocation5 + $0xe8] sm:$0xff] %v1504_v42 }
 0x2d1   : > { %v1561_v47 = vpop.f32.mrf.mxu3 }
 0x2d2   : > { %v1532_v39 = vpop.f32.mrf.mxu2  ;;  %v1562_v49 = vadd.f32 %v1561_v47, %v3757_v48 }
 0x2d3   : > { %v1533_v46 = vadd.f32 %v1532_v39, %v3755_v50 }
 0x2d4   : > { %1595 = vst [vmem:[#allocation5 + $0xf8] sm:$0xff] %v1562_v49 }
 0x2d5   : > { %1594 = vst [vmem:[#allocation5 + $0xf0] sm:$0xff] %v1533_v46 }
 0x2d6 LB: >> { %v2753_v43 = vld [vmem:[#allocation15 + $0xe0] sm:$0xf]  ;;  %v2919_v38 = vld [vmem:[#allocation15 + $0xec] sm:$0xf0]  ;;  %v2917_v44 = vld [vmem:[#allocation15 + $0xe4] sm:$0xf]  ;;  %s3424_s19 = sphi %s3789_s19, %s1601_s19  }
 0x2d7   : >> { %v2754_v51 = vor.u32 %v2919_v38, %v2753_v43  ;;  %v2755_v52 = vld [vmem:[#allocation15 + $0xf0] sm:$0xf0]  ;;  %v2918_v45 = vld [vmem:[#allocation15 + $0xec] sm:$0xf]  ;;  %v2763_v53 = vld [vmem:[#allocation15 + $0xf8] sm:$0xf0] }
 0x2d8   : >> { %v2758_v50 = vor.u32 %v2917_v44, %v2755_v52  ;;  %v2766_v54 = vor.u32 %v2918_v45, %v2763_v53  ;;  %v2737_v55 = vld [vmem:[#allocation15 + $0xc0] sm:$0xf]  ;;  %v2915_v48 = vld [vmem:[#allocation15 + $0xcc] sm:$0xf0]  ;;  %v2913_v56 = vld [vmem:[#allocation15 + $0xc4] sm:$0xf] }
 0x2d9   : >> { %1812 = vmatpush.bf16.msra.mxu0 %v2754_v51  ;;  %v2738_v57 = vor.u32 %v2915_v48, %v2737_v55  ;;  %v2739_v58 = vld [vmem:[#allocation15 + $0xd0] sm:$0xf0]  ;;  %v2914_v59 = vld [vmem:[#allocation15 + $0xcc] sm:$0xf]  ;;  %v2747_v60 = vld [vmem:[#allocation15 + $0xd8] sm:$0xf0] }
 0x2da   : >> { %1826 = vmatpush.bf16.msra.mxu1 %v2758_v50  ;;  %1854 = vmatpush.bf16.msra.mxu3 %v2766_v54  ;;  %v2742_v61 = vor.u32 %v2913_v56, %v2739_v58  ;;  %v2750_v62 = vor.u32 %v2914_v59, %v2747_v60  ;;  %v2761_v63 = vld [vmem:[#allocation15 + $0xe8] sm:$0xf]  ;;  %v2920_v0 = vld [vmem:[#allocation15 + $0xf4] sm:$0xf0]  ;;  %v2721_v1 = vld [vmem:[#allocation15 + $0xa0] sm:$0xf] }
 0x2db   : >> { %v2762_v2 = vor.u32 %v2920_v0, %v2761_v63  ;;  %v2911_v3 = vld [vmem:[#allocation15 + $0xac] sm:$0xf0]  ;;  %v2909_v4 = vld [vmem:[#allocation15 + $0xa4] sm:$0xf]  ;;  %v2723_v5 = vld [vmem:[#allocation15 + $0xb0] sm:$0xf0] }
 0x2dc   : >> { %v2910_v6 = vld [vmem:[#allocation15 + $0xac] sm:$0xf]  ;;  %v2731_v7 = vld [vmem:[#allocation15 + $0xb8] sm:$0xf0]  ;;  %v2745_v8 = vld [vmem:[#allocation15 + $0xc8] sm:$0xf]  ;;  %v2722_v9 = vor.u32 %v2911_v3, %v2721_v1  ;;  %v2726_v13 = vor.u32 %v2909_v4, %v2723_v5 }
 0x2dd   : >> { %1813 = vmatpush.bf16.msra.mxu0 %v2738_v57  ;;  %1840 = vmatpush.bf16.msra.mxu2 %v2762_v2  ;;  %v2916_v10 = vld [vmem:[#allocation15 + $0xd4] sm:$0xf0]  ;;  %v2705_v11 = vld [vmem:[#allocation15 + $0x80] sm:$0xf]  ;;  %v2907_v12 = vld [vmem:[#allocation15 + $0x8c] sm:$0xf0]  ;;  %v2734_v14 = vor.u32 %v2910_v6, %v2731_v7 }
 0x2de   : >> { %1827 = vmatpush.bf16.msra.mxu1 %v2742_v61  ;;  %1855 = vmatpush.bf16.msra.mxu3 %v2750_v62  ;;  %v2746_v15 = vor.u32 %v2916_v10, %v2745_v8  ;;  %v2905_v16 = vld [vmem:[#allocation15 + $0x84] sm:$0xf]  ;;  %v2707_v17 = vld [vmem:[#allocation15 + $0x90] sm:$0xf0]  ;;  %v2906_v18 = vld [vmem:[#allocation15 + $0x8c] sm:$0xf]  ;;  %v2706_v22 = vor.u32 %v2907_v12, %v2705_v11 }
 0x2df   : >> { %v2715_v19 = vld [vmem:[#allocation15 + $0x98] sm:$0xf0]  ;;  %v2729_v20 = vld [vmem:[#allocation15 + $0xa8] sm:$0xf]  ;;  %v2912_v21 = vld [vmem:[#allocation15 + $0xb4] sm:$0xf0]  ;;  %v2710_v26 = vor.u32 %v2905_v16, %v2707_v17 }
 0x2e0   : >> { %v2730_v23 = vor.u32 %v2912_v21, %v2729_v20  ;;  %v2689_v24 = vld [vmem:[#allocation15 + $0x60] sm:$0xf]  ;;  %v2903_v25 = vld [vmem:[#allocation15 + $0x6c] sm:$0xf0]  ;;  %v2718_v27 = vor.u32 %v2906_v18, %v2715_v19  ;;  %v2901_v28 = vld [vmem:[#allocation15 + $0x64] sm:$0xf] }
 0x2e1   : >> { %1814 = vmatpush.bf16.msra.mxu0 %v2722_v9  ;;  %1841 = vmatpush.bf16.msra.mxu2 %v2746_v15  ;;  %v2713_v29 = vld [vmem:[#allocation15 + $0x88] sm:$0xf]  ;;  %v2908_v30 = vld [vmem:[#allocation15 + $0x94] sm:$0xf0]  ;;  %v2691_v31 = vld [vmem:[#allocation15 + $0x70] sm:$0xf0]  ;;  %v2690_v34 = vor.u32 %v2903_v25, %v2689_v24 }
 0x2e2   : >> { %1828 = vmatpush.bf16.msra.mxu1 %v2726_v13  ;;  %1856 = vmatpush.bf16.msra.mxu3 %v2734_v14  ;;  %v2902_v32 = vld [vmem:[#allocation15 + $0x6c] sm:$0xf]  ;;  %v2699_v33 = vld [vmem:[#allocation15 + $0x78] sm:$0xf0]  ;;  %v2714_v35 = vor.u32 %v2908_v30, %v2713_v29  ;;  %v2673_v36 = vld [vmem:[#allocation15 + $0x40] sm:$0xf]  ;;  %v2694_v40 = vor.u32 %v2901_v28, %v2691_v31 }
 0x2e3   : >> { %v2899_v37 = vld [vmem:[#allocation15 + $0x4c] sm:$0xf0]  ;;  %v2702_v41 = vor.u32 %v2902_v32, %v2699_v33  ;;  %v2897_v42 = vld [vmem:[#allocation15 + $0x44] sm:$0xf]  ;;  %v2697_v39 = vld [vmem:[#allocation15 + $0x68] sm:$0xf] }
 0x2e4   : >> { %v2904_v46 = vld [vmem:[#allocation15 + $0x74] sm:$0xf0]  ;;  %v2675_v47 = vld [vmem:[#allocation15 + $0x50] sm:$0xf0]  ;;  %v2898_v49 = vld [vmem:[#allocation15 + $0x4c] sm:$0xf]  ;;  %v2674_v38 = vor.u32 %v2899_v37, %v2673_v36 }
 0x2e5   : >> { %1815 = vmatpush.bf16.msra.mxu0 %v2706_v22  ;;  %1842 = vmatpush.bf16.msra.mxu2 %v2730_v23  ;;  %v2683_v43 = vld [vmem:[#allocation15 + $0x58] sm:$0xf0]  ;;  %v2698_v44 = vor.u32 %v2904_v46, %v2697_v39  ;;  %v2657_v51 = vld [vmem:[#allocation15 + $0x20] sm:$0xf]  ;;  %v2895_v52 = vld [vmem:[#allocation15 + $0x2c] sm:$0xf0]  ;;  %v2678_v45 = vor.u32 %v2897_v42, %v2675_v47 }
 0x2e6   : >> { %1829 = vmatpush.bf16.msra.mxu1 %v2710_v26  ;;  %1857 = vmatpush.bf16.msra.mxu3 %v2718_v27  ;;  %v2686_v53 = vor.u32 %v2898_v49, %v2683_v43  ;;  %v2893_v50 = vld [vmem:[#allocation15 + $0x24] sm:$0xf]  ;;  %v2681_v54 = vld [vmem:[#allocation15 + $0x48] sm:$0xf]  ;;  %v2900_v55 = vld [vmem:[#allocation15 + $0x54] sm:$0xf0]  ;;  %v2658_v58 = vor.u32 %v2895_v52, %v2657_v51 }
 0x2e7   : >> { %v2659_v48 = vld [vmem:[#allocation15 + $0x30] sm:$0xf0]  ;;  %v2894_v56 = vld [vmem:[#allocation15 + $0x2c] sm:$0xf]  ;;  %v2667_v57 = vld [vmem:[#allocation15 + $0x38] sm:$0xf0]  ;;  %v2682_v59 = vor.u32 %v2900_v55, %v2681_v54 }
 0x2e8   : >> { %v2641_v60 = vld [vmem:[#allocation15] sm:$0xf]  ;;  %v2891_v61 = vld [vmem:[#allocation15 + $0xc] sm:$0xf0]  ;;  %v2662_v62 = vor.u32 %v2893_v50, %v2659_v48  ;;  %v2670_v63 = vor.u32 %v2894_v56, %v2667_v57  ;;  %v2889_v0 = vld [vmem:[#allocation15 + $0x4] sm:$0xf] }
 0x2e9   : >> { %1816 = vmatpush.bf16.msra.mxu0 %v2690_v34  ;;  %1843 = vmatpush.bf16.msra.mxu2 %v2714_v35  ;;  %v2665_v1 = vld [vmem:[#allocation15 + $0x28] sm:$0xf]  ;;  %v2896_v2 = vld [vmem:[#allocation15 + $0x34] sm:$0xf0]  ;;  %v2643_v3 = vld [vmem:[#allocation15 + $0x10] sm:$0xf0]  ;;  %v2642_v6 = vor.u32 %v2891_v61, %v2641_v60 }
 0x2ea   : >> { %1830 = vmatpush.bf16.msra.mxu1 %v2694_v40  ;;  %1858 = vmatpush.bf16.msra.mxu3 %v2702_v41  ;;  %v2890_v4 = vld [vmem:[#allocation15 + $0xc] sm:$0xf]  ;;  %v2651_v5 = vld [vmem:[#allocation15 + $0x18] sm:$0xf0]  ;;  %v1617_v7 = vld [vmem:[#allocation2 + $0x18] sm:$0xff]  ;;  %v2666_v9 = vor.u32 %v2896_v2, %v2665_v1  ;;  %v2646_v10 = vor.u32 %v2889_v0, %v2643_v3  ;;  %s2636_s10 = sshll.u32 %s3424_s19, 4 }
 0x2eb   : >> { %v1618_v8 = vld [vmem:[#allocation2 + $0x8] sm:$0xff]  ;;  %v2654_v11 = vor.u32 %v2890_v4, %v2651_v5  ;;  %v2892_v13 = vld [vmem:[#allocation15 + $0x14] sm:$0xf0]  ;;  %s1603_s16 = sshra.s32 %s2636_s10, 3  ;;  %s2921_s30 = sshll.u32 %s3424_s19, 3 }
 0x2ec   : >> { %v2649_v12 = vld [vmem:[#allocation15 + $0x8] sm:$0xf]  ;;  %v1619_v14 = vpack.c.bf16 %v1618_v8, %v1617_v7  ;;  %s2888_s22 = sshll.u32 %s1603_s16, 5  ;;  %s2013_s2 = scalar_lea.vmem %s3622_s1, %s2921_s30 [#allocation17] }
 0x2ed   : >> { %1817 = vmatpush.bf16.msra.mxu0 %v2674_v38  ;;  %1844 = vmatpush.bf16.msra.mxu2 %v2698_v44  ;;  %v2650_v15 = vor.u32 %v2892_v13, %v2649_v12  ;;  %s3795_s23 = scalar_lea.vmem [#allocation5], %s2888_s22  ;;  %s1601_s19 = sadd.s32 1, %s3424_s19  }
 0x2ee   : >> { %1831 = vmatpush.bf16.msra.mxu1 %v2678_v45  ;;  %1859 = vmatpush.bf16.msra.mxu3 %v2686_v53  ;;  %v1608_v16 = vld [vmem:[%s3795_s23] sm:$0xff]  ;;  %v1609_v17 = vld [vmem:[%s3795_s23 + $0x8] sm:$0xff]  ;;  %v1611_v24 = vld [vmem:[%s3795_s23 + $0x18] sm:$0xff]  ;;  %p1598_p7 = scmp.ge.s32.totalorder %s1601_s19, 4  }
 0x2ef   : >> { %v1612_v25 = vld [vmem:[%s3795_s23 + $0x20] sm:$0xff]  ;;  %v1613_v27 = vld [vmem:[%s3795_s23 + $0x28] sm:$0xff]  ;;  %v1610_v41 = vld [vmem:[%s3795_s23 + $0x10] sm:$0xff]  ;;  %s2923_s3 = sshll.u32 (%p1598_p7), %s3408_s27, 5  ;;  %s2032_s15 = sshll.u32 (%p1598_p7), %s3622_s1, 4  ;;  %s2033_s15 = int_to_ptr.vmem [resolvable:$true] %s2032_s15 }
 0x2f0   : >> { %v1615_v39 = vld [vmem:[%s3795_s23 + $0x38] sm:$0xff]  ;;  %v1614_v3 = vld [vmem:[%s3795_s23 + $0x30] sm:$0xff]  ;;  %s2031_s17 = scalar_lea.hbm (%p1598_p7), %s3909_s7, %s2923_s3  ;;  %s2017_s9 = scalar_lea.sflag (%p1598_p7), [#allocation8], %s3600_s4 }
 0x2f1   : >> { %1818 = vmatpush.bf16.msra.mxu0 %v2658_v58  ;;  %1845 = vmatpush.bf16.msra.mxu2 %v2682_v59  ;;  %s2034_s21 = sshll.u32 (%p1598_p7), %s2031_s17, 4  ;;  %s3334_s27 = scalar_lea.hbm (%p1598_p7), %s3909_s7, 96  ;;  %s2035_s21 = int_to_ptr.hbm [resolvable:$true] %s2034_s21 }
 0x2f2   : >> { %1832 = vmatpush.bf16.msra.mxu1 %v2662_v62  ;;  %1860 = vmatpush.bf16.msra.mxu3 %v2670_v63  ;;  %s3328_s20 = sshra.s32 (%p1598_p7), %s2035_s21, 4  ;;  %s3329_s20 = int_to_ptr.hbm [resolvable:$true] %s3328_s20 }
 0x2f3   : > { %s3330_s10 = scalar_lea.hbm (%p1598_p7), %s3329_s20, 32  ;;  %p3335_p11 = scmp.lt.s32.totalorder (%p1598_p7), %s3329_s20, %s3909_s7 }
 0x2f4   : > { %p3331_p8 = scmp.ne.s32.totalorder (%p1598_p7), %s3329_s20, %s3330_s10  ;;  %p3336_p12 = scmp.lt.s32.totalorder (%p1598_p7), %s3334_s27, %s3330_s10 }
 0x2f5   : >> { %1819 = vmatpush.bf16.msra.mxu0 %v2642_v6  ;;  %1846 = vmatpush.bf16.msra.mxu2 %v2666_v9 }
 0x2f6   : >> { %1833 = vmatpush.bf16.msra.mxu1 %v2646_v10  ;;  %1861 = vmatpush.bf16.msra.mxu3 %v2654_v11  ;;  %p3332_p9 = pnand (%p1598_p7), %p3331_p8, %p3578_p2  ;;  %p3337_p13 = por (%p1598_p7), %p3336_p12, %p3335_p11 }
 0x2f8   : >> { %1820 = vmatmul.bf16.vlgmr.msra.gmra.mxu0 %v1619_v14  ;;  %p3333_p10 = pneg (%p1598_p7), %p3332_p9 }
 0x2f9   : >> { %1834 = vmatmul.bf16.vlgmr.msra.gmra.mxu1 %v1619_v14  ;;  %1862 = vmatmul.bf16.vlgmr.msra.gmra.mxu3 %v1619_v14 }
 0x2fa   : >> { %1847 = vmatpush.bf16.msra.mxu2 %v2650_v15  ;;  %p3338_p0 = pnand (%p1598_p7), %p3337_p13, %p3333_p10 }
 0x2fd   : >> { %1848 = vmatmul.bf16.vlgmr.msra.gmra.mxu2 %v1619_v14 }
 0x375   : >> { %v1821_v18 = vpop.f32.mrf.mxu0 }
 0x376   : >> { %v1868_v19 = vadd.f32 %v1821_v18, %v1608_v16  ;;  %v1835_v20 = vpop.f32.mrf.mxu1  ;;  %v1993_v16 = vld [vmem:[#allocation3 + $0x8] sm:$0xff] }
 0x377   : >> { %v1869_v21 = vadd.f32 %v1835_v20, %v1609_v17 }
 0x378   : >> { %v2767_v22 = vmul.f32 -1.442695, %v1868_v19 }
 0x379   : >> { %v2769_v23 = vmul.f32 -1.442695, %v1869_v21 }
 0x37a   : >> { %3102 = vpow2.f32 %v2767_v22 }
 0x37b   : >> { %3104 = vpow2.f32 %v2769_v23 }
 0x37c   : >> { %v1863_v26 = vpop.f32.mrf.mxu3 }
 0x37d   : >> { %v1871_v28 = vadd.f32 %v1863_v26, %v1611_v24  ;;  %v1823_v29 = vpop.f32.mrf.mxu0 }
 0x37e   : >> { %v1872_v30 = vadd.f32 %v1823_v29, %v1612_v25  ;;  %v1837_v31 = vpop.f32.mrf.mxu1 }
 0x37f   : >> { %v2771_v32 = vmul.f32 -1.442695, %v1871_v28  ;;  %v1873_v33 = vadd.f32 %v1837_v31, %v1613_v27 }
 0x380   : >> { %v3103_v34 = vpop.eup %3102  ;;  %v2768_v35 = vmul.f32 -1.442695, %v1872_v30  ;;  %v1849_v46 = vpop.f32.mrf.mxu2 }
 0x381   : >> { %v3105_v36 = vpop.eup %3104  ;;  %v1882_v37 = vadd.f32 1.0, %v3103_v34  ;;  %3106 = vpow2.f32 %v2771_v32  ;;  %v2770_v40 = vmul.f32 -1.442695, %v1873_v33  ;;  %v1870_v47 = vadd.f32 %v1849_v46, %v1610_v41 }
 0x382   : >> { %v1920_v42 = vadd.f32 1.0, %v3105_v36  ;;  %3108 = vpow2.f32 %v2768_v35 }
 0x383   : >> { %3110 = vrcp.f32 %v1882_v37  ;;  %v1893_v58 = vand.u32 2147483647, %v1882_v37  ;;  %v1895_v59 = vand.u32 2147483648, %v1882_v37  ;;  %vm1889_vm11 = vweird.f32 %v1882_v37 }
 0x384   : >> { %3112 = vrcp.f32 %v1920_v42  ;;  %v1865_v49 = vpop.f32.mrf.mxu3  ;;  %v1933_v61 = vand.u32 2147483648, %v1920_v42  ;;  %v1931_v62 = vand.u32 2147483647, %v1920_v42  ;;  %vm1927_vm9 = vweird.f32 %v1920_v42 }
 0x385   : >> { %3114 = vpow2.f32 %v2770_v40  ;;  %v1875_v43 = vadd.f32 %v1865_v49, %v1615_v39  ;;  %vm3816_vm12 = vcmp.eq.f32.partialorder %v1893_v58, 8.507059e+37  ;;  %v1896_v8 = vor.u32 1.1754944e-38, %v1895_v59 }
 0x386   : >> { %3116 = vtanh.f32 %v1870_v47  ;;  %v1934_v11 = vor.u32 1.1754944e-38, %v1933_v61  ;;  %vm1932_vm14 = vcmp.eq.f32.partialorder %v1931_v62, 8.507059e+37 }
 0x387   : >> { %v3107_v38 = vpop.eup %3106  ;;  %v2772_v44 = vmul.f32 -1.442695, %v1875_v43 }
 0x388   : >> { %v3109_v51 = vpop.eup %3108  ;;  %v3804_v52 = vadd.f32 1.0, %v3107_v38  ;;  %v1851_v4 = vpop.f32.mrf.mxu2 }
 0x389   : >> { %v3111_v45 = vpop.eup %3110  ;;  %v3806_v53 = vadd.f32 1.0, %v3109_v51  ;;  %3118 = vpow2.f32 %v2772_v44  ;;  %v1874_v17 = vadd.f32 %v1851_v4, %v1614_v3 }
 0x38a   : >> { %v3113_v50 = vpop.eup %3112  ;;  %v1885_v54 = vmul.f32 %v3111_v45, %v1882_v37  ;;  %3120 = vrcp.f32 %v3804_v52  ;;  %vm1890_vm8 = vweird.f32 %v3111_v45  ;;  %v1973_v19 = vand.u32 2147483648, %v3804_v52 }
 0x38b   : >> { %v3115_v55 = vpop.eup %3114  ;;  %v1923_v48 = vmul.f32 %v3113_v50, %v1920_v42  ;;  %3122 = vrcp.f32 %v3806_v53  ;;  %vm1928_vm10 = vweird.f32 %v3113_v50  ;;  %vm1891_vm13 = vmor %vm1889_vm11, %vm1890_vm8  ;;  %v1910_v26 = vand.u32 2147483648, %v3806_v53 }
 0x38c   : >> { %v1886_v56 = vsub.f32 1.0, %v1885_v54  ;;  %v3810_v57 = vadd.f32 1.0, %v3115_v55  ;;  %v3117_v63 = vpop.eup %3116  ;;  %vm1929_vm15 = vmor %vm1927_vm9, %vm1928_vm10  ;;  %vm1904_vm0 = vweird.f32 %v3806_v53  ;;  %v1908_v31 = vand.u32 2147483647, %v3806_v53 }
 0x38d   : >> { %v1924_v60 = vsub.f32 1.0, %v1923_v48  ;;  %v1911_v41 = vor.u32 1.1754944e-38, %v1910_v26  ;;  %vm1967_vm5 = vweird.f32 %v3804_v52  ;;  %v1971_v46 = vand.u32 2147483647, %v3804_v52 }
 0x38e   : >> { %3124 = vrcp.f32 %v3810_v57  ;;  %v1887_v0 = vmul.f32 %v3111_v45, %v1886_v56  ;;  %v1948_v33 = vand.u32 2147483648, %v3810_v57  ;;  %v1946_v35 = vand.u32 2147483647, %v3810_v57 }
 0x38f   : >> { %v3119_v1 = vpop.eup %3118  ;;  %v1925_v2 = vmul.f32 %v3113_v50, %v1924_v60  ;;  %vm1909_vm6 = vcmp.eq.f32.partialorder %v1908_v31, 8.507059e+37  ;;  %vm1942_vm8 = vweird.f32 %v3810_v57  ;;  %vm1972_vm11 = vcmp.eq.f32.partialorder %v1971_v46, 8.507059e+37 }
 0x390   : >> { %v3814_v5 = vpop.eup %3120  ;;  %v1888_v6 = vadd.f32 %v3111_v45, %v1887_v0  ;;  %v3820_v9 = vadd.f32 1.0, %v3119_v1  ;;  %vm1947_vm10 = vcmp.eq.f32.partialorder %v1946_v35, 8.507059e+37 }
 0x391   : >> { %v3123_v10 = vpop.eup %3122  ;;  %v1963_v12 = vmul.f32 %v3814_v5, %v3804_v52  ;;  %v1926_v13 = vadd.f32 %v3113_v50, %v1925_v2  ;;  %vm1968_vm2 = vweird.f32 %v3814_v5  ;;  %v1994_v52 = vld [vmem:[#allocation3 + $0x10] sm:$0xff] }
 0x392   : >> { %v1900_v14 = vmul.f32 %v3123_v10, %v3806_v53  ;;  %v1892_v15 = vsel %vm1891_vm13, %v3111_v45, %v1888_v6  ;;  %3126 = vrcp.f32 %v3820_v9  ;;  %vm1905_vm1 = vweird.f32 %v3123_v10  ;;  %vm3847_vm7 = vmor %vm1967_vm5, %vm1968_vm2 }
 0x393   : >> { %v1964_v18 = vsub.f32 1.0, %v1963_v12  ;;  %v1897_v20 = vsel %vm3816_vm12, %v1896_v8, %v1892_v15  ;;  %v1930_v21 = vsel %vm1929_vm15, %v3113_v50, %v1926_v13  ;;  %3128 = vtanh.f32 %v1874_v17  ;;  %vm1906_vm4 = vmor %vm1904_vm0, %vm1905_vm1 }
 0x394   : >> { %v3125_v22 = vpop.eup %3124  ;;  %v1901_v23 = vsub.f32 1.0, %v1900_v14  ;;  %v1935_v24 = vsel %vm1932_vm14, %v1934_v11, %v1930_v21  ;;  %v1997_v25 = vmul.f32 %v3117_v63, %v1897_v20  ;;  %v1949_v53 = vor.u32 1.1754944e-38, %v1948_v33 }
 0x395   : >> { %v1965_v27 = vmul.f32 %v3814_v5, %v1964_v18  ;;  %v1938_v28 = vmul.f32 %v3125_v22, %v3810_v57  ;;  %v1995_v29 = vmul.f32 %v1993_v16, %v1935_v24  ;;  %vm1943_vm3 = vweird.f32 %v3125_v22 }
 0x396   : >> { %v1902_v30 = vmul.f32 %v3123_v10, %v1901_v23  ;;  %vm1944_vm9 = vmor %vm1942_vm8, %vm1943_vm3  ;;  %v1974_v50 = vor.u32 1.1754944e-38, %v1973_v19  ;;  %v1988_v63 = vand.u32 2147483648, %v3820_v9  ;;  %vm1982_vm13 = vweird.f32 %v3820_v9 }
 0x397   : >> { %v1939_v32 = vsub.f32 1.0, %v1938_v28  ;;  %v1999_v34 = vadd.f32 %v1997_v25, %v1995_v29  ;;  %v1966_v37 = vadd.f32 %v3814_v5, %v1965_v27  ;;  %v1986_v0 = vand.u32 2147483647, %v3820_v9 }
 0x398   : >> { %v3127_v36 = vpop.eup %3126  ;;  %v1903_v40 = vadd.f32 %v3123_v10, %v1902_v30  ;;  %v1989_v2 = vor.u32 1.1754944e-38, %v1988_v63 }
 0x399   : >> { %v1940_v42 = vmul.f32 %v3125_v22, %v1939_v32  ;;  %3130 = vtanh.f32 %v1999_v34  ;;  %2007 = vst [vmem:[#allocation3 + $0x8] sm:$0xff] %v1999_v34  ;;  %v1978_v39 = vmul.f32 %v3127_v36, %v3820_v9  ;;  %v3129_v51 = vpop.eup %3128  ;;  %v1970_v45 = vsel %vm3847_vm7, %v3814_v5, %v1966_v37 }
 0x39a   : >> { %v1907_v47 = vsel %vm1906_vm4, %v3123_v10, %v1903_v40  ;;  %v1975_v58 = vsel %vm1972_vm11, %v1974_v50, %v1970_v45  ;;  %vm1983_vm12 = vweird.f32 %v3127_v36  ;;  %vm1987_vm15 = vcmp.eq.f32.partialorder %v1986_v0, 8.507059e+37 }
 0x39b   : >> { %v1979_v43 = vsub.f32 1.0, %v1978_v39  ;;  %v1912_v38 = vsel %vm1909_vm6, %v1911_v41, %v1907_v47  ;;  %v1941_v44 = vadd.f32 %v3125_v22, %v1940_v42  ;;  %vm1984_vm14 = vmor %vm1982_vm13, %vm1983_vm12 }
 0x39c   : >> { %v1998_v55 = vmul.f32 %v3129_v51, %v1912_v38 }
 0x39d   : >> { %v1945_v54 = vsel %vm1944_vm9, %v3125_v22, %v1941_v44  ;;  %v1980_v48 = vmul.f32 %v3127_v36, %v1979_v43 }
 0x39e   : >> { %v1950_v56 = vsel %vm1947_vm10, %v1949_v53, %v1945_v54 }
 0x39f   : >> { %v3131_v57 = vpop.eup %3130  ;;  %v1996_v59 = vmul.f32 %v1994_v52, %v1950_v56  ;;  %v1981_v62 = vadd.f32 %v3127_v36, %v1980_v48 }
 0x3a0   : >> { %v2003_v60 = vmul.f32 %v3131_v57, %v1975_v58 }
 0x3a1   : >> { %v2000_v61 = vadd.f32 %v1998_v55, %v1996_v59  ;;  %v1985_v1 = vsel %vm1984_vm14, %v3127_v36, %v1981_v62 }
 0x3a2   : >> { %2005 = vst [vmem:[#allocation2 + $0x18] sm:$0xff] %v2003_v60  ;;  %v1990_v4 = vsel %vm1987_vm15, %v1989_v2, %v1985_v1 }
 0x3a3   : >> { %3132 = vtanh.f32 %v2000_v61  ;;  %2008 = vst [vmem:[#allocation3 + $0x10] sm:$0xff] %v2000_v61 }
 0x3a9   : >> { %v3133_v3 = vpop.eup %3132 }
 0x3aa   : >> { %v2004_v5 = vmul.f32 %v3133_v3, %v1990_v4  ;;  %1600 = sbr.rel (!%p1598_p7) target bundleno = 726 (0x2d6), region = 148 }
 0x3ac   : >> { %2006 = vst [vmem:[#allocation2 + $0x8] sm:$0xff] %v2004_v5  ;;  %v2932_v6 = vpack.c.bf16 %v2004_v5, %v2003_v60 }
 0x3ae   : >> { %2933 = vst [vmem:[%s2013_s2] sm:$0xff] %v2932_v6  }
 0x3af   : > { %3341 = shalt.err (!%p3338_p0)
}
 0x3b0   : > { %s3436_s4 = smov 64   ;;  %s3437_s1 = smov 4  }
 0x3b1   : > { %2956 = dma.vmem_to_hbm [thread:$0]  (%p3578_p2), %s2033_s15, 512, %s2035_s21, %s2017_s9, %s3436_s4, %s3436_s4, %s3437_s1  }
 0x3b2 PF: > { %p2993_p4 = scmp.ge.s32.totalorder %s3416_s29, 2  ;;  %s2049_s30 = sand.u32 1, %s3396_s24  }
 0x3b3   : > { %s2050_s2 = scalar_lea.sflag [#allocation8], %s2049_s30 }
 0x3b4   : > { %p2979_p6 = pnand %p2993_p4, %p3586_p5 }
 0x3b6   : > { %p2980_p3 = pneg %p2979_p6 }
 0x3b8   : > { %3391 = dma.done.wait (%p2980_p3), %s2050_s2, 512  }
 0x3b9   : > { %3393 = vsyncadd (%p2980_p3), %s2050_s2, 4294966784  ;;  %s26_s29 = sadd.s32 1, %s3416_s29   ;;  %s3935_s24 = smov %s3400_s25 }
 0x3ba   : > { %p23_p1 = scmp.ge.s32.totalorder %s26_s29, 5   ;;  %s3936_s25 = smov %s3404_s26 }
 0x3bb   : > { %s3937_s26 = smov %s3584_s14  ;;  %s3938_s27 = smov %s3412_s28 }
 0x3bc   : > { %s3939_s28 = smov %s3941_s13  ;;  %25 = sbr.rel (!%p23_p1) target bundleno = 14 (0xe), region = 159 }
 0x3c1   :  { %2056 = vsyncpa [#allocation7], 1 }
 0x3c2   :  { %2058 = vsyncpa [#allocation7 + $0x1], 1 }
 0x3c3   :  { %2059 = vsyncpa [#allocation10], 1 }
 0x3c4   :  { %2060 = vsyncpa [#allocation13], 1 }
 0x3c5   :  { %2061 = vsyncpa [#allocation16], 1 }
 0x3c6   :  { %2062 = vsyncpa [#allocation8], 1 }
 0x3c7   :  { %2064 = vsyncpa [#allocation8 + $0x1], 1 }

</bundles_post_ra>
